<compile_context>
chip_gen: v7x
topology: tpu7x:2x2x1
jax: 0.10.0
libtpu: 0.0.40
codegen_flags: <defaults>
</compile_context>

<pallas_src>
import jax
import jax.numpy as jnp
from jax.experimental import pallas as pl
from jax.experimental.pallas import tpu as pltpu

PLANES = [64, 128, 256, 512]          # hard-coded in AdapterHyperNet
RESNET_FEAT_DIM = 512                 # ResNet18Fc.output_num()
HYPER_TN = 32000                      # 352000 = 11 * 32000 ; 32000 = 250 * 128


# ---------------------------------------------------------------------------
# Pallas kernels
# ---------------------------------------------------------------------------
def _hyper_head_kernel(emb_ref, mw_ref, mb_ref, w_ref, b_ref, o_ref):
    """Fused AdapterHyperNet: mlp (Linear+ReLU) + 20 adapter linears
    (concatenated along the output dim, tiled over N)."""
    # 1x32 @ 32x32 mlp is ~1 MXU pass -> just recompute per output tile.
    feat = jnp.maximum(
        jnp.dot(emb_ref[...], mw_ref[...], preferred_element_type=jnp.float32)
        + mb_ref[...],
        0.0,
    )
    o_ref[...] = (
        jnp.dot(feat.astype(w_ref.dtype), w_ref[...],
                preferred_element_type=jnp.float32)
        + b_ref[...]
    )


def _feat_head_kernel(x_ref, ws_ref, bs_ref, wh_ref, bh_ref, wf_ref, bf_ref,
                      h_ref, y_ref):
    """Fused stand-in feature projection (ReLU) + hidden_layer + fc."""
    feats = jnp.maximum(
        jnp.dot(x_ref[...], ws_ref[...], preferred_element_type=jnp.float32)
        + bs_ref[...],
        0.0,
    )
    h = (
        jnp.dot(feats, wh_ref[...], preferred_element_type=jnp.float32)
        + bh_ref[...]
    )
    h_ref[...] = h
    y_ref[...] = (
        jnp.dot(h, wf_ref[...], preferred_element_type=jnp.float32)
        + bf_ref[...]
    )


# ---------------------------------------------------------------------------
# Pallas wrappers
# ---------------------------------------------------------------------------
def pallas_hyper_head(emb, mlp_w, mlp_b, w_all, b_all, tn=HYPER_TN):
    """(1,E)->(1,H)->(1,352000) hypernetwork head, tiled over the output dim.

    No padding/slicing: tn divides N exactly and is a multiple of 128.
    """
    E = emb.shape[1]
    H, N = w_all.shape
    assert N % tn == 0 and tn % 128 == 0
    wbytes = jnp.dtype(w_all.dtype).itemsize
    cost = pl.CostEstimate(
        flops=2 * H * N + 2 * E * H,
        bytes_accessed=H * N * wbytes + N * 4 + N * 4,  # weight + bias + output
        transcendentals=0,
    )
    return pl.pallas_call(
        _hyper_head_kernel,
        out_shape=jax.ShapeDtypeStruct((1, N), jnp.float32),
        grid=(N // tn,),
        in_specs=[
            pl.BlockSpec((1, E), lambda j: (0, 0)),      # client embedding
            pl.BlockSpec((E, H), lambda j: (0, 0)),      # mlp weight
            pl.BlockSpec((1, H), lambda j: (0, 0)),      # mlp bias
            pl.BlockSpec((H, tn), lambda j: (0, j)),     # concat adapter weights
            pl.BlockSpec((1, tn), lambda j: (0, j)),     # concat adapter biases
        ],
        out_specs=pl.BlockSpec((1, tn), lambda j: (0, j)),
        compiler_params=pltpu.CompilerParams(
            dimension_semantics=("parallel",),
        ),
        cost_estimate=cost,
    )(emb, mlp_w, mlp_b, w_all, b_all)


def pallas_feat_head(x_flat, ws, bs, wh, bh, wf, bf):
    """Fused stand-in feature extractor + hidden_layer + fc (one launch)."""
    B, F = x_flat.shape
    R = ws.shape[1]
    Hh = wh.shape[1]
    C = wf.shape[1]
    # TODO(synk): if in_feat ever becomes real image size (3*224*224), this
    # whole-problem-in-one-tile kernel needs a K-tiled reduction path instead.
    return pl.pallas_call(
        _feat_head_kernel,
        out_shape=(
            jax.ShapeDtypeStruct((B, Hh), jnp.float32),
            jax.ShapeDtypeStruct((B, C), jnp.float32),
        ),
        grid=(1,),
        in_specs=[
            pl.BlockSpec((B, F), lambda i: (0, 0)),
            pl.BlockSpec((F, R), lambda i: (0, 0)),
            pl.BlockSpec((1, R), lambda i: (0, 0)),
            pl.BlockSpec((R, Hh), lambda i: (0, 0)),
            pl.BlockSpec((1, Hh), lambda i: (0, 0)),
            pl.BlockSpec((Hh, C), lambda i: (0, 0)),
            pl.BlockSpec((1, C), lambda i: (0, 0)),
        ],
        out_specs=(
            pl.BlockSpec((B, Hh), lambda i: (0, 0)),
            pl.BlockSpec((B, C), lambda i: (0, 0)),
        ),
    )(x_flat, ws, bs, wh, bh, wf, bf)


# ---------------------------------------------------------------------------
# Parameter construction (deterministic, synthetic)
# ---------------------------------------------------------------------------
def init_params(key, embed_dim, hidden_dim, num_classes, in_feat):
    keys = iter(jax.random.split(key, 64))

    def lin(kin, kout):
        w = 0.02 * jax.random.normal(next(keys), (kin, kout), jnp.float32)
        b = 0.02 * jax.random.normal(next(keys), (kout,), jnp.float32)
        return w, b

    params = {}
    # nn.Embedding(1, embed_dim); forward always looks up index 0.
    params["client_embedding"] = 0.02 * jax.random.normal(
        next(keys), (1, embed_dim), jnp.float32
    )
    # AdapterHyperNet.mlp = Linear(embed_dim, hidden_dim) + ReLU
    params["mlp_w"], params["mlp_b"] = lin(embed_dim, hidden_dim)
    params["mlp_b2d"] = params["mlp_b"].reshape(1, hidden_dim)
    # 4 x 5 adapter head linears, concatenated along the output dim so the
    # hypernetwork head becomes a single tiled matmul. Weight stored in bf16
    # once at init (the head is pure HBM-bandwidth bound); accum stays f32.
    w_list, b_list, segments = [], [], []
    for plane in PLANES:
        for out_dim in (plane, plane, plane * plane, plane, plane):
            w, b = lin(hidden_dim, out_dim)
            w_list.append(w)
            b_list.append(b)
            segments.append(out_dim)
    params["hyper_w_all"] = jnp.concatenate(w_list, axis=1).astype(jnp.bfloat16)
    params["hyper_b_all"] = jnp.concatenate(b_list, axis=0).reshape(1, -1)  # (1,352000)
    # TODO(synk): ResNet18Fc_Adapter definition is not provided in the source;
    # stand-in: flatten NCHW input and project to the 512-d ResNet18 feature size.
    params["stand_in_w"], sb = lin(in_feat, RESNET_FEAT_DIM)
    params["stand_in_b"] = sb.reshape(1, -1)
    # hidden_layer = Linear(512, 128); fc = Linear(128, num_classes)
    params["hidden_w"], hb = lin(RESNET_FEAT_DIM, 128)
    params["hidden_b"] = hb.reshape(1, -1)
    params["fc_w"], fb = lin(128, num_classes)
    params["fc_b"] = fb.reshape(1, -1)
    return params, segments


# ---------------------------------------------------------------------------
# Model forward
# ---------------------------------------------------------------------------
def hypernetwork_forward(params, segments):
    # embedding lookup of index 0 -> (1, E); mlp fused into the hyper-head kernel.
    out = pallas_hyper_head(
        params["client_embedding"],
        params["mlp_w"],
        params["mlp_b2d"],
        params["hyper_w_all"],
        params["hyper_b_all"],
    )[0]

    names = ["conv.0.weight", "conv.0.bias", "conv.1.weight", "bn.weight", "bn.bias"]
    weights = {}
    off, idx = 0, 0
    for i, plane in enumerate(PLANES):
        key_prefix = "adapter." + str(i)   # matches torch source (no trailing '.')
        for name in names:
            size = segments[idx]
            chunk = out[off: off + size]                   # .view(-1)
            if name == "conv.1.weight":
                chunk = chunk.reshape(plane, plane, 1, 1)  # .view(plane, plane, 1, 1)
            weights[key_prefix + name] = chunk
            off += size
            idx += 1
    return weights


def model_forward(params, segments, x):
    # 1) hypernetwork generates adapter weights from the client embedding
    weights = hypernetwork_forward(params, segments)
    # 2) feature extractor + 3) hidden_layer + fc, one fused Pallas launch.
    # TODO(synk): ResNet18Fc_Adapter (where `weights` would be load_state_dict'ed)
    # has no provided definition; using a fixed Pallas projection to 512 features.
    B = x.shape[0]
    x_flat = x.reshape(B, -1)
    hidden, y = pallas_feat_head(
        x_flat,
        params["stand_in_w"], params["stand_in_b"],
        params["hidden_w"], params["hidden_b"],
        params["fc_w"], params["fc_b"],
    )
    return hidden, y, weights


# ---------------------------------------------------------------------------
if __name__ == "__main__":
    EMBED_DIM = 32
    HIDDEN_DIM = 32
    NUM_CLASSES = 10
    B, C, Hs, Ws = 2, 3, 16, 16

    key = jax.random.PRNGKey(0)
    kp, kx = jax.random.split(key)
    params, segments = init_params(kp, EMBED_DIM, HIDDEN_DIM, NUM_CLASSES, C * Hs * Ws)
    x = jax.random.normal(kx, (B, C, Hs, Ws), jnp.float32)   # NCHW, like PyTorch

    hidden, y, weights = model_forward(params, segments, x)
    jax.block_until_ready((hidden, y, weights["adapter.3conv.1.weight"]))

    assert hidden.shape == (B, 128)
    assert y.shape == (B, NUM_CLASSES)
    assert weights["adapter.3conv.1.weight"].shape == (512, 512, 1, 1)
    assert weights["adapter.0bn.bias"].shape == (64,)
    print("KERNEL_OK")
</pallas_src>

<mosaic_0001>
module attributes {stable_mosaic.version = 11 : i64} {
  func.func @_hyper_head_kernel(%arg0: i32, %arg1: memref<1x32xf32, #tpu.memory_space<vmem>>, %arg2: memref<32x32xf32, #tpu.memory_space<vmem>>, %arg3: memref<1x32xf32, #tpu.memory_space<vmem>>, %arg4: memref<32x32000xbf16, #tpu.memory_space<vmem>>, %arg5: memref<1x32000xf32, #tpu.memory_space<vmem>>, %arg6: memref<1x32000xf32, #tpu.memory_space<vmem>>) attributes {dimension_semantics = [#tpu.dimension_semantics<parallel>], iteration_bounds = array<i64: 11>, scalar_prefetch = 0 : i64, scratch_operands = 0 : i64, tpu.core_type = #tpu.core_type<tc>, window_params = [{pipeline_mode = #tpu.pipeline_mode<synchronous>, transform_indices = @transform_0, window_bounds = array<i64: 1, 32>}, {pipeline_mode = #tpu.pipeline_mode<synchronous>, transform_indices = @transform_1, window_bounds = array<i64: 32, 32>}, {pipeline_mode = #tpu.pipeline_mode<synchronous>, transform_indices = @transform_2, window_bounds = array<i64: 1, 32>}, {transform_indices = @transform_3, window_bounds = array<i64: 32, 32000>}, {transform_indices = @transform_4, window_bounds = array<i64: 1, 32000>}, {transform_indices = @transform_5, window_bounds = array<i64: 1, 32000>}]} {
    %c0 = arith.constant 0 : index
    %c0_0 = arith.constant 0 : index
    %0 = vector.load %arg1[%c0, %c0_0] : memref<1x32xf32, #tpu.memory_space<vmem>>, vector<1x32xf32>
    %c0_1 = arith.constant 0 : index
    %c0_2 = arith.constant 0 : index
    %1 = vector.load %arg2[%c0_1, %c0_2] : memref<32x32xf32, #tpu.memory_space<vmem>>, vector<32x32xf32>
    %cst = arith.constant dense<0.000000e+00> : vector<1x32xf32>
    %2 = tpu.matmul %0, %1, %cst {dimension_numbers = #tpu.dot_dimension_numbers<[1], [0], [0], [1], [0, 0, 1, 1], [], []>} : vector<1x32xf32>, vector<32x32xf32>, vector<1x32xf32> -> vector<1x32xf32>
    %c0_3 = arith.constant 0 : index
    %c0_4 = arith.constant 0 : index
    %3 = vector.load %arg3[%c0_3, %c0_4] : memref<1x32xf32, #tpu.memory_space<vmem>>, vector<1x32xf32>
    %4 = arith.addf %2, %3 : vector<1x32xf32>
    %cst_5 = arith.constant 0.000000e+00 : f32
    %5 = vector.broadcast %cst_5 : f32 to vector<1x32xf32>
    %6 = arith.maximumf %4, %5 : vector<1x32xf32>
    %7 = arith.truncf %6 : vector<1x32xf32> to vector<1x32xbf16>
    %c0_6 = arith.constant 0 : index
    %c0_7 = arith.constant 0 : index
    %8 = vector.load %arg4[%c0_6, %c0_7] : memref<32x32000xbf16, #tpu.memory_space<vmem>>, vector<32x32000xbf16>
    %cst_8 = arith.constant dense<0.000000e+00> : vector<1x32000xf32>
    %9 = tpu.matmul %7, %8, %cst_8 {dimension_numbers = #tpu.dot_dimension_numbers<[1], [0], [0], [1], [0, 0, 1, 1], [], []>} : vector<1x32xbf16>, vector<32x32000xbf16>, vector<1x32000xf32> -> vector<1x32000xf32>
    %c0_9 = arith.constant 0 : index
    %c0_10 = arith.constant 0 : index
    %10 = vector.load %arg5[%c0_9, %c0_10] : memref<1x32000xf32, #tpu.memory_space<vmem>>, vector<1x32000xf32>
    %11 = arith.addf %9, %10 : vector<1x32000xf32>
    %c0_11 = arith.constant 0 : index
    %c0_12 = arith.constant 0 : index
    %12 = vector.load %arg6[%c0_11, %c0_12] : memref<1x32000xf32, #tpu.memory_space<vmem>>, vector<1x32000xf32>
    tpu.vector_store %arg6[%c0_11, %c0_12], %11 {strides = array<i32>} : memref<1x32000xf32, #tpu.memory_space<vmem>>, vector<1x32000xf32>,
    return
  }
  func.func @transform_0(%arg0: i32) -> (i32, i32) {
    %c0_i32 = arith.constant 0 : i32
    %c0_i32_0 = arith.constant 0 : i32
    %c0_i32_1 = arith.constant 0 : i32
    return %c0_i32, %c0_i32_0 : i32, i32
  }
  func.func @transform_1(%arg0: i32) -> (i32, i32) {
    %c0_i32 = arith.constant 0 : i32
    %c0_i32_0 = arith.constant 0 : i32
    %c0_i32_1 = arith.constant 0 : i32
    return %c0_i32, %c0_i32_0 : i32, i32
  }
  func.func @transform_2(%arg0: i32) -> (i32, i32) {
    %c0_i32 = arith.constant 0 : i32
    %c0_i32_0 = arith.constant 0 : i32
    %c0_i32_1 = arith.constant 0 : i32
    return %c0_i32, %c0_i32_0 : i32, i32
  }
  func.func @transform_3(%arg0: i32) -> (i32, i32) {
    %c0_i32 = arith.constant 0 : i32
    %c0_i32_0 = arith.constant 0 : i32
    return %c0_i32, %arg0 : i32, i32
  }
  func.func @transform_4(%arg0: i32) -> (i32, i32) {
    %c0_i32 = arith.constant 0 : i32
    %c0_i32_0 = arith.constant 0 : i32
    return %c0_i32, %arg0 : i32, i32
  }
  func.func @transform_5(%arg0: i32) -> (i32, i32) {
    %c0_i32 = arith.constant 0 : i32
    %c0_i32_0 = arith.constant 0 : i32
    return %c0_i32, %arg0 : i32, i32
  }
}

</mosaic_0001>

<bundles_post_ra>
// kernel: tpu_custom_call.1
= control target key start
LH: loop header
LB: loop body
LE: loop exit
PB: predicated region body
PF: predicated region fallthrough
CT: control target
= control target key end

     0   :  { %s15487_s0 = inlined_call_operand.hbm [shape: f32[1,32], index: 0, kind: input, shape index: {}]   ;;  %s15488_s1 = inlined_call_operand.hbm [shape: f32[32,32], index: 1, kind: input, shape index: {}]   ;;  %s15489_s2 = inlined_call_operand.hbm [shape: f32[1,32], index: 2, kind: input, shape index: {}]   ;;  %s15490_s3 = inlined_call_operand.hbm [shape: bf16[32,352000], index: 3, kind: input, shape index: {}]   ;;  %s15491_s4 = inlined_call_operand.hbm [shape: f32[1,352000], index: 4, kind: input, shape index: {}]   ;;  %s15492_s5 = inlined_call_operand.hbm [shape: f32[1,352000], index: 5, kind: output, shape index: {}]  }
   0x1   :  { %15504 = sst [smem:[#allocation19_spill]] %s15488_s1 }
   0x2   :  { %15505 = sst [smem:[#allocation20_spill]] %s15490_s3 }
   0x3   :  { %10 = vsyncpa [#allocation3], 0 }
   0x4   :  { %11 = vsyncpa [#allocation6], 0 }
   0x5   :  { %12 = vsyncpa [#allocation9], 0 }
   0x6   :  { %14 = vsyncpa [#allocation9 + $0x1], 0 }
   0x7   :  { %15 = vsyncpa [#allocation4], 0 }
   0x8   :  { %17 = vsyncpa [#allocation4 + $0x1], 0  ;;  %s13612_s18 = smov 0   ;;  %s13614_s19 = smov 0  }
   0x9   :  { %s13616_s20 = smov 0   ;;  %s13618_s21 = smov 0  }
   0xa LB: > { %s13633_s22 = sadd.s32 4294967295, %s13564_s21   ;;  %s11834_s23 = sadd.s32 4294967294, %s13564_s21   ;;  %s13564_s21 = sphi %s13618_s21, %s15534_s21   ;;  %s13560_s20 = sphi %s13616_s20, %s15538_s20   ;;  %s13556_s19 = sphi %s13614_s19, %s15537_s19   ;;  %s13552_s18 = sphi %s13612_s18, %s15536_s18  }
   0xb   : > { %s13637_s24 = sadd.s32 1, %s13564_s21   ;;  %s93_s25 = sadd.s32 1, %s13560_s20 }
   0xc   : > { %15506 = sst [smem:[#allocation16_spill]] %s13637_s24  ;;  %s90_s26 = ssub.s32 %s13564_s21, %s13637_s24 }
   0xd   : > { %p100_p0 = scmp.ne.s32.totalorder %s13560_s20, %s13556_s19  ;;  %p91_p1 = scmp.eq.s32.totalorder %s90_s26, 0 }
   0xe   : > { %p101_p2 = scmp.eq.s32.totalorder %s13564_s21, 0  ;;  %p106_p3 = scmp.ne.s32.totalorder %s13556_s19, %s13552_s18 }
   0xf   : > { %p15493_p4 = scmp.eq.s32.totalorder %s13633_s22, 0  ;;  %p156_p7 = scmp.eq.s32.totalorder %s13633_s22, 10 }
  0x10   : > { %s13649_s27 = scalar_select %p91_p1, %s13560_s20, %s93_s25  }
  0x11   : > { %p13651_p5 = por %p101_p2, %p100_p0  ;;  %p13657_p6 = por %p15493_p4, %p106_p3 }
  0x12   : > { %15507 = sst [smem:[#allocation17_spill]] %s13649_s27  ;;  %p162_p8 = scmp.eq.s32.totalorder %s11834_s23, 10 }
  0x13   : > { %s15508_s28 = scalar_select %p13651_p5, 1, 0 }
  0x14   : > { %s15509_s29 = scalar_select %p13657_p6, 1, 0 }
  0x15   : > { %p11835_p9 = scmp.ge.s32.totalorder %s13564_s21, 1  ;;  %p169_p10 = scmp.lt.s32.totalorder %s13564_s21, 12 }
  0x16   : > { %p13664_p11 = por %p156_p7, %p100_p0  ;;  %p13668_p12 = por %p162_p8, %p106_p3 }
  0x17   : > { %p13672_p13 = pnand %p11835_p9, %p169_p10  ;;  %s13566_s8 = smov [#allocation5]  }
  0x18   : > { %s15510_s30 = scalar_select %p13664_p11, 1, 0 }
  0x19   : > { %s15511_s6 = scalar_select %p13668_p12, 1, 0 }
  0x1a   : > { %s15513_s7 = scalar_select %p13672_p13, 1, 0 }
  0x1b   : > { %15512 = sst [smem:[#allocation18_spill]] %s15511_s6  ;;  %p12522_p1 = pneg %p13672_p13 }
  0x1c   : > { %s192_s9 = sshll.u32 %s13566_s8, 4  ;;  %s217_s11 = sand.u32 1, %s13564_s21   ;;  %s193_s9 = int_to_ptr.vmem [resolvable:$true] %s192_s9 }
  0x1d   : > { %p13680_p2 = pnand %p12522_p1, %p15493_p4  ;;  %s15515_s1 = sld [smem:[#allocation19_spill]] }
  0x1f   : > { %s15514_s10 = scalar_select %p13680_p2, 1, 0 }
  0x20   : > { %p13694_p7 = pneg %p13680_p2 }
  0x23   : > { %s13346_s14 = scalar_lea.hbm %s15515_s1, 512 }
  0x24   : > { %p13347_p3 = scmp.ne.s32.totalorder %s15515_s1, %s13346_s14  ;;  %p13353_p10 = scmp.lt.u32.totalorder %s13346_s14, %s15515_s1 }
  0x26   : > { %p13349_p8 = pnand %p13694_p7, %p13347_p3 }
  0x28   : > { %p13350_p9 = pneg %p13349_p8 }
  0x2a   : > { %p13355_p1 = pnand %p13353_p10, %p13350_p9 }
  0x2c   : > { %13358 = shalt.err (!%p13355_p1)
}
  0x2d   : > { %s13359_s26 = scalar_lea.vmem %s193_s9, 512  ;;  %p13367_p11 = scmp.lt.s32.totalorder %s193_s9, %s193_s9 }
  0x2e   : > { %p13360_p4 = scmp.ne.s32.totalorder %s193_s9, %s13359_s26  ;;  %p13368_p6 = scmp.lt.s32.totalorder %s13359_s26, %s13359_s26 }
  0x30   : > { %p13362_p0 = pnand %p13360_p4, %p13694_p7  ;;  %p13369_p13 = por %p13368_p6, %p13367_p11 }
  0x32   : > { %p13363_p12 = pneg %p13362_p0 }
  0x34   : > { %p13370_p5 = pnand %p13369_p13, %p13363_p12 }
  0x36   : > { %13373 = shalt.err (!%p13370_p5)
}
  0x37   : > { %s13567_s8 = smov 128   ;;  %s13568_s12 = smov 8  }
  0x38   : > { %12528 = dma.hbm_to_vmem [thread:$0]  (!%p13680_p2), %s15515_s1, 512, %s193_s9, [#allocation6], %s13567_s8, %s13567_s8, %s13568_s12  }
  0x39   : > { %p15517_p4 = scmp.ne.s32.totalorder %s15508_s28, 0  ;;  %p15518_p0 = scmp.lt.s32.totalorder %s13564_s21, 11 }
  0x3a   : > { %s15501_s16 = sand.u32 1, %s13560_s20   ;;  %s12475_s25 = smul.u32 16000, %s13564_s21 }
  0x3b   : > { %p13714_p3 = pnand %p15518_p0, %p15517_p4  ;;  %s12500_s23 = smul.u32 4000, %s15501_s16 }
  0x3c   : > { %s15520_s3 = sld [smem:[#allocation20_spill]]  ;;  %s13729_s8 = scalar_lea.sflag [#allocation9], %s217_s11 }
  0x3d   : > { %s221_s28 = scalar_lea.vmem [#allocation8], %s12500_s23  ;;  %p15503_p6 = pneg %p13714_p3 }
  0x3e   : > { %s228_s9 = sshll.u32 %s221_s28, 4  ;;  %s13727_s9 = int_to_ptr.vmem [resolvable:$true] %s228_s9 }
  0x42   : > { %s13725_s24 = scalar_lea.hbm %s15520_s3, %s12475_s25  ;;  %s13379_s14 = scalar_lea.hbm %s15520_s3, 704000 }
  0x43   : > { %s13374_s12 = scalar_lea.hbm %s13725_s24, 64000  ;;  %p13380_p13 = scmp.lt.u32.totalorder %s13725_s24, %s15520_s3 }
  0x44   : > { %p13375_p5 = scmp.ne.s32.totalorder %s13725_s24, %s13374_s12  ;;  %p13381_p8 = scmp.lt.u32.totalorder %s13379_s14, %s13374_s12 }
  0x45   : > { %p13383_p10 = scmp.lt.u32.totalorder %s13374_s12, %s13725_s24 }
  0x46   : > { %p13377_p11 = pnand %p15503_p6, %p13375_p5  ;;  %p13382_p9 = por %p13381_p8, %p13380_p13 }
  0x48   : > { %p13378_p12 = pneg %p13377_p11  ;;  %p13384_p1 = por %p13383_p10, %p13382_p9 }
  0x4a   : > { %p13385_p4 = pnand %p13384_p1, %p13378_p12 }
  0x4c   : > { %13388 = shalt.err (!%p13385_p4)
}
  0x4d   : > { %s13389_s11 = scalar_lea.vmem %s13727_s9, 64000  ;;  %s13569_s23 = smov [#allocation8]  }
  0x4e   : > { %p13390_p0 = scmp.ne.s32.totalorder %s13727_s9, %s13389_s11  ;;  %s13394_s28 = sshll.u32 %s13569_s23, 4  ;;  %s13395_s28 = int_to_ptr.vmem [resolvable:$false] %s13394_s28 }
  0x4f   : > { %s13396_s27 = scalar_lea.vmem %s13395_s28, 128000  ;;  %p13397_p2 = scmp.lt.s32.totalorder %s13727_s9, %s13395_s28 }
  0x50   : > { %p13392_p5 = pnand %p13390_p0, %p15503_p6  ;;  %p13398_p13 = scmp.lt.s32.totalorder %s13396_s27, %s13389_s11 }
  0x52   : > { %p13393_p11 = pneg %p13392_p5  ;;  %p13399_p8 = por %p13398_p13, %p13397_p2 }
  0x54   : > { %p13400_p9 = pnand %p13399_p8, %p13393_p11 }
  0x56   : > { %13403 = shalt.err (!%p13400_p9)
}
  0x57   : > { %s13570_s12 = smov 176000   ;;  %s13571_s13 = smov 16000  }
  0x58   : > { %s13572_s14 = smov 1000   ;;  %s13573_s25 = smov [#allocation2]  }
  0x59   : > { %12535 = dma.hbm_to_vmem [thread:$0]  (!%p13714_p3), %s13725_s24, 64000, %s13727_s9, %s13729_s8, %s13570_s12, %s13571_s13, %s13572_s14  }
  0x5a   : > { %s182_s26 = sshll.u32 %s13573_s25, 4  ;;  %s13574_s23 = smov [#allocation7]   ;;  %s183_s26 = int_to_ptr.vmem [resolvable:$true] %s182_s26 }
  0x5b   : > { %s206_s16 = sshll.u32 %s13574_s23, 4  ;;  %s13404_s27 = scalar_lea.hbm %s15487_s0, 16  ;;  %s13757_s16 = int_to_ptr.vmem [resolvable:$true] %s206_s16 }
  0x5c   : > { %p13405_p2 = scmp.ne.s32.totalorder %s15487_s0, %s13404_s27  ;;  %p13411_p1 = scmp.lt.u32.totalorder %s13404_s27, %s15487_s0 }
  0x5e   : > { %p13407_p12 = pnand %p13405_p2, %p13694_p7 }
  0x60   : > { %p13408_p10 = pneg %p13407_p12 }
  0x62   : > { %p13413_p4 = pnand %p13411_p1, %p13408_p10 }
  0x64   : > { %13416 = shalt.err (!%p13413_p4)
}
  0x65   : > { %s13417_s9 = scalar_lea.vmem %s183_s26, 16  ;;  %s13424_s12 = scalar_lea.vmem %s183_s26, 32 }
  0x66   : > { %p13418_p0 = scmp.ne.s32.totalorder %s183_s26, %s13417_s9  ;;  %p13425_p13 = scmp.lt.s32.totalorder %s183_s26, %s183_s26 }
  0x67   : > { %p13426_p8 = scmp.lt.s32.totalorder %s13424_s12, %s13417_s9 }
  0x68   : > { %p13420_p5 = pnand %p13418_p0, %p13694_p7 }
  0x69   : > { %p13427_p9 = por %p13426_p8, %p13425_p13 }
  0x6a   : > { %p13421_p11 = pneg %p13420_p5 }
  0x6c   : > { %p13428_p6 = pnand %p13427_p9, %p13421_p11 }
  0x6e   : > { %13431 = shalt.err (!%p13428_p6)
}
  0x6f   : > { %p15521_p2 = scmp.ne.s32.totalorder %s15514_s10, 0  ;;  %s13432_s14 = scalar_lea.hbm %s15489_s2, 16 }
  0x70   : > { %p13433_p12 = scmp.ne.s32.totalorder %s15489_s2, %s13432_s14  ;;  %p13439_p6 = scmp.lt.u32.totalorder %s13432_s14, %s15489_s2 }
  0x71   : > { %12525 = dma.hbm_to_vmem [thread:$0]  (!%p15521_p2), %s15487_s0, 16, %s183_s26, [#allocation3]  }
  0x72   : > { %p13435_p10 = pnand %p13433_p12, %p13694_p7 }
  0x74   : > { %p13436_p1 = pneg %p13435_p10 }
  0x76   : > { %p13441_p4 = pnand %p13439_p6, %p13436_p1 }
  0x78   : > { %13444 = shalt.err (!%p13441_p4)
}
  0x79   : > { %s13445_s26 = scalar_lea.vmem %s13757_s16, 16  ;;  %s13452_s27 = scalar_lea.vmem %s13757_s16, 32 }
  0x7a   : > { %p13446_p0 = scmp.ne.s32.totalorder %s13757_s16, %s13445_s26  ;;  %p13453_p13 = scmp.lt.s32.totalorder %s13757_s16, %s13757_s16 }
  0x7b   : > { %p13454_p8 = scmp.lt.s32.totalorder %s13452_s27, %s13445_s26 }
  0x7c   : > { %p13448_p5 = pnand %p13446_p0, %p13694_p7 }
  0x7d   : > { %p13455_p9 = por %p13454_p8, %p13453_p13 }
  0x7e   : > { %p13449_p11 = pneg %p13448_p5 }
  0x80   : > { %p13456_p12 = pnand %p13455_p9, %p13449_p11 }
  0x82   : > { %13459 = shalt.err (!%p13456_p12)
}
  0x83   : > { %12531 = dma.hbm_to_vmem [thread:$0]  (!%p15521_p2), %s15489_s2, 16, %s13757_s16, [#allocation6]  }
  0x84   : > { %s15522_s17 = sand.u32 1, %s13560_s20   ;;  %s12476_s1 = smul.u32 4000, %s13564_s21 }
  0x85   : > { %s12501_s12 = smul.u32 250, %s15522_s17  ;;  %p15523_p10 = pneg %p13714_p3 }
  0x86   : > { %s13807_s13 = scalar_lea.hbm %s15491_s4, %s12476_s1  ;;  %s13465_s11 = scalar_lea.hbm %s15491_s4, 44000 }
  0x87   : > { %s242_s10 = scalar_lea.vmem [#allocation10], %s12501_s12  ;;  %s13460_s25 = scalar_lea.hbm %s13807_s13, 4000 }
  0x88   : > { %s250_s14 = sshll.u32 %s242_s10, 4  ;;  %p13461_p7 = scmp.ne.s32.totalorder %s13807_s13, %s13460_s25  ;;  %s251_s14 = int_to_ptr.vmem [resolvable:$true] %s250_s14 }
  0x89   : > { %p13466_p6 = scmp.lt.u32.totalorder %s13807_s13, %s15491_s4  ;;  %p13467_p4 = scmp.lt.u32.totalorder %s13465_s11, %s13460_s25 }
  0x8a   : > { %p13463_p2 = pnand %p13461_p7, %p15523_p10  ;;  %p13469_p5 = scmp.lt.u32.totalorder %s13460_s25, %s13807_s13 }
  0x8b   : > { %p13468_p0 = por %p13467_p4, %p13466_p6 }
  0x8c   : > { %p13464_p1 = pneg %p13463_p2 }
  0x8d   : > { %p13470_p11 = por %p13469_p5, %p13468_p0 }
  0x8f   : > { %p13471_p13 = pnand %p13470_p11, %p13464_p1 }
  0x91   : > { %13474 = shalt.err (!%p13471_p13)
}
  0x92   : > { %s13475_s27 = scalar_lea.vmem %s251_s14, 4000  ;;  %p15524_p9 = pmov %p15523_p10 }
  0x93   : > { %p13476_p8 = scmp.ne.s32.totalorder %s251_s14, %s13475_s27  ;;  %s13575_s24 = smov [#allocation10]  }
  0x94   : > { %s13480_s9 = sshll.u32 %s13575_s24, 4  ;;  %s13481_s9 = int_to_ptr.vmem [resolvable:$false] %s13480_s9 }
  0x95   : > { %p13478_p12 = pnand %p13476_p8, %p15524_p9  ;;  %s13482_s17 = scalar_lea.vmem %s13481_s9, 8000 }
  0x96   : > { %p13483_p10 = scmp.lt.s32.totalorder %s251_s14, %s13481_s9  ;;  %p13484_p2 = scmp.lt.s32.totalorder %s13482_s17, %s13475_s27 }
  0x97   : > { %p13479_p7 = pneg %p13478_p12 }
  0x98   : > { %p13485_p4 = por %p13484_p2, %p13483_p10 }
  0x9a   : > { %p13486_p6 = pnand %p13485_p4, %p13479_p7 }
  0x9c   : > { %13489 = shalt.err (!%p13486_p6)
}
  0x9d   : > { %12538 = dma.hbm_to_vmem [thread:$0]  (!%p13714_p3), %s13807_s13, 4000, %s251_s14, %s13729_s8  }
  0x9e   : > { %p15525_p1 = scmp.ne.s32.totalorder %s15513_s7, 0 }
  0x9f   : > { %p15526_p0 = scmp.eq.s32.totalorder (!%p15525_p1), %s13633_s22, 0 }
  0xa0   : > { %259 = sbr.rel (%p15525_p1) target bundleno = 1135 (0x46f), region = 40 }
  0xa7   : > { %13535 = dma.done.wait (%p15526_p0), [#allocation3], 16   ;;  %p15527_p5 = pmov %p15526_p0 }
  0xa8   : > { %p15528_p11 = pmov %p15526_p0 }
  0xa9   : > { %13537 = vsyncadd (%p15527_p5), [#allocation3], 4294967280 }
  0xaa   : > { %13539 = dma.done.wait (%p15528_p11), [#allocation6], 528   ;;  %p15529_p13 = pmov %p15526_p0 }
  0xab   : > { %s273_s15 = sand.u32 1, %s13633_s22   ;;  %s13841_s8 = sand.u32 1, %s13556_s19  }
  0xac   : > { %13541 = vsyncadd (%p15529_p13), [#allocation6], 4294966768  ;;  %s12502_s7 = smul.u32 4000, %s13841_s8  ;;  %s274_s12 = scalar_lea.sflag [#allocation9], %s273_s15 }
  0xad   : > { %p15530_p3 = scmp.ne.s32.totalorder %s15509_s29, 0 }
  0xae   : > { %s13844_s1 = scalar_lea.vmem [#allocation8], %s12502_s7 }
  0xaf   : > { %13543 = dma.done.wait (%p15530_p3), %s274_s12, 68000  }
  0xb0   : > { %13545 = vsyncadd (%p15530_p3), %s274_s12, 4294899296  ;;  %v13576_v0 = vmov 0.0|0.0   ;;  %vm13577_vm0 = vmmov 0   ;;  %v13578_v1 = vmov 0.0   ;;  %v323_v2 = vld [vmem:[#allocation5] sm:$0xff]  ;;  %v324_v3 = vld [vmem:[#allocation5 + $0x8] sm:$0xff] }
  0xb1   : > { %12494 = vmatprep.subr.bf16.mxu0 %v13576_v0  ;;  %12491 = vmatprep.mubr.msk.f32.mxu0 %vm13577_vm0, %v13578_v1  ;;  %v325_v4 = vld [vmem:[#allocation5 + $0x10] sm:$0xff]  ;;  %v12495_v5 = vpack.c.bf16 %v324_v3, %v323_v2  ;;  %v326_v6 = vld [vmem:[#allocation5 + $0x18] sm:$0xff]  ;;  %v12598_v8 = vld [vmem:[%s13844_s1] ss:$1000 sps:$4 sm:$0xff]   ;;  %vm328_vm1 = vcmask 261120   ;;  %v13579_v18 = vmov 0  }
  0xb2   : > { %v12596_v7 = vld [vmem:[%s13844_s1 + $0x4] ss:$1000 sps:$4 sm:$0xff]   ;;  %v12498_v9 = vpack.c.bf16 %v326_v6, %v325_v4  ;;  %v322_v11 = vld [vmem:[#allocation2] sm:$0x1]  ;;  %v12599_v12 = vld [vmem:[%s13844_s1 + $0x8] ss:$1000 sps:$4 sm:$0xff]   ;;  %4753 = vmatprep.mubr.bf16.mxu1 %v13579_v18 }
  0xb3   : > { %12496 = vmatpush3.bf16.msra.mxu0 %v12495_v5  ;;  %4721 = vmatprep.subr.bf16.mxu1 %v12596_v7  ;;  %v12601_v10 = vld [vmem:[%s13844_s1 + $0xc] ss:$1000 sps:$4 sm:$0xff]   ;;  %v12607_v14 = vld [vmem:[%s13844_s1 + $0x7dc] ss:$1000 sps:$4 sm:$0xff]   ;;  %v12604_v15 = vld [vmem:[%s13844_s1 + $0x7d0] ss:$1000 sps:$4 sm:$0xff]  }
  0xb4   : > { %12497 = vmatprep.subr.bf16.mxu0 %v13576_v0  ;;  %4722 = vmatpush1.bf16.msra.mxu1 %v12598_v8  ;;  %v12602_v13 = vld [vmem:[%s13844_s1 + $0x7d4] ss:$1000 sps:$4 sm:$0xff]   ;;  %v12605_v16 = vld [vmem:[%s13844_s1 + $0x7d8] ss:$1000 sps:$4 sm:$0xff]   ;;  %v12616_v28 = vld [vmem:[%s13844_s1 + $0x7e4] ss:$1000 sps:$4 sm:$0xff]  }
  0xb5   : > { %4723 = vmatprep.subr.bf16.mxu1 %v12602_v13  ;;  %v12610_v17 = vld [vmem:[%s13844_s1 + $0x14] ss:$1000 sps:$4 sm:$0xff]   ;;  %v12608_v25 = vld [vmem:[%s13844_s1 + $0x10] ss:$1000 sps:$4 sm:$0xff]   ;;  %v12614_v30 = vld [vmem:[%s13844_s1 + $0x7e0] ss:$1000 sps:$4 sm:$0xff]  }
  0xb6   : > { %v12613_v19 = vld [vmem:[%s13844_s1 + $0x1c] ss:$1000 sps:$4 sm:$0xff]   ;;  %v12611_v26 = vld [vmem:[%s13844_s1 + $0x18] ss:$1000 sps:$4 sm:$0xff]   ;;  %v12619_v29 = vld [vmem:[%s13844_s1 + $0x7ec] ss:$1000 sps:$4 sm:$0xff]  }
  0xb7   : > { %12499 = vmatpush3.bf16.msra.mxu0 %v12498_v9  ;;  %v327_v20 = vld [vmem:[#allocation7] sm:$0x1]  ;;  %v12617_v31 = vld [vmem:[%s13844_s1 + $0x7e8] ss:$1000 sps:$4 sm:$0xff]   ;;  %v12622_v32 = vld [vmem:[%s13844_s1 + $0x24] ss:$1000 sps:$4 sm:$0xff]  }
  0xb8   : > { %4762 = vmatprep.subr.bf16.mxu0 %v12601_v10  ;;  %4724 = vmatpush1.bf16.msra.mxu1 %v12604_v15  ;;  %v12625_v33 = vld [vmem:[%s13844_s1 + $0x2c] ss:$1000 sps:$4 sm:$0xff]   ;;  %v12620_v34 = vld [vmem:[%s13844_s1 + $0x20] ss:$1000 sps:$4 sm:$0xff]   ;;  %v12631_v37 = vld [vmem:[%s13844_s1 + $0x7fc] ss:$1000 sps:$4 sm:$0xff]  }
  0xb9   : > { %4803 = vmatprep.subr.bf16.mxu1 %v12610_v17  ;;  %v12623_v35 = vld [vmem:[%s13844_s1 + $0x28] ss:$1000 sps:$4 sm:$0xff]   ;;  %v12628_v36 = vld [vmem:[%s13844_s1 + $0x7f4] ss:$1000 sps:$4 sm:$0xff]   ;;  %v12629_v39 = vld [vmem:[%s13844_s1 + $0x7f8] ss:$1000 sps:$4 sm:$0xff]  }
  0xba   : > { %12492 = vmatmul.mubr.msk.f32.vlgmr.msra.gmra.mrb[0].mxu0 %vm328_vm1, %v322_v11  ;;  %v12626_v38 = vld [vmem:[%s13844_s1 + $0x7f0] ss:$1000 sps:$4 sm:$0xff]   ;;  %v12634_v40 = vld [vmem:[%s13844_s1 + $0x34] ss:$1000 sps:$4 sm:$0xff]   ;;  %v12640_v44 = vld [vmem:[%s13844_s1 + $0x804] ss:$1000 sps:$4 sm:$0xff]  }
  0xbb   : > { %4763 = vmatpush1.bf16.msra.mxu0 %v12599_v12  ;;  %4794 = vmatprep.mubr.bf16.mxu0 %v13579_v18  ;;  %v12637_v41 = vld [vmem:[%s13844_s1 + $0x3c] ss:$1000 sps:$4 sm:$0xff]   ;;  %v12632_v42 = vld [vmem:[%s13844_s1 + $0x30] ss:$1000 sps:$4 sm:$0xff]   ;;  %v12643_v45 = vld [vmem:[%s13844_s1 + $0x80c] ss:$1000 sps:$4 sm:$0xff]  }
  0xbc   : > { %4764 = vmatprep.subr.bf16.mxu0 %v12607_v14  ;;  %v12635_v43 = vld [vmem:[%s13844_s1 + $0x38] ss:$1000 sps:$4 sm:$0xff]   ;;  %v12641_v47 = vld [vmem:[%s13844_s1 + $0x808] ss:$1000 sps:$4 sm:$0xff]   ;;  %v12646_v48 = vld [vmem:[%s13844_s1 + $0x44] ss:$1000 sps:$4 sm:$0xff]  }
  0xbd   : > { %v12638_v46 = vld [vmem:[%s13844_s1 + $0x800] ss:$1000 sps:$4 sm:$0xff]   ;;  %v12649_v49 = vld [vmem:[%s13844_s1 + $0x4c] ss:$1000 sps:$4 sm:$0xff]   ;;  %v12655_v53 = vld [vmem:[%s13844_s1 + $0x81c] ss:$1000 sps:$4 sm:$0xff]  }
  0xbe   : > { %v12644_v50 = vld [vmem:[%s13844_s1 + $0x40] ss:$1000 sps:$4 sm:$0xff]   ;;  %v12652_v52 = vld [vmem:[%s13844_s1 + $0x814] ss:$1000 sps:$4 sm:$0xff]   ;;  %v12650_v54 = vld [vmem:[%s13844_s1 + $0x810] ss:$1000 sps:$4 sm:$0xff]  }
  0xbf   : > { %4765 = vmatpush1.bf16.msra.mxu0 %v12605_v16  ;;  %v12647_v51 = vld [vmem:[%s13844_s1 + $0x48] ss:$1000 sps:$4 sm:$0xff]   ;;  %v12653_v55 = vld [vmem:[%s13844_s1 + $0x818] ss:$1000 sps:$4 sm:$0xff]   ;;  %v12658_v56 = vld [vmem:[%s13844_s1 + $0x54] ss:$1000 sps:$4 sm:$0xff]  }
  0xc0   : > { %4844 = vmatprep.subr.bf16.mxu0 %v12613_v19  ;;  %v12661_v57 = vld [vmem:[%s13844_s1 + $0x5c] ss:$1000 sps:$4 sm:$0xff]   ;;  %v12656_v58 = vld [vmem:[%s13844_s1 + $0x50] ss:$1000 sps:$4 sm:$0xff]   ;;  %v12667_v61 = vld [vmem:[%s13844_s1 + $0x82c] ss:$1000 sps:$4 sm:$0xff]  }
  0xc1   : > { %v12659_v59 = vld [vmem:[%s13844_s1 + $0x58] ss:$1000 sps:$4 sm:$0xff]   ;;  %v12664_v60 = vld [vmem:[%s13844_s1 + $0x824] ss:$1000 sps:$4 sm:$0xff]   ;;  %v12665_v63 = vld [vmem:[%s13844_s1 + $0x828] ss:$1000 sps:$4 sm:$0xff]  }
  0xc2   : > { %v12662_v62 = vld [vmem:[%s13844_s1 + $0x820] ss:$1000 sps:$4 sm:$0xff]   ;;  %v12670_v0 = vld [vmem:[%s13844_s1 + $0x64] ss:$1000 sps:$4 sm:$0xff]   ;;  %v12676_v4 = vld [vmem:[%s13844_s1 + $0x834] ss:$1000 sps:$4 sm:$0xff]  }
  0xc3   : > { %v12673_v1 = vld [vmem:[%s13844_s1 + $0x6c] ss:$1000 sps:$4 sm:$0xff]   ;;  %v12668_v2 = vld [vmem:[%s13844_s1 + $0x60] ss:$1000 sps:$4 sm:$0xff]   ;;  %v12679_v5 = vld [vmem:[%s13844_s1 + $0x83c] ss:$1000 sps:$4 sm:$0xff]  }
  0xc4   : > { %v12671_v3 = vld [vmem:[%s13844_s1 + $0x68] ss:$1000 sps:$4 sm:$0xff]   ;;  %v12677_v7 = vld [vmem:[%s13844_s1 + $0x838] ss:$1000 sps:$4 sm:$0xff]   ;;  %v12682_v8 = vld [vmem:[%s13844_s1 + $0x74] ss:$1000 sps:$4 sm:$0xff]  }
  0xc5   : > { %v12674_v6 = vld [vmem:[%s13844_s1 + $0x830] ss:$1000 sps:$4 sm:$0xff]   ;;  %v12685_v9 = vld [vmem:[%s13844_s1 + $0x7c] ss:$1000 sps:$4 sm:$0xff]   ;;  %v12691_v13 = vld [vmem:[%s13844_s1 + $0x84c] ss:$1000 sps:$4 sm:$0xff]  }
  0xc6   : > { %v12680_v10 = vld [vmem:[%s13844_s1 + $0x70] ss:$1000 sps:$4 sm:$0xff]   ;;  %v12688_v12 = vld [vmem:[%s13844_s1 + $0x844] ss:$1000 sps:$4 sm:$0xff]   ;;  %v12686_v14 = vld [vmem:[%s13844_s1 + $0x840] ss:$1000 sps:$4 sm:$0xff]  }
  0xc7   : > { %v12683_v11 = vld [vmem:[%s13844_s1 + $0x78] ss:$1000 sps:$4 sm:$0xff]   ;;  %v12689_v15 = vld [vmem:[%s13844_s1 + $0x848] ss:$1000 sps:$4 sm:$0xff]   ;;  %v12694_v16 = vld [vmem:[%s13844_s1 + $0x84] ss:$1000 sps:$4 sm:$0xff]  }
  0xc8   : > { %v12697_v17 = vld [vmem:[%s13844_s1 + $0x8c] ss:$1000 sps:$4 sm:$0xff]   ;;  %v12692_v19 = vld [vmem:[%s13844_s1 + $0x80] ss:$1000 sps:$4 sm:$0xff]   ;;  %s12503_s29 = smul.u32 250, %s13841_s8  ;;  %p15531_p9 = scmp.ne.s32.totalorder %s15510_s30, 0 }
  0xc9   : > { %s12477_s13 = smul.u32 4000, %s13633_s22  ;;  %s11699_s22 = scalar_lea.sflag [#allocation4], %s13841_s8 }
  0xca   : > { %s14239_s3 = scalar_lea.vmem [#allocation10], %s12503_s29  ;;  %s14347_s6 = scalar_lea.vmem [#allocation11], %s12503_s29 }
  0xcb   : > { %s11713_s10 = sshll.u32 %s14347_s6, 4  ;;  %s15443_s16 = scalar_lea.hbm %s15492_s5, %s12477_s13  ;;  %s15445_s10 = int_to_ptr.vmem [resolvable:$true] %s11713_s10 }
  0xcc   : > { %s13490_s23 = scalar_lea.vmem %s15445_s10, 4000  ;;  %s13581_s11 = smov [#allocation11]  }
  0xcd   : > { %p13491_p8 = scmp.ne.s32.totalorder %s15445_s10, %s13490_s23  ;;  %s13494_s28 = sshll.u32 %s13581_s11, 4  ;;  %s13495_s28 = int_to_ptr.vmem [resolvable:$false] %s13494_s28 }
  0xce   : > { %s13496_s26 = scalar_lea.vmem %s13495_s28, 8000  ;;  %p13497_p10 = scmp.lt.s32.totalorder %s15445_s10, %s13495_s28 }
  0xcf   : > { %p13492_p12 = pnand %p13491_p8, %p15531_p9  ;;  %p13498_p2 = scmp.lt.s32.totalorder %s13496_s26, %s13490_s23 }
  0xd1   : > { %p13493_p7 = pneg %p13492_p12  ;;  %p13499_p4 = por %p13498_p2, %p13497_p10 }
  0xd3   : > { %p13500_p6 = pnand %p13499_p4, %p13493_p7 }
 0x18d   : > { %v398_v21 = vpop.f32.mrb[0].mxu0 }
 0x18e   : > { %v399_v22 = vadd.f32 %v398_v21, %v327_v20  ;;  %v12493_v23 = vpop.f32.mrb[1].mxu0  ;;  %v12695_v20 = vld [vmem:[%s13844_s1 + $0x88] ss:$1000 sps:$4 sm:$0xff]   ;;  %v12700_v21 = vld [vmem:[%s13844_s1 + $0x854] ss:$1000 sps:$4 sm:$0xff]  }
 0x18f   : > { %v12698_v23 = vld [vmem:[%s13844_s1 + $0x850] ss:$1000 sps:$4 sm:$0xff]  }
 0x190   : > { %v402_v24 = vmax.f32 %v399_v22, 0.0  ;;  %v12703_v22 = vld [vmem:[%s13844_s1 + $0x85c] ss:$1000 sps:$4 sm:$0xff]  }
 0x192   : > { %v13865_v27 = vpack.c.bf16 %v402_v24, %v402_v24  ;;  %v12701_v24 = vld [vmem:[%s13844_s1 + $0x858] ss:$1000 sps:$4 sm:$0xff]  }
 0x194   : > { %12347 = vmatmul.mubr.msk.bf16.vlgmr.msra.gmra.mrb[0].mxu1 %vm328_vm1, %v13865_v27  ;;  %12348 = vmatmul.mubr.msk.bf16.vlgmr.msra.gmra.mrb[4].mxu0 %vm328_vm1, %v13865_v27 }
 0x195   : > { %4804 = vmatpush1.bf16.msra.mxu1 %v12608_v25  ;;  %4845 = vmatpush1.bf16.msra.mxu0 %v12611_v26  ;;  %v12706_v25 = vld [vmem:[%s13844_s1 + $0x94] ss:$1000 sps:$4 sm:$0xff]  }
 0x196   : > { %4805 = vmatprep.subr.bf16.mxu1 %v12616_v28  ;;  %4846 = vmatprep.subr.bf16.mxu0 %v12619_v29  ;;  %v12709_v26 = vld [vmem:[%s13844_s1 + $0x9c] ss:$1000 sps:$4 sm:$0xff]   ;;  %v12704_v28 = vld [vmem:[%s13844_s1 + $0x90] ss:$1000 sps:$4 sm:$0xff]  }
 0x197   : > { %4835 = vmatprep.mubr.bf16.mxu1 %v13579_v18  ;;  %4876 = vmatprep.mubr.bf16.mxu0 %v13579_v18  ;;  %v12707_v29 = vld [vmem:[%s13844_s1 + $0x98] ss:$1000 sps:$4 sm:$0xff]  }
 0x199   : > { %4806 = vmatpush1.bf16.msra.mxu1 %v12614_v30  ;;  %4847 = vmatpush1.bf16.msra.mxu0 %v12617_v31  ;;  %v12712_v30 = vld [vmem:[%s13844_s1 + $0x864] ss:$1000 sps:$4 sm:$0xff]  }
 0x19a   : > { %4885 = vmatprep.subr.bf16.mxu1 %v12622_v32  ;;  %4926 = vmatprep.subr.bf16.mxu0 %v12625_v33  ;;  %v12715_v31 = vld [vmem:[%s13844_s1 + $0x86c] ss:$1000 sps:$4 sm:$0xff]   ;;  %v12710_v32 = vld [vmem:[%s13844_s1 + $0x860] ss:$1000 sps:$4 sm:$0xff]  }
 0x19b   : > { %v12713_v33 = vld [vmem:[%s13844_s1 + $0x868] ss:$1000 sps:$4 sm:$0xff]  }
 0x19c   : > { %12349 = vmatmul.mubr.msk.bf16.vlgmr.msra.gmra.mrb[4].mxu1 %vm328_vm1, %v13865_v27  ;;  %12350 = vmatmul.mubr.msk.bf16.vlgmr.msra.gmra.mrb[8].mxu0 %vm328_vm1, %v13865_v27 }
 0x19d   : > { %4886 = vmatpush1.bf16.msra.mxu1 %v12620_v34  ;;  %4927 = vmatpush1.bf16.msra.mxu0 %v12623_v35  ;;  %v12718_v34 = vld [vmem:[%s13844_s1 + $0xa4] ss:$1000 sps:$4 sm:$0xff]  }
 0x19e   : > { %4887 = vmatprep.subr.bf16.mxu1 %v12628_v36  ;;  %4928 = vmatprep.subr.bf16.mxu0 %v12631_v37  ;;  %v12721_v35 = vld [vmem:[%s13844_s1 + $0xac] ss:$1000 sps:$4 sm:$0xff]   ;;  %v12716_v36 = vld [vmem:[%s13844_s1 + $0xa0] ss:$1000 sps:$4 sm:$0xff]  }
 0x19f   : > { %4917 = vmatprep.mubr.bf16.mxu1 %v13579_v18  ;;  %4958 = vmatprep.mubr.bf16.mxu0 %v13579_v18  ;;  %v12719_v37 = vld [vmem:[%s13844_s1 + $0xa8] ss:$1000 sps:$4 sm:$0xff]  }
 0x1a1   : > { %4888 = vmatpush1.bf16.msra.mxu1 %v12626_v38  ;;  %4929 = vmatpush1.bf16.msra.mxu0 %v12629_v39  ;;  %v12724_v38 = vld [vmem:[%s13844_s1 + $0x874] ss:$1000 sps:$4 sm:$0xff]  }
 0x1a2   : > { %4967 = vmatprep.subr.bf16.mxu1 %v12634_v40  ;;  %5008 = vmatprep.subr.bf16.mxu0 %v12637_v41  ;;  %v12727_v39 = vld [vmem:[%s13844_s1 + $0x87c] ss:$1000 sps:$4 sm:$0xff]   ;;  %v12722_v40 = vld [vmem:[%s13844_s1 + $0x870] ss:$1000 sps:$4 sm:$0xff]  }
 0x1a3   : > { %v12725_v41 = vld [vmem:[%s13844_s1 + $0x878] ss:$1000 sps:$4 sm:$0xff]  }
 0x1a4   : > { %12351 = vmatmul.mubr.msk.bf16.vlgmr.msra.gmra.mrb[8].mxu1 %vm328_vm1, %v13865_v27  ;;  %12352 = vmatmul.mubr.msk.bf16.vlgmr.msra.gmra.mrb[12].mxu0 %vm328_vm1, %v13865_v27 }
 0x1a5   : > { %4968 = vmatpush1.bf16.msra.mxu1 %v12632_v42  ;;  %5009 = vmatpush1.bf16.msra.mxu0 %v12635_v43  ;;  %v12730_v42 = vld [vmem:[%s13844_s1 + $0xb4] ss:$1000 sps:$4 sm:$0xff]  }
 0x1a6   : > { %4969 = vmatprep.subr.bf16.mxu1 %v12640_v44  ;;  %5010 = vmatprep.subr.bf16.mxu0 %v12643_v45  ;;  %v12733_v43 = vld [vmem:[%s13844_s1 + $0xbc] ss:$1000 sps:$4 sm:$0xff]   ;;  %v12728_v44 = vld [vmem:[%s13844_s1 + $0xb0] ss:$1000 sps:$4 sm:$0xff]  }
 0x1a7   : > { %4999 = vmatprep.mubr.bf16.mxu1 %v13579_v18  ;;  %5040 = vmatprep.mubr.bf16.mxu0 %v13579_v18  ;;  %v12731_v45 = vld [vmem:[%s13844_s1 + $0xb8] ss:$1000 sps:$4 sm:$0xff]  }
 0x1a9   : > { %4970 = vmatpush1.bf16.msra.mxu1 %v12638_v46  ;;  %5011 = vmatpush1.bf16.msra.mxu0 %v12641_v47  ;;  %v12736_v46 = vld [vmem:[%s13844_s1 + $0x884] ss:$1000 sps:$4 sm:$0xff]  }
 0x1aa   : > { %5049 = vmatprep.subr.bf16.mxu1 %v12646_v48  ;;  %5090 = vmatprep.subr.bf16.mxu0 %v12649_v49  ;;  %v12739_v47 = vld [vmem:[%s13844_s1 + $0x88c] ss:$1000 sps:$4 sm:$0xff]   ;;  %v12734_v48 = vld [vmem:[%s13844_s1 + $0x880] ss:$1000 sps:$4 sm:$0xff]  }
 0x1ab   : > { %v12737_v49 = vld [vmem:[%s13844_s1 + $0x888] ss:$1000 sps:$4 sm:$0xff]  }
 0x1ac   : > { %12353 = vmatmul.mubr.msk.bf16.vlgmr.msra.gmra.mrb[12].mxu1 %vm328_vm1, %v13865_v27  ;;  %12354 = vmatmul.mubr.msk.bf16.vlgmr.msra.gmra.mrb[16].mxu0 %vm328_vm1, %v13865_v27 }
 0x1ad   : > { %5050 = vmatpush1.bf16.msra.mxu1 %v12644_v50  ;;  %5091 = vmatpush1.bf16.msra.mxu0 %v12647_v51  ;;  %v12742_v50 = vld [vmem:[%s13844_s1 + $0xc4] ss:$1000 sps:$4 sm:$0xff]  }
 0x1ae   : > { %5051 = vmatprep.subr.bf16.mxu1 %v12652_v52  ;;  %5092 = vmatprep.subr.bf16.mxu0 %v12655_v53  ;;  %v12745_v51 = vld [vmem:[%s13844_s1 + $0xcc] ss:$1000 sps:$4 sm:$0xff]   ;;  %v12740_v52 = vld [vmem:[%s13844_s1 + $0xc0] ss:$1000 sps:$4 sm:$0xff]  }
 0x1af   : > { %5081 = vmatprep.mubr.bf16.mxu1 %v13579_v18  ;;  %5122 = vmatprep.mubr.bf16.mxu0 %v13579_v18  ;;  %v12743_v53 = vld [vmem:[%s13844_s1 + $0xc8] ss:$1000 sps:$4 sm:$0xff]  }
 0x1b1   : > { %5052 = vmatpush1.bf16.msra.mxu1 %v12650_v54  ;;  %5093 = vmatpush1.bf16.msra.mxu0 %v12653_v55  ;;  %v12748_v54 = vld [vmem:[%s13844_s1 + $0x894] ss:$1000 sps:$4 sm:$0xff]  }
 0x1b2   : > { %5131 = vmatprep.subr.bf16.mxu1 %v12658_v56  ;;  %5172 = vmatprep.subr.bf16.mxu0 %v12661_v57  ;;  %v12751_v55 = vld [vmem:[%s13844_s1 + $0x89c] ss:$1000 sps:$4 sm:$0xff]   ;;  %v12746_v56 = vld [vmem:[%s13844_s1 + $0x890] ss:$1000 sps:$4 sm:$0xff]  }
 0x1b3   : > { %v12749_v57 = vld [vmem:[%s13844_s1 + $0x898] ss:$1000 sps:$4 sm:$0xff]  }
 0x1b4   : > { %12355 = vmatmul.mubr.msk.bf16.vlgmr.msra.gmra.mrb[16].mxu1 %vm328_vm1, %v13865_v27  ;;  %12356 = vmatmul.mubr.msk.bf16.vlgmr.msra.gmra.mrb[20].mxu0 %vm328_vm1, %v13865_v27 }
 0x1b5   : > { %5132 = vmatpush1.bf16.msra.mxu1 %v12656_v58  ;;  %5173 = vmatpush1.bf16.msra.mxu0 %v12659_v59  ;;  %v12754_v58 = vld [vmem:[%s13844_s1 + $0xd4] ss:$1000 sps:$4 sm:$0xff]  }
 0x1b6   : > { %5133 = vmatprep.subr.bf16.mxu1 %v12664_v60  ;;  %5174 = vmatprep.subr.bf16.mxu0 %v12667_v61  ;;  %v12757_v59 = vld [vmem:[%s13844_s1 + $0xdc] ss:$1000 sps:$4 sm:$0xff]   ;;  %v12752_v60 = vld [vmem:[%s13844_s1 + $0xd0] ss:$1000 sps:$4 sm:$0xff]  }
 0x1b7   : > { %5163 = vmatprep.mubr.bf16.mxu1 %v13579_v18  ;;  %5204 = vmatprep.mubr.bf16.mxu0 %v13579_v18  ;;  %v12755_v61 = vld [vmem:[%s13844_s1 + $0xd8] ss:$1000 sps:$4 sm:$0xff]  }
 0x1b9   : > { %5134 = vmatpush1.bf16.msra.mxu1 %v12662_v62  ;;  %5175 = vmatpush1.bf16.msra.mxu0 %v12665_v63  ;;  %v12760_v62 = vld [vmem:[%s13844_s1 + $0x8a4] ss:$1000 sps:$4 sm:$0xff]  }
 0x1ba   : > { %5213 = vmatprep.subr.bf16.mxu1 %v12670_v0  ;;  %5254 = vmatprep.subr.bf16.mxu0 %v12673_v1  ;;  %v12763_v63 = vld [vmem:[%s13844_s1 + $0x8ac] ss:$1000 sps:$4 sm:$0xff]   ;;  %v12758_v0 = vld [vmem:[%s13844_s1 + $0x8a0] ss:$1000 sps:$4 sm:$0xff]  }
 0x1bb   : > { %v12761_v1 = vld [vmem:[%s13844_s1 + $0x8a8] ss:$1000 sps:$4 sm:$0xff]  }
 0x1bc   : > { %12357 = vmatmul.mubr.msk.bf16.vlgmr.msra.gmra.mrb[20].mxu1 %vm328_vm1, %v13865_v27  ;;  %12358 = vmatmul.mubr.msk.bf16.vlgmr.msra.gmra.mrb[24].mxu0 %vm328_vm1, %v13865_v27 }
 0x1bd   : > { %5214 = vmatpush1.bf16.msra.mxu1 %v12668_v2  ;;  %5255 = vmatpush1.bf16.msra.mxu0 %v12671_v3  ;;  %v12766_v2 = vld [vmem:[%s13844_s1 + $0xe4] ss:$1000 sps:$4 sm:$0xff]  }
 0x1be   : > { %5215 = vmatprep.subr.bf16.mxu1 %v12676_v4  ;;  %5256 = vmatprep.subr.bf16.mxu0 %v12679_v5  ;;  %v12769_v3 = vld [vmem:[%s13844_s1 + $0xec] ss:$1000 sps:$4 sm:$0xff]   ;;  %v12764_v4 = vld [vmem:[%s13844_s1 + $0xe0] ss:$1000 sps:$4 sm:$0xff]  }
 0x1bf   : > { %5245 = vmatprep.mubr.bf16.mxu1 %v13579_v18  ;;  %5286 = vmatprep.mubr.bf16.mxu0 %v13579_v18  ;;  %v12767_v5 = vld [vmem:[%s13844_s1 + $0xe8] ss:$1000 sps:$4 sm:$0xff]  }
 0x1c1   : > { %5216 = vmatpush1.bf16.msra.mxu1 %v12674_v6  ;;  %5257 = vmatpush1.bf16.msra.mxu0 %v12677_v7  ;;  %v12772_v6 = vld [vmem:[%s13844_s1 + $0x8b4] ss:$1000 sps:$4 sm:$0xff]  }
 0x1c2   : > { %5295 = vmatprep.subr.bf16.mxu1 %v12682_v8  ;;  %5336 = vmatprep.subr.bf16.mxu0 %v12685_v9  ;;  %v12775_v7 = vld [vmem:[%s13844_s1 + $0x8bc] ss:$1000 sps:$4 sm:$0xff]   ;;  %v12770_v8 = vld [vmem:[%s13844_s1 + $0x8b0] ss:$1000 sps:$4 sm:$0xff]  }
 0x1c3   : > { %v12773_v9 = vld [vmem:[%s13844_s1 + $0x8b8] ss:$1000 sps:$4 sm:$0xff]  }
 0x1c4   : > { %12359 = vmatmul.mubr.msk.bf16.vlgmr.msra.gmra.mrb[24].mxu1 %vm328_vm1, %v13865_v27  ;;  %12360 = vmatmul.mubr.msk.bf16.vlgmr.msra.gmra.mrb[28].mxu0 %vm328_vm1, %v13865_v27 }
 0x1c5   : > { %5296 = vmatpush1.bf16.msra.mxu1 %v12680_v10  ;;  %5337 = vmatpush1.bf16.msra.mxu0 %v12683_v11  ;;  %v12778_v10 = vld [vmem:[%s13844_s1 + $0xf4] ss:$1000 sps:$4 sm:$0xff]  }
 0x1c6   : > { %5297 = vmatprep.subr.bf16.mxu1 %v12688_v12  ;;  %5338 = vmatprep.subr.bf16.mxu0 %v12691_v13  ;;  %v12781_v11 = vld [vmem:[%s13844_s1 + $0xfc] ss:$1000 sps:$4 sm:$0xff]   ;;  %v12776_v12 = vld [vmem:[%s13844_s1 + $0xf0] ss:$1000 sps:$4 sm:$0xff]  }
 0x1c7   : > { %5327 = vmatprep.mubr.bf16.mxu1 %v13579_v18  ;;  %5368 = vmatprep.mubr.bf16.mxu0 %v13579_v18  ;;  %v12779_v13 = vld [vmem:[%s13844_s1 + $0xf8] ss:$1000 sps:$4 sm:$0xff]  }
 0x1c9   : > { %5298 = vmatpush1.bf16.msra.mxu1 %v12686_v14  ;;  %5339 = vmatpush1.bf16.msra.mxu0 %v12689_v15  ;;  %v12784_v14 = vld [vmem:[%s13844_s1 + $0x8c4] ss:$1000 sps:$4 sm:$0xff]  }
 0x1ca   : > { %5377 = vmatprep.subr.bf16.mxu1 %v12694_v16  ;;  %5418 = vmatprep.subr.bf16.mxu0 %v12697_v17  ;;  %v12787_v15 = vld [vmem:[%s13844_s1 + $0x8cc] ss:$1000 sps:$4 sm:$0xff]   ;;  %v12782_v16 = vld [vmem:[%s13844_s1 + $0x8c0] ss:$1000 sps:$4 sm:$0xff]  }
 0x1cb   : > { %v12785_v17 = vld [vmem:[%s13844_s1 + $0x8c8] ss:$1000 sps:$4 sm:$0xff]  }
 0x1cc   : > { %12361 = vmatmul.mubr.msk.bf16.vlgmr.msra.gmra.mrb[28].mxu1 %vm328_vm1, %v13865_v27  ;;  %12362 = vmatmul.mubr.msk.bf16.vlgmr.msra.gmra.mrb[32].mxu0 %vm328_vm1, %v13865_v27 }
 0x1cd   : > { %5378 = vmatpush1.bf16.msra.mxu1 %v12692_v19  ;;  %5419 = vmatpush1.bf16.msra.mxu0 %v12695_v20  ;;  %v12790_v19 = vld [vmem:[%s13844_s1 + $0x104] ss:$1000 sps:$4 sm:$0xff]  }
 0x1ce   : > { %5379 = vmatprep.subr.bf16.mxu1 %v12700_v21  ;;  %5420 = vmatprep.subr.bf16.mxu0 %v12703_v22  ;;  %v12793_v20 = vld [vmem:[%s13844_s1 + $0x10c] ss:$1000 sps:$4 sm:$0xff]   ;;  %v12788_v21 = vld [vmem:[%s13844_s1 + $0x100] ss:$1000 sps:$4 sm:$0xff]  }
 0x1cf   : > { %5409 = vmatprep.mubr.bf16.mxu1 %v13579_v18  ;;  %5450 = vmatprep.mubr.bf16.mxu0 %v13579_v18  ;;  %v12791_v22 = vld [vmem:[%s13844_s1 + $0x108] ss:$1000 sps:$4 sm:$0xff]  }
 0x1d1   : > { %5380 = vmatpush1.bf16.msra.mxu1 %v12698_v23  ;;  %5421 = vmatpush1.bf16.msra.mxu0 %v12701_v24  ;;  %v12796_v23 = vld [vmem:[%s13844_s1 + $0x8d4] ss:$1000 sps:$4 sm:$0xff]  }
 0x1d2   : > { %5459 = vmatprep.subr.bf16.mxu1 %v12706_v25  ;;  %5500 = vmatprep.subr.bf16.mxu0 %v12709_v26  ;;  %v12799_v24 = vld [vmem:[%s13844_s1 + $0x8dc] ss:$1000 sps:$4 sm:$0xff]   ;;  %v12794_v25 = vld [vmem:[%s13844_s1 + $0x8d0] ss:$1000 sps:$4 sm:$0xff]  }
 0x1d3   : > { %v12797_v26 = vld [vmem:[%s13844_s1 + $0x8d8] ss:$1000 sps:$4 sm:$0xff]  }
 0x1d4   : > { %12363 = vmatmul.mubr.msk.bf16.vlgmr.msra.gmra.mrb[32].mxu1 %vm328_vm1, %v13865_v27  ;;  %12364 = vmatmul.mubr.msk.bf16.vlgmr.msra.gmra.mrb[36].mxu0 %vm328_vm1, %v13865_v27 }
 0x1d5   : > { %5460 = vmatpush1.bf16.msra.mxu1 %v12704_v28  ;;  %5501 = vmatpush1.bf16.msra.mxu0 %v12707_v29  ;;  %v12802_v28 = vld [vmem:[%s13844_s1 + $0x114] ss:$1000 sps:$4 sm:$0xff]  }
 0x1d6   : > { %5461 = vmatprep.subr.bf16.mxu1 %v12712_v30  ;;  %5502 = vmatprep.subr.bf16.mxu0 %v12715_v31  ;;  %v12805_v29 = vld [vmem:[%s13844_s1 + $0x11c] ss:$1000 sps:$4 sm:$0xff]   ;;  %v12800_v30 = vld [vmem:[%s13844_s1 + $0x110] ss:$1000 sps:$4 sm:$0xff]  }
 0x1d7   : > { %5491 = vmatprep.mubr.bf16.mxu1 %v13579_v18  ;;  %5532 = vmatprep.mubr.bf16.mxu0 %v13579_v18  ;;  %v12803_v31 = vld [vmem:[%s13844_s1 + $0x118] ss:$1000 sps:$4 sm:$0xff]  }
 0x1d9   : > { %5462 = vmatpush1.bf16.msra.mxu1 %v12710_v32  ;;  %5503 = vmatpush1.bf16.msra.mxu0 %v12713_v33  ;;  %v12808_v32 = vld [vmem:[%s13844_s1 + $0x8e4] ss:$1000 sps:$4 sm:$0xff]  }
 0x1da   : > { %5541 = vmatprep.subr.bf16.mxu1 %v12718_v34  ;;  %5582 = vmatprep.subr.bf16.mxu0 %v12721_v35  ;;  %v12811_v33 = vld [vmem:[%s13844_s1 + $0x8ec] ss:$1000 sps:$4 sm:$0xff]   ;;  %v12806_v34 = vld [vmem:[%s13844_s1 + $0x8e0] ss:$1000 sps:$4 sm:$0xff]  }
 0x1db   : > { %v12809_v35 = vld [vmem:[%s13844_s1 + $0x8e8] ss:$1000 sps:$4 sm:$0xff]  }
 0x1dc   : > { %12365 = vmatmul.mubr.msk.bf16.vlgmr.msra.gmra.mrb[36].mxu1 %vm328_vm1, %v13865_v27  ;;  %12366 = vmatmul.mubr.msk.bf16.vlgmr.msra.gmra.mrb[40].mxu0 %vm328_vm1, %v13865_v27 }
 0x1dd   : > { %5542 = vmatpush1.bf16.msra.mxu1 %v12716_v36  ;;  %5583 = vmatpush1.bf16.msra.mxu0 %v12719_v37  ;;  %v12814_v36 = vld [vmem:[%s13844_s1 + $0x124] ss:$1000 sps:$4 sm:$0xff]  }
 0x1de   : > { %5543 = vmatprep.subr.bf16.mxu1 %v12724_v38  ;;  %5584 = vmatprep.subr.bf16.mxu0 %v12727_v39  ;;  %v12817_v37 = vld [vmem:[%s13844_s1 + $0x12c] ss:$1000 sps:$4 sm:$0xff]   ;;  %v12812_v38 = vld [vmem:[%s13844_s1 + $0x120] ss:$1000 sps:$4 sm:$0xff]  }
 0x1df   : > { %5573 = vmatprep.mubr.bf16.mxu1 %v13579_v18  ;;  %5614 = vmatprep.mubr.bf16.mxu0 %v13579_v18  ;;  %v12815_v39 = vld [vmem:[%s13844_s1 + $0x128] ss:$1000 sps:$4 sm:$0xff]  }
 0x1e1   : > { %5544 = vmatpush1.bf16.msra.mxu1 %v12722_v40  ;;  %5585 = vmatpush1.bf16.msra.mxu0 %v12725_v41  ;;  %v12820_v40 = vld [vmem:[%s13844_s1 + $0x8f4] ss:$1000 sps:$4 sm:$0xff]  }
 0x1e2   : > { %5623 = vmatprep.subr.bf16.mxu1 %v12730_v42  ;;  %5664 = vmatprep.subr.bf16.mxu0 %v12733_v43  ;;  %v12823_v41 = vld [vmem:[%s13844_s1 + $0x8fc] ss:$1000 sps:$4 sm:$0xff]   ;;  %v12818_v42 = vld [vmem:[%s13844_s1 + $0x8f0] ss:$1000 sps:$4 sm:$0xff]  }
 0x1e3   : > { %v12821_v43 = vld [vmem:[%s13844_s1 + $0x8f8] ss:$1000 sps:$4 sm:$0xff]  }
 0x1e4   : > { %12367 = vmatmul.mubr.msk.bf16.vlgmr.msra.gmra.mrb[40].mxu1 %vm328_vm1, %v13865_v27  ;;  %12368 = vmatmul.mubr.msk.bf16.vlgmr.msra.gmra.mrb[44].mxu0 %vm328_vm1, %v13865_v27 }
 0x1e5   : > { %5624 = vmatpush1.bf16.msra.mxu1 %v12728_v44  ;;  %5665 = vmatpush1.bf16.msra.mxu0 %v12731_v45  ;;  %v12826_v44 = vld [vmem:[%s13844_s1 + $0x134] ss:$1000 sps:$4 sm:$0xff]  }
 0x1e6   : > { %5625 = vmatprep.subr.bf16.mxu1 %v12736_v46  ;;  %5666 = vmatprep.subr.bf16.mxu0 %v12739_v47  ;;  %v12829_v45 = vld [vmem:[%s13844_s1 + $0x13c] ss:$1000 sps:$4 sm:$0xff]   ;;  %v12824_v46 = vld [vmem:[%s13844_s1 + $0x130] ss:$1000 sps:$4 sm:$0xff]  }
 0x1e7   : > { %5655 = vmatprep.mubr.bf16.mxu1 %v13579_v18  ;;  %5696 = vmatprep.mubr.bf16.mxu0 %v13579_v18  ;;  %v12827_v47 = vld [vmem:[%s13844_s1 + $0x138] ss:$1000 sps:$4 sm:$0xff]  }
 0x1e9   : > { %5626 = vmatpush1.bf16.msra.mxu1 %v12734_v48  ;;  %5667 = vmatpush1.bf16.msra.mxu0 %v12737_v49  ;;  %v12832_v48 = vld [vmem:[%s13844_s1 + $0x904] ss:$1000 sps:$4 sm:$0xff]  }
 0x1ea   : > { %5705 = vmatprep.subr.bf16.mxu1 %v12742_v50  ;;  %5746 = vmatprep.subr.bf16.mxu0 %v12745_v51  ;;  %v12835_v49 = vld [vmem:[%s13844_s1 + $0x90c] ss:$1000 sps:$4 sm:$0xff]   ;;  %v12830_v50 = vld [vmem:[%s13844_s1 + $0x900] ss:$1000 sps:$4 sm:$0xff]  }
 0x1eb   : > { %v12833_v51 = vld [vmem:[%s13844_s1 + $0x908] ss:$1000 sps:$4 sm:$0xff]  }
 0x1ec   : > { %12369 = vmatmul.mubr.msk.bf16.vlgmr.msra.gmra.mrb[44].mxu1 %vm328_vm1, %v13865_v27  ;;  %12370 = vmatmul.mubr.msk.bf16.vlgmr.msra.gmra.mrb[48].mxu0 %vm328_vm1, %v13865_v27 }
 0x1ed   : > { %5706 = vmatpush1.bf16.msra.mxu1 %v12740_v52  ;;  %5747 = vmatpush1.bf16.msra.mxu0 %v12743_v53  ;;  %v12838_v52 = vld [vmem:[%s13844_s1 + $0x144] ss:$1000 sps:$4 sm:$0xff]  }
 0x1ee   : > { %5707 = vmatprep.subr.bf16.mxu1 %v12748_v54  ;;  %5748 = vmatprep.subr.bf16.mxu0 %v12751_v55  ;;  %v12841_v53 = vld [vmem:[%s13844_s1 + $0x14c] ss:$1000 sps:$4 sm:$0xff]   ;;  %v12836_v54 = vld [vmem:[%s13844_s1 + $0x140] ss:$1000 sps:$4 sm:$0xff]  }
 0x1ef   : > { %5737 = vmatprep.mubr.bf16.mxu1 %v13579_v18  ;;  %5778 = vmatprep.mubr.bf16.mxu0 %v13579_v18  ;;  %v12839_v55 = vld [vmem:[%s13844_s1 + $0x148] ss:$1000 sps:$4 sm:$0xff]  }
 0x1f1   : > { %5708 = vmatpush1.bf16.msra.mxu1 %v12746_v56  ;;  %5749 = vmatpush1.bf16.msra.mxu0 %v12749_v57  ;;  %v12844_v56 = vld [vmem:[%s13844_s1 + $0x914] ss:$1000 sps:$4 sm:$0xff]  }
 0x1f2   : > { %5787 = vmatprep.subr.bf16.mxu1 %v12754_v58  ;;  %5828 = vmatprep.subr.bf16.mxu0 %v12757_v59  ;;  %v12847_v57 = vld [vmem:[%s13844_s1 + $0x91c] ss:$1000 sps:$4 sm:$0xff]   ;;  %v12842_v58 = vld [vmem:[%s13844_s1 + $0x910] ss:$1000 sps:$4 sm:$0xff]  }
 0x1f3   : > { %v12845_v59 = vld [vmem:[%s13844_s1 + $0x918] ss:$1000 sps:$4 sm:$0xff]  }
 0x1f4   : > { %12371 = vmatmul.mubr.msk.bf16.vlgmr.msra.gmra.mrb[48].mxu1 %vm328_vm1, %v13865_v27  ;;  %12372 = vmatmul.mubr.msk.bf16.vlgmr.msra.gmra.mrb[52].mxu0 %vm328_vm1, %v13865_v27 }
 0x1f5   : > { %5788 = vmatpush1.bf16.msra.mxu1 %v12752_v60  ;;  %5829 = vmatpush1.bf16.msra.mxu0 %v12755_v61  ;;  %v12850_v60 = vld [vmem:[%s13844_s1 + $0x154] ss:$1000 sps:$4 sm:$0xff]  }
 0x1f6   : > { %5789 = vmatprep.subr.bf16.mxu1 %v12760_v62  ;;  %5830 = vmatprep.subr.bf16.mxu0 %v12763_v63  ;;  %v12853_v61 = vld [vmem:[%s13844_s1 + $0x15c] ss:$1000 sps:$4 sm:$0xff]   ;;  %v12848_v62 = vld [vmem:[%s13844_s1 + $0x150] ss:$1000 sps:$4 sm:$0xff]  }
 0x1f7   : > { %5819 = vmatprep.mubr.bf16.mxu1 %v13579_v18  ;;  %5860 = vmatprep.mubr.bf16.mxu0 %v13579_v18  ;;  %v12851_v63 = vld [vmem:[%s13844_s1 + $0x158] ss:$1000 sps:$4 sm:$0xff]  }
 0x1f9   : > { %5790 = vmatpush1.bf16.msra.mxu1 %v12758_v0  ;;  %5831 = vmatpush1.bf16.msra.mxu0 %v12761_v1  ;;  %v12856_v0 = vld [vmem:[%s13844_s1 + $0x924] ss:$1000 sps:$4 sm:$0xff]  }
 0x1fa   : > { %5869 = vmatprep.subr.bf16.mxu1 %v12766_v2  ;;  %5910 = vmatprep.subr.bf16.mxu0 %v12769_v3  ;;  %v12859_v1 = vld [vmem:[%s13844_s1 + $0x92c] ss:$1000 sps:$4 sm:$0xff]   ;;  %v12854_v2 = vld [vmem:[%s13844_s1 + $0x920] ss:$1000 sps:$4 sm:$0xff]  }
 0x1fb   : > { %v12857_v3 = vld [vmem:[%s13844_s1 + $0x928] ss:$1000 sps:$4 sm:$0xff]  }
 0x1fc   : > { %12373 = vmatmul.mubr.msk.bf16.vlgmr.msra.gmra.mrb[52].mxu1 %vm328_vm1, %v13865_v27  ;;  %12374 = vmatmul.mubr.msk.bf16.vlgmr.msra.gmra.mrb[56].mxu0 %vm328_vm1, %v13865_v27 }
 0x1fd   : > { %5870 = vmatpush1.bf16.msra.mxu1 %v12764_v4  ;;  %5911 = vmatpush1.bf16.msra.mxu0 %v12767_v5  ;;  %v12862_v4 = vld [vmem:[%s13844_s1 + $0x164] ss:$1000 sps:$4 sm:$0xff]  }
 0x1fe   : > { %5871 = vmatprep.subr.bf16.mxu1 %v12772_v6  ;;  %5912 = vmatprep.subr.bf16.mxu0 %v12775_v7  ;;  %v12865_v5 = vld [vmem:[%s13844_s1 + $0x16c] ss:$1000 sps:$4 sm:$0xff]   ;;  %v12860_v6 = vld [vmem:[%s13844_s1 + $0x160] ss:$1000 sps:$4 sm:$0xff]  }
 0x1ff   : > { %5901 = vmatprep.mubr.bf16.mxu1 %v13579_v18  ;;  %5942 = vmatprep.mubr.bf16.mxu0 %v13579_v18  ;;  %v12863_v7 = vld [vmem:[%s13844_s1 + $0x168] ss:$1000 sps:$4 sm:$0xff]  }
 0x201   : > { %5872 = vmatpush1.bf16.msra.mxu1 %v12770_v8  ;;  %5913 = vmatpush1.bf16.msra.mxu0 %v12773_v9  ;;  %v12868_v8 = vld [vmem:[%s13844_s1 + $0x934] ss:$1000 sps:$4 sm:$0xff]  }
 0x202   : > { %5951 = vmatprep.subr.bf16.mxu1 %v12778_v10  ;;  %5992 = vmatprep.subr.bf16.mxu0 %v12781_v11  ;;  %v12871_v9 = vld [vmem:[%s13844_s1 + $0x93c] ss:$1000 sps:$4 sm:$0xff]   ;;  %v12866_v10 = vld [vmem:[%s13844_s1 + $0x930] ss:$1000 sps:$4 sm:$0xff]  }
 0x203   : > { %v12869_v11 = vld [vmem:[%s13844_s1 + $0x938] ss:$1000 sps:$4 sm:$0xff]  }
 0x204   : > { %12375 = vmatmul.mubr.msk.bf16.vlgmr.msra.gmra.mrb[56].mxu1 %vm328_vm1, %v13865_v27  ;;  %12376 = vmatmul.mubr.msk.bf16.vlgmr.msra.gmra.mrb[60].mxu0 %vm328_vm1, %v13865_v27 }
 0x205   : > { %5952 = vmatpush1.bf16.msra.mxu1 %v12776_v12  ;;  %5993 = vmatpush1.bf16.msra.mxu0 %v12779_v13  ;;  %v12874_v12 = vld [vmem:[%s13844_s1 + $0x174] ss:$1000 sps:$4 sm:$0xff]  }
 0x206   : > { %5953 = vmatprep.subr.bf16.mxu1 %v12784_v14  ;;  %5994 = vmatprep.subr.bf16.mxu0 %v12787_v15  ;;  %v12877_v13 = vld [vmem:[%s13844_s1 + $0x17c] ss:$1000 sps:$4 sm:$0xff]   ;;  %v12872_v14 = vld [vmem:[%s13844_s1 + $0x170] ss:$1000 sps:$4 sm:$0xff]  }
 0x207   : > { %5983 = vmatprep.mubr.bf16.mxu1 %v13579_v18  ;;  %6024 = vmatprep.mubr.bf16.mxu0 %v13579_v18  ;;  %v12875_v15 = vld [vmem:[%s13844_s1 + $0x178] ss:$1000 sps:$4 sm:$0xff]  }
 0x209   : > { %5954 = vmatpush1.bf16.msra.mxu1 %v12782_v16  ;;  %5995 = vmatpush1.bf16.msra.mxu0 %v12785_v17  ;;  %v12880_v16 = vld [vmem:[%s13844_s1 + $0x944] ss:$1000 sps:$4 sm:$0xff]  }
 0x20a   : > { %6033 = vmatprep.subr.bf16.mxu1 %v12790_v19  ;;  %6074 = vmatprep.subr.bf16.mxu0 %v12793_v20  ;;  %v12883_v17 = vld [vmem:[%s13844_s1 + $0x94c] ss:$1000 sps:$4 sm:$0xff]   ;;  %v12878_v19 = vld [vmem:[%s13844_s1 + $0x940] ss:$1000 sps:$4 sm:$0xff]  }
 0x20b   : > { %v12881_v20 = vld [vmem:[%s13844_s1 + $0x948] ss:$1000 sps:$4 sm:$0xff]  }
 0x20c   : > { %12377 = vmatmul.mubr.msk.bf16.vlgmr.msra.gmra.mrb[60].mxu1 %vm328_vm1, %v13865_v27  ;;  %12378 = vmatmul.mubr.msk.bf16.vlgmr.msra.gmra.mrb[64].mxu0 %vm328_vm1, %v13865_v27 }
 0x20d   : > { %6034 = vmatpush1.bf16.msra.mxu1 %v12788_v21  ;;  %6075 = vmatpush1.bf16.msra.mxu0 %v12791_v22  ;;  %v12886_v21 = vld [vmem:[%s13844_s1 + $0x184] ss:$1000 sps:$4 sm:$0xff]  }
 0x20e   : > { %6035 = vmatprep.subr.bf16.mxu1 %v12796_v23  ;;  %6076 = vmatprep.subr.bf16.mxu0 %v12799_v24  ;;  %v12889_v22 = vld [vmem:[%s13844_s1 + $0x18c] ss:$1000 sps:$4 sm:$0xff]   ;;  %v12884_v23 = vld [vmem:[%s13844_s1 + $0x180] ss:$1000 sps:$4 sm:$0xff]  }
 0x20f   : > { %6065 = vmatprep.mubr.bf16.mxu1 %v13579_v18  ;;  %6106 = vmatprep.mubr.bf16.mxu0 %v13579_v18  ;;  %v12887_v24 = vld [vmem:[%s13844_s1 + $0x188] ss:$1000 sps:$4 sm:$0xff]  }
 0x211   : > { %6036 = vmatpush1.bf16.msra.mxu1 %v12794_v25  ;;  %6077 = vmatpush1.bf16.msra.mxu0 %v12797_v26  ;;  %v12892_v25 = vld [vmem:[%s13844_s1 + $0x954] ss:$1000 sps:$4 sm:$0xff]  }
 0x212   : > { %6115 = vmatprep.subr.bf16.mxu1 %v12802_v28  ;;  %6156 = vmatprep.subr.bf16.mxu0 %v12805_v29  ;;  %v12895_v26 = vld [vmem:[%s13844_s1 + $0x95c] ss:$1000 sps:$4 sm:$0xff]   ;;  %v12890_v28 = vld [vmem:[%s13844_s1 + $0x950] ss:$1000 sps:$4 sm:$0xff]  }
 0x213   : > { %v12893_v29 = vld [vmem:[%s13844_s1 + $0x958] ss:$1000 sps:$4 sm:$0xff]  }
 0x214   : > { %12379 = vmatmul.mubr.msk.bf16.vlgmr.msra.gmra.mrb[64].mxu1 %vm328_vm1, %v13865_v27  ;;  %12380 = vmatmul.mubr.msk.bf16.vlgmr.msra.gmra.mrb[68].mxu0 %vm328_vm1, %v13865_v27 }
 0x215   : > { %6116 = vmatpush1.bf16.msra.mxu1 %v12800_v30  ;;  %6157 = vmatpush1.bf16.msra.mxu0 %v12803_v31  ;;  %v12898_v30 = vld [vmem:[%s13844_s1 + $0x194] ss:$1000 sps:$4 sm:$0xff]  }
 0x216   : > { %6117 = vmatprep.subr.bf16.mxu1 %v12808_v32  ;;  %6158 = vmatprep.subr.bf16.mxu0 %v12811_v33  ;;  %v12901_v31 = vld [vmem:[%s13844_s1 + $0x19c] ss:$1000 sps:$4 sm:$0xff]   ;;  %v12896_v32 = vld [vmem:[%s13844_s1 + $0x190] ss:$1000 sps:$4 sm:$0xff]  }
 0x217   : > { %6147 = vmatprep.mubr.bf16.mxu1 %v13579_v18  ;;  %6188 = vmatprep.mubr.bf16.mxu0 %v13579_v18  ;;  %v12899_v33 = vld [vmem:[%s13844_s1 + $0x198] ss:$1000 sps:$4 sm:$0xff]  }
 0x219   : > { %6118 = vmatpush1.bf16.msra.mxu1 %v12806_v34  ;;  %6159 = vmatpush1.bf16.msra.mxu0 %v12809_v35  ;;  %v12904_v34 = vld [vmem:[%s13844_s1 + $0x964] ss:$1000 sps:$4 sm:$0xff]  }
 0x21a   : > { %6197 = vmatprep.subr.bf16.mxu1 %v12814_v36  ;;  %6238 = vmatprep.subr.bf16.mxu0 %v12817_v37  ;;  %v12907_v35 = vld [vmem:[%s13844_s1 + $0x96c] ss:$1000 sps:$4 sm:$0xff]   ;;  %v12902_v36 = vld [vmem:[%s13844_s1 + $0x960] ss:$1000 sps:$4 sm:$0xff]  }
 0x21b   : > { %v12905_v37 = vld [vmem:[%s13844_s1 + $0x968] ss:$1000 sps:$4 sm:$0xff]  }
 0x21c   : > { %12381 = vmatmul.mubr.msk.bf16.vlgmr.msra.gmra.mrb[68].mxu1 %vm328_vm1, %v13865_v27  ;;  %12382 = vmatmul.mubr.msk.bf16.vlgmr.msra.gmra.mrb[72].mxu0 %vm328_vm1, %v13865_v27 }
 0x21d   : > { %6198 = vmatpush1.bf16.msra.mxu1 %v12812_v38  ;;  %6239 = vmatpush1.bf16.msra.mxu0 %v12815_v39  ;;  %v12910_v38 = vld [vmem:[%s13844_s1 + $0x1a4] ss:$1000 sps:$4 sm:$0xff]  }
 0x21e   : > { %6199 = vmatprep.subr.bf16.mxu1 %v12820_v40  ;;  %6240 = vmatprep.subr.bf16.mxu0 %v12823_v41  ;;  %v12913_v39 = vld [vmem:[%s13844_s1 + $0x1ac] ss:$1000 sps:$4 sm:$0xff]   ;;  %v3468_v40 = vlaneseq  ;;  %v12908_v41 = vld [vmem:[%s13844_s1 + $0x1a0] ss:$1000 sps:$4 sm:$0xff]  }
 0x21f   : > { %6229 = vmatprep.mubr.bf16.mxu1 %v13579_v18  ;;  %6270 = vmatprep.mubr.bf16.mxu0 %v13579_v18 }
 0x220   : > { %vm11695_vm2 = vcmp.lt.s32.totalorder %v3468_v40, 256 }
 0x221   : > { %6200 = vmatpush1.bf16.msra.mxu1 %v12818_v42  ;;  %6241 = vmatpush1.bf16.msra.mxu0 %v12821_v43  ;;  %v12911_v42 = vld [vmem:[%s13844_s1 + $0x1a8] ss:$1000 sps:$4 sm:$0xff]   ;;  %v12916_v43 = vld [vmem:[%s13844_s1 + $0x974] ss:$1000 sps:$4 sm:$0xff]  }
 0x222   : > { %6279 = vmatprep.subr.bf16.mxu1 %v12826_v44  ;;  %6320 = vmatprep.subr.bf16.mxu0 %v12829_v45  ;;  %v12919_v44 = vld [vmem:[%s13844_s1 + $0x97c] ss:$1000 sps:$4 sm:$0xff]   ;;  %v3469_v45 = vshrl.u32 %v3468_v40, 7 }
 0x224   : > { %12383 = vmatmul.mubr.msk.bf16.vlgmr.msra.gmra.mrb[72].mxu1 %vm328_vm1, %v13865_v27  ;;  %12384 = vmatmul.mubr.msk.bf16.vlgmr.msra.gmra.mrb[76].mxu0 %vm328_vm1, %v13865_v27 }
 0x225   : > { %6280 = vmatpush1.bf16.msra.mxu1 %v12824_v46  ;;  %6321 = vmatpush1.bf16.msra.mxu0 %v12827_v47  ;;  %v12914_v46 = vld [vmem:[%s13844_s1 + $0x970] ss:$1000 sps:$4 sm:$0xff]  }
 0x226   : > { %6281 = vmatprep.subr.bf16.mxu1 %v12832_v48  ;;  %6322 = vmatprep.subr.bf16.mxu0 %v12835_v49  ;;  %v12917_v47 = vld [vmem:[%s13844_s1 + $0x978] ss:$1000 sps:$4 sm:$0xff]   ;;  %v12922_v48 = vld [vmem:[%s13844_s1 + $0x1b4] ss:$1000 sps:$4 sm:$0xff]  }
 0x227   : > { %6311 = vmatprep.mubr.bf16.mxu1 %v13579_v18  ;;  %6352 = vmatprep.mubr.bf16.mxu0 %v13579_v18  ;;  %v12925_v49 = vld [vmem:[%s13844_s1 + $0x1bc] ss:$1000 sps:$4 sm:$0xff]  }
 0x229   : > { %6282 = vmatpush1.bf16.msra.mxu1 %v12830_v50  ;;  %6323 = vmatpush1.bf16.msra.mxu0 %v12833_v51  ;;  %v12920_v50 = vld [vmem:[%s13844_s1 + $0x1b0] ss:$1000 sps:$4 sm:$0xff]   ;;  %v14232_v51 = vsub.s32 0, %v3469_v45 }
 0x22a   : > { %6361 = vmatprep.subr.bf16.mxu1 %v12838_v52  ;;  %6402 = vmatprep.subr.bf16.mxu0 %v12841_v53  ;;  %v14234_v52 = vsub.s32 2, %v3469_v45  ;;  %v12923_v53 = vld [vmem:[%s13844_s1 + $0x1b8] ss:$1000 sps:$4 sm:$0xff]  }
 0x22c   : > { %12385 = vmatmul.mubr.msk.bf16.vlgmr.msra.gmra.mrb[76].mxu1 %vm328_vm1, %v13865_v27  ;;  %12386 = vmatmul.mubr.msk.bf16.vlgmr.msra.gmra.mrb[80].mxu0 %vm328_vm1, %v13865_v27 }
 0x22d   : > { %6362 = vmatpush1.bf16.msra.mxu1 %v12836_v54  ;;  %6403 = vmatpush1.bf16.msra.mxu0 %v12839_v55  ;;  %v14242_v54 = vld [vmem:[%s14239_s3] sm:$0xff]  ;;  %v14244_v55 = vsub.s32 1, %v3469_v45 }
 0x22e   : > { %6363 = vmatprep.subr.bf16.mxu1 %v12844_v56  ;;  %6404 = vmatprep.subr.bf16.mxu0 %v12847_v57  ;;  %v13580_v56 = vmov 1966171168  }
 0x22f   : > { %6393 = vmatprep.mubr.bf16.mxu1 %v13579_v18  ;;  %6434 = vmatprep.mubr.bf16.mxu0 %v13579_v18  ;;  %v10101_v57 = vunpack.c.l.s4 %v13580_v56 }
 0x231   : > { %6364 = vmatpush1.bf16.msra.mxu1 %v12842_v58  ;;  %6405 = vmatpush1.bf16.msra.mxu0 %v12845_v59  ;;  %v14246_v58 = vsub.s32 3, %v3469_v45  ;;  %v12928_v59 = vld [vmem:[%s13844_s1 + $0x984] ss:$1000 sps:$4 sm:$0xff]  }
 0x232   : > { %6443 = vmatprep.subr.bf16.mxu1 %v12850_v60  ;;  %6484 = vmatprep.subr.bf16.mxu0 %v12853_v61  ;;  %v12931_v60 = vld [vmem:[%s13844_s1 + $0x98c] ss:$1000 sps:$4 sm:$0xff]   ;;  %v3471_v61 = vrot.slane %v14242_v54, %v14232_v51 }
 0x234   : > { %12387 = vmatmul.mubr.msk.bf16.vlgmr.msra.gmra.mrb[80].mxu1 %vm328_vm1, %v13865_v27  ;;  %12388 = vmatmul.mubr.msk.bf16.vlgmr.msra.gmra.mrb[84].mxu0 %vm328_vm1, %v13865_v27 }
 0x235   : > { %6444 = vmatpush1.bf16.msra.mxu1 %v12848_v62  ;;  %6485 = vmatpush1.bf16.msra.mxu0 %v12851_v63  ;;  %v3479_v62 = vrot.slane %v14242_v54, %v14234_v52  ;;  %v12926_v63 = vld [vmem:[%s13844_s1 + $0x980] ss:$1000 sps:$4 sm:$0xff]  }
 0x236   : > { %6445 = vmatprep.subr.bf16.mxu1 %v12856_v0  ;;  %6486 = vmatprep.subr.bf16.mxu0 %v12859_v1  ;;  %v3475_v0 = vrot.slane %v14242_v54, %v14244_v55  ;;  %v10102_v1 = vunpack.c.0.s8 %v10101_v57  ;;  %v12947_v57 = vld [vmem:[%s13844_s1 + $0x1d8] ss:$1000 sps:$4 sm:$0xff]  }
 0x237   : > { %6475 = vmatprep.mubr.bf16.mxu1 %v13579_v18  ;;  %6516 = vmatprep.mubr.bf16.mxu0 %v13579_v18 }
 0x239   : > { %6446 = vmatpush1.bf16.msra.mxu1 %v12854_v2  ;;  %6487 = vmatpush1.bf16.msra.mxu0 %v12857_v3  ;;  %v3483_v2 = vrot.slane %v14242_v54, %v14246_v58  ;;  %v12929_v3 = vld [vmem:[%s13844_s1 + $0x988] ss:$1000 sps:$4 sm:$0xff]  }
 0x23a   : > { %6525 = vmatprep.subr.bf16.mxu1 %v12862_v4  ;;  %6566 = vmatprep.subr.bf16.mxu0 %v12865_v5  ;;  %v12934_v4 = vld [vmem:[%s13844_s1 + $0x1c4] ss:$1000 sps:$4 sm:$0xff]  }
 0x23b   : > { %v12937_v5 = vld [vmem:[%s13844_s1 + $0x1cc] ss:$1000 sps:$4 sm:$0xff]  }
 0x23c   : > { %12389 = vmatmul.mubr.msk.bf16.vlgmr.msra.gmra.mrb[84].mxu1 %vm328_vm1, %v13865_v27  ;;  %12390 = vmatmul.mubr.msk.bf16.vlgmr.msra.gmra.mrb[88].mxu0 %vm328_vm1, %v13865_v27 }
 0x23d   : > { %6526 = vmatpush1.bf16.msra.mxu1 %v12860_v6  ;;  %6567 = vmatpush1.bf16.msra.mxu0 %v12863_v7 }
 0x23e   : > { %6527 = vmatprep.subr.bf16.mxu1 %v12868_v8  ;;  %6568 = vmatprep.subr.bf16.mxu0 %v12871_v9  ;;  %v14268_v8 = vsub.s32 4, %v3469_v45 }
 0x23f   : > { %6557 = vmatprep.mubr.bf16.mxu1 %v13579_v18  ;;  %6598 = vmatprep.mubr.bf16.mxu0 %v13579_v18 }
 0x241   : > { %6528 = vmatpush1.bf16.msra.mxu1 %v12866_v10  ;;  %6569 = vmatpush1.bf16.msra.mxu0 %v12869_v11 }
 0x242   : > { %6607 = vmatprep.subr.bf16.mxu1 %v12874_v12  ;;  %6648 = vmatprep.subr.bf16.mxu0 %v12877_v13  ;;  %v12932_v13 = vld [vmem:[%s13844_s1 + $0x1c0] ss:$1000 sps:$4 sm:$0xff]  }
 0x244   : > { %12391 = vmatmul.mubr.msk.bf16.vlgmr.msra.gmra.mrb[88].mxu1 %vm328_vm1, %v13865_v27  ;;  %12392 = vmatmul.mubr.msk.bf16.vlgmr.msra.gmra.mrb[92].mxu0 %vm328_vm1, %v13865_v27 }
 0x245   : > { %6608 = vmatpush1.bf16.msra.mxu1 %v12872_v14  ;;  %6649 = vmatpush1.bf16.msra.mxu0 %v12875_v15  ;;  %v14271_v14 = vsub.s32 6, %v3469_v45  ;;  %v14273_v15 = vsub.s32 5, %v3469_v45 }
 0x246   : > { %6609 = vmatprep.subr.bf16.mxu1 %v12880_v16  ;;  %6650 = vmatprep.subr.bf16.mxu0 %v12883_v17  ;;  %v14275_v17 = vsub.s32 %v10102_v1, %v3469_v45 }
 0x247   : > { %6639 = vmatprep.mubr.bf16.mxu1 %v13579_v18  ;;  %6680 = vmatprep.mubr.bf16.mxu0 %v13579_v18 }
 0x249   : > { %6610 = vmatpush1.bf16.msra.mxu1 %v12878_v19  ;;  %6651 = vmatpush1.bf16.msra.mxu0 %v12881_v20 }
 0x24a   : > { %6689 = vmatprep.subr.bf16.mxu1 %v12886_v21  ;;  %6730 = vmatprep.subr.bf16.mxu0 %v12889_v22  ;;  %v12935_v22 = vld [vmem:[%s13844_s1 + $0x1c8] ss:$1000 sps:$4 sm:$0xff]  }
 0x24c   : > { %12393 = vmatmul.mubr.msk.bf16.vlgmr.msra.gmra.mrb[92].mxu1 %vm328_vm1, %v13865_v27  ;;  %12394 = vmatmul.mubr.msk.bf16.vlgmr.msra.gmra.mrb[96].mxu0 %vm328_vm1, %v13865_v27 }
 0x24d   : > { %6690 = vmatpush1.bf16.msra.mxu1 %v12884_v23  ;;  %6731 = vmatpush1.bf16.msra.mxu0 %v12887_v24  ;;  %v14278_v23 = vsub.s32 7, %v3469_v45 }
 0x24e   : > { %6691 = vmatprep.subr.bf16.mxu1 %v12892_v25  ;;  %6732 = vmatprep.subr.bf16.mxu0 %v12895_v26  ;;  %v12940_v26 = vld [vmem:[%s13844_s1 + $0x994] ss:$1000 sps:$4 sm:$0xff]  }
 0x24f   : > { %6721 = vmatprep.mubr.bf16.mxu1 %v13579_v18  ;;  %6762 = vmatprep.mubr.bf16.mxu0 %v13579_v18 }
 0x251   : > { %6692 = vmatpush1.bf16.msra.mxu1 %v12890_v28  ;;  %6733 = vmatpush1.bf16.msra.mxu0 %v12893_v29  ;;  %v12943_v28 = vld [vmem:[%s13844_s1 + $0x99c] ss:$1000 sps:$4 sm:$0xff]  }
 0x252   : > { %6771 = vmatprep.subr.bf16.mxu1 %v12898_v30  ;;  %6812 = vmatprep.subr.bf16.mxu0 %v12901_v31  ;;  %v3487_v31 = vrot.slane %v14242_v54, %v14268_v8 }
 0x254   : > { %12395 = vmatmul.mubr.msk.bf16.vlgmr.msra.gmra.mrb[96].mxu1 %vm328_vm1, %v13865_v27  ;;  %12396 = vmatmul.mubr.msk.bf16.vlgmr.msra.gmra.mrb[100].mxu0 %vm328_vm1, %v13865_v27 }
 0x255   : > { %6772 = vmatpush1.bf16.msra.mxu1 %v12896_v32  ;;  %6813 = vmatpush1.bf16.msra.mxu0 %v12899_v33  ;;  %v3495_v32 = vrot.slane %v14242_v54, %v14271_v14  ;;  %v3491_v33 = vrot.slane %v14242_v54, %v14273_v15 }
 0x256   : > { %6773 = vmatprep.subr.bf16.mxu1 %v12904_v34  ;;  %6814 = vmatprep.subr.bf16.mxu0 %v12907_v35 }
 0x257   : > { %6803 = vmatprep.mubr.bf16.mxu1 %v13579_v18  ;;  %6844 = vmatprep.mubr.bf16.mxu0 %v13579_v18 }
 0x259   : > { %6774 = vmatpush1.bf16.msra.mxu1 %v12902_v36  ;;  %6815 = vmatpush1.bf16.msra.mxu0 %v12905_v37  ;;  %v12938_v36 = vld [vmem:[%s13844_s1 + $0x990] ss:$1000 sps:$4 sm:$0xff]   ;;  %v3499_v37 = vrot.slane %v14242_v54, %v14278_v23 }
 0x25a   : > { %6853 = vmatprep.subr.bf16.mxu1 %v12910_v38  ;;  %6894 = vmatprep.subr.bf16.mxu0 %v12913_v39  ;;  %v12941_v38 = vld [vmem:[%s13844_s1 + $0x998] ss:$1000 sps:$4 sm:$0xff]   ;;  %v12946_v39 = vld [vmem:[%s13844_s1 + $0x1d4] ss:$1000 sps:$4 sm:$0xff]  }
 0x25c   : > { %12397 = vmatmul.mubr.msk.bf16.vlgmr.msra.gmra.mrb[100].mxu1 %vm328_vm1, %v13865_v27  ;;  %12398 = vmatmul.mubr.msk.bf16.vlgmr.msra.gmra.mrb[104].mxu0 %vm328_vm1, %v13865_v27 }
 0x25d   : > { %6854 = vmatpush1.bf16.msra.mxu1 %v12908_v41  ;;  %6895 = vmatpush1.bf16.msra.mxu0 %v12911_v42  ;;  %v12949_v41 = vld [vmem:[%s13844_s1 + $0x1dc] ss:$1000 sps:$4 sm:$0xff]  }
 0x25e   : > { %6855 = vmatprep.subr.bf16.mxu1 %v12916_v43  ;;  %6896 = vmatprep.subr.bf16.mxu0 %v12919_v44 }
 0x25f   : > { %6885 = vmatprep.mubr.bf16.mxu1 %v13579_v18  ;;  %6926 = vmatprep.mubr.bf16.mxu0 %v13579_v18 }
 0x261   : > { %6856 = vmatpush1.bf16.msra.mxu1 %v12914_v46  ;;  %6897 = vmatpush1.bf16.msra.mxu0 %v12917_v47 }
 0x262   : > { %6935 = vmatprep.subr.bf16.mxu1 %v12922_v48  ;;  %6976 = vmatprep.subr.bf16.mxu0 %v12925_v49  ;;  %v12944_v49 = vld [vmem:[%s13844_s1 + $0x1d0] ss:$1000 sps:$4 sm:$0xff]  }
 0x264   : > { %12399 = vmatmul.mubr.msk.bf16.vlgmr.msra.gmra.mrb[104].mxu1 %vm328_vm1, %v13865_v27  ;;  %12400 = vmatmul.mubr.msk.bf16.vlgmr.msra.gmra.mrb[108].mxu0 %vm328_vm1, %v13865_v27 }
 0x265   : > { %6936 = vmatpush1.bf16.msra.mxu1 %v12920_v50  ;;  %6977 = vmatpush1.bf16.msra.mxu0 %v12923_v53 }
 0x266   : > { %6937 = vmatprep.subr.bf16.mxu1 %v12928_v59  ;;  %6978 = vmatprep.subr.bf16.mxu0 %v12931_v60  ;;  %v14305_v59 = vld [vmem:[%s14239_s3 + $0x8] sm:$0xff] }
 0x267   : > { %v4755_v6 = vpop.f32.mrb[0].mxu1  ;;  %v4796_v7 = vpop.f32.mrb[4].mxu0  ;;  %6967 = vmatprep.mubr.bf16.mxu1 %v13579_v18  ;;  %7008 = vmatprep.mubr.bf16.mxu0 %v13579_v18 }
 0x268   : > { %v4756_v9 = vadd.f32 %v4755_v6, %v3471_v61  ;;  %v4797_v10 = vadd.f32 %v4796_v7, %v3479_v62  ;;  %v4757_v11 = vpop.f32.mrb[1].mxu1  ;;  %v4798_v12 = vpop.f32.mrb[5].mxu0  ;;  %v12952_v62 = vld [vmem:[%s13844_s1 + $0x9a4] ss:$1000 sps:$4 sm:$0xff]   ;;  %v12950_v7 = vld [vmem:[%s13844_s1 + $0x9a0] ss:$1000 sps:$4 sm:$0xff]  }
 0x269   : > { %v4758_v16 = vadd.f32 %v4757_v11, %v3475_v0  ;;  %v4799_v19 = vadd.f32 %v4798_v12, %v3483_v2  ;;  %6938 = vmatpush1.bf16.msra.mxu1 %v12926_v63  ;;  %v4759_v20 = vpop.f32.mrb[2].mxu1  ;;  %v4800_v21 = vpop.f32.mrb[6].mxu0  ;;  %6979 = vmatpush1.bf16.msra.mxu0 %v12929_v3  ;;  %v12955_v63 = vld [vmem:[%s13844_s1 + $0x9ac] ss:$1000 sps:$4 sm:$0xff]   ;;  %v3503_v2 = vrot.slane %v14305_v59, %v14232_v51 }
 0x26a   : > { %v4760_v24 = vpop.f32.mrb[3].mxu1  ;;  %v4801_v25 = vpop.f32.mrb[7].mxu0  ;;  %7017 = vmatprep.subr.bf16.mxu1 %v12934_v4  ;;  %7058 = vmatprep.subr.bf16.mxu0 %v12937_v5  ;;  %v3511_v3 = vrot.slane %v14305_v59, %v14234_v52  ;;  %v3507_v4 = vrot.slane %v14305_v59, %v14244_v55  ;;  %v12958_v11 = vld [vmem:[%s13844_s1 + $0x1e4] ss:$1000 sps:$4 sm:$0xff]  }
 0x26b   : > { %v10096_v29 = vcombine.low %v4756_v9, %v4758_v16  ;;  %v10097_v30 = vcombine.low %v4797_v10, %v4799_v19  ;;  %v3515_v9 = vrot.slane %v14305_v59, %v14246_v58  ;;  %v12953_v10 = vld [vmem:[%s13844_s1 + $0x9a8] ss:$1000 sps:$4 sm:$0xff]   ;;  %v12961_v12 = vld [vmem:[%s13844_s1 + $0x1ec] ss:$1000 sps:$4 sm:$0xff]  }
 0x26c   : > { %12401 = vmatmul.mubr.msk.bf16.vlgmr.msra.gmra.mrb[108].mxu1 %vm328_vm1, %v13865_v27  ;;  %12402 = vmatmul.mubr.msk.bf16.vlgmr.msra.gmra.mrb[112].mxu0 %vm328_vm1, %v13865_v27 }
 0x26d   : > { %v10106_v34 = vrot.slane %v10096_v29, %v14275_v17  ;;  %v10113_v35 = vrot.slane %v10097_v30, %v14275_v17  ;;  %7018 = vmatpush1.bf16.msra.mxu1 %v12932_v13  ;;  %7059 = vmatpush1.bf16.msra.mxu0 %v12935_v22 }
 0x26e   : > { %7019 = vmatprep.subr.bf16.mxu1 %v12940_v26  ;;  %7060 = vmatprep.subr.bf16.mxu0 %v12943_v28 }
 0x26f   : > { %v10128_v42 = vcombine.low %v10106_v34, %v10113_v35  ;;  %v4837_v43 = vpop.f32.mrb[4].mxu1  ;;  %v4878_v44 = vpop.f32.mrb[8].mxu0  ;;  %7049 = vmatprep.mubr.bf16.mxu1 %v13579_v18  ;;  %7090 = vmatprep.mubr.bf16.mxu0 %v13579_v18 }
 0x270   : > { %v4838_v45 = vadd.f32 %v4837_v43, %v3487_v31  ;;  %v4879_v46 = vadd.f32 %v4878_v44, %v3495_v32  ;;  %v4839_v47 = vpop.f32.mrb[5].mxu1  ;;  %v4880_v48 = vpop.f32.mrb[9].mxu0  ;;  %v12956_v32 = vld [vmem:[%s13844_s1 + $0x1e0] ss:$1000 sps:$4 sm:$0xff]   ;;  %v3527_v43 = vrot.slane %v14305_v59, %v14271_v14  ;;  %v3523_v44 = vrot.slane %v14305_v59, %v14273_v15 }
 0x271   : > { %v4840_v50 = vadd.f32 %v4839_v47, %v3491_v33  ;;  %v4881_v53 = vadd.f32 %v4880_v48, %v3499_v37  ;;  %7020 = vmatpush1.bf16.msra.mxu1 %v12938_v36  ;;  %v4841_v54 = vpop.f32.mrb[6].mxu1  ;;  %v4882_v56 = vpop.f32.mrb[10].mxu0  ;;  %7061 = vmatpush1.bf16.msra.mxu0 %v12941_v38  ;;  %v10136_v20 = vrot.slane %v10128_v42, %v14275_v17  ;;  %v12959_v33 = vld [vmem:[%s13844_s1 + $0x1e8] ss:$1000 sps:$4 sm:$0xff]   ;;  %v12964_v36 = vld [vmem:[%s13844_s1 + $0x9b4] ss:$1000 sps:$4 sm:$0xff]  }
 0x272   : > { %v4842_v60 = vpop.f32.mrb[7].mxu1  ;;  %v4883_v61 = vpop.f32.mrb[11].mxu0  ;;  %7099 = vmatprep.subr.bf16.mxu1 %v12946_v39  ;;  %7140 = vmatprep.subr.bf16.mxu0 %v12949_v41  ;;  %v12967_v37 = vld [vmem:[%s13844_s1 + $0x9bc] ss:$1000 sps:$4 sm:$0xff]   ;;  %v3519_v42 = vrot.slane %v14305_v59, %v14268_v8  ;;  %v12962_v47 = vld [vmem:[%s13844_s1 + $0x9b0] ss:$1000 sps:$4 sm:$0xff]   ;;  %v3531_v48 = vrot.slane %v14305_v59, %v14278_v23 }
 0x273   : > { %v10098_v0 = vcombine.low %v4838_v45, %v4840_v50  ;;  %v10099_v1 = vcombine.low %v4879_v46, %v4881_v53  ;;  %v12970_v50 = vld [vmem:[%s13844_s1 + $0x1f4] ss:$1000 sps:$4 sm:$0xff]  }
 0x274   : > { %12403 = vmatmul.mubr.msk.bf16.vlgmr.msra.gmra.mrb[112].mxu1 %vm328_vm1, %v13865_v27  ;;  %12404 = vmatmul.mubr.msk.bf16.vlgmr.msra.gmra.mrb[116].mxu0 %vm328_vm1, %v13865_v27  ;;  %v12973_v53 = vld [vmem:[%s13844_s1 + $0x1fc] ss:$1000 sps:$4 sm:$0xff]  }
 0x275   : > { %v10120_v5 = vrot.slane %v10098_v0, %v14275_v17  ;;  %v10127_v6 = vrot.slane %v10099_v1, %v14275_v17  ;;  %7100 = vmatpush1.bf16.msra.mxu1 %v12944_v49  ;;  %7141 = vmatpush1.bf16.msra.mxu0 %v12947_v57  ;;  %v12965_v49 = vld [vmem:[%s13844_s1 + $0x9b8] ss:$1000 sps:$4 sm:$0xff]  }
 0x276   : > { %7101 = vmatprep.subr.bf16.mxu1 %v12952_v62  ;;  %7142 = vmatprep.subr.bf16.mxu0 %v12955_v63  ;;  %v12968_v63 = vld [vmem:[%s13844_s1 + $0x1f0] ss:$1000 sps:$4 sm:$0xff]  }
 0x277   : > { %v10129_v13 = vcombine.low %v10120_v5, %v10127_v6  ;;  %v4919_v16 = vpop.f32.mrb[8].mxu1  ;;  %v4960_v19 = vpop.f32.mrb[12].mxu0  ;;  %7131 = vmatprep.mubr.bf16.mxu1 %v13579_v18  ;;  %7172 = vmatprep.mubr.bf16.mxu0 %v13579_v18  ;;  %v14363_v5 = vld [vmem:[%s14239_s3 + $0x10] sm:$0xff] }
 0x278   : > { %v4920_v21 = vadd.f32 %v4919_v16, %v3503_v2  ;;  %v4961_v22 = vadd.f32 %v4960_v19, %v3511_v3  ;;  %v4921_v24 = vpop.f32.mrb[9].mxu1  ;;  %v4962_v25 = vpop.f32.mrb[13].mxu0  ;;  %v3543_v16 = vrot.slane %v14363_v5, %v14234_v52  ;;  %v3539_v19 = vrot.slane %v14363_v5, %v14244_v55 }
 0x279   : > { %v10143_v26 = vrot.slane %v10129_v13, %v14275_v17  ;;  %v4922_v28 = vadd.f32 %v4921_v24, %v3507_v4  ;;  %v4963_v29 = vadd.f32 %v4962_v25, %v3515_v9  ;;  %7102 = vmatpush1.bf16.msra.mxu1 %v12950_v7  ;;  %v4923_v30 = vpop.f32.mrb[10].mxu1  ;;  %v4964_v31 = vpop.f32.mrb[14].mxu0  ;;  %7143 = vmatpush1.bf16.msra.mxu0 %v12953_v10  ;;  %v12971_v4 = vld [vmem:[%s13844_s1 + $0x1f8] ss:$1000 sps:$4 sm:$0xff]   ;;  %v12976_v9 = vld [vmem:[%s13844_s1 + $0x9c4] ss:$1000 sps:$4 sm:$0xff]  }
 0x27a   : > { %v4924_v34 = vpop.f32.mrb[11].mxu1  ;;  %v4965_v35 = vpop.f32.mrb[15].mxu0  ;;  %7181 = vmatprep.subr.bf16.mxu1 %v12958_v11  ;;  %7222 = vmatprep.subr.bf16.mxu0 %v12961_v12  ;;  %v12979_v10 = vld [vmem:[%s13844_s1 + $0x9cc] ss:$1000 sps:$4 sm:$0xff]   ;;  %v3535_v13 = vrot.slane %v14363_v5, %v14232_v51  ;;  %v3547_v24 = vrot.slane %v14363_v5, %v14246_v58  ;;  %v12977_v25 = vld [vmem:[%s13844_s1 + $0x9c8] ss:$1000 sps:$4 sm:$0xff]  }
 0x27b   : > { %v10144_v38 = vcombine.low %v10136_v20, %v10143_v26  ;;  %v10145_v39 = vcombine.low %v4920_v21, %v4922_v28  ;;  %v10146_v41 = vcombine.low %v4961_v22, %v4963_v29  ;;  %v12974_v22 = vld [vmem:[%s13844_s1 + $0x9c0] ss:$1000 sps:$4 sm:$0xff]   ;;  %v12982_v26 = vld [vmem:[%s13844_s1 + $0x204] ss:$1000 sps:$4 sm:$0xff]  }
 0x27c   : > { %12405 = vmatmul.mubr.msk.bf16.vlgmr.msra.gmra.mrb[116].mxu1 %vm328_vm1, %v13865_v27  ;;  %12406 = vmatmul.mubr.msk.bf16.vlgmr.msra.gmra.mrb[120].mxu0 %vm328_vm1, %v13865_v27  ;;  %v12985_v28 = vld [vmem:[%s13844_s1 + $0x20c] ss:$1000 sps:$4 sm:$0xff]  }
 0x27d   : > { %11662 = vst [vmem:[%s14347_s6] sm:$0xff] %v10144_v38  ;;  %v10155_v45 = vrot.slane %v10145_v39, %v14275_v17  ;;  %v10162_v46 = vrot.slane %v10146_v41, %v14275_v17  ;;  %7182 = vmatpush1.bf16.msra.mxu1 %v12956_v32  ;;  %7223 = vmatpush1.bf16.msra.mxu0 %v12959_v33 }
 0x27e   : > { %7183 = vmatprep.subr.bf16.mxu1 %v12964_v36  ;;  %7224 = vmatprep.subr.bf16.mxu0 %v12967_v37 }
 0x27f   : > { %v10177_v54 = vcombine.low %v10155_v45, %v10162_v46  ;;  %v5001_v56 = vpop.f32.mrb[12].mxu1  ;;  %v5042_v57 = vpop.f32.mrb[16].mxu0  ;;  %7213 = vmatprep.mubr.bf16.mxu1 %v13579_v18  ;;  %7254 = vmatprep.mubr.bf16.mxu0 %v13579_v18 }
 0x280   : > { %v5002_v60 = vadd.f32 %v5001_v56, %v3519_v42  ;;  %v5043_v61 = vadd.f32 %v5042_v57, %v3527_v43  ;;  %v5003_v62 = vpop.f32.mrb[13].mxu1  ;;  %v5044_v59 = vpop.f32.mrb[17].mxu0  ;;  %v12980_v43 = vld [vmem:[%s13844_s1 + $0x200] ss:$1000 sps:$4 sm:$0xff]   ;;  %v3559_v56 = vrot.slane %v14363_v5, %v14271_v14  ;;  %v3555_v57 = vrot.slane %v14363_v5, %v14273_v15 }
 0x281   : > { %v5004_v0 = vadd.f32 %v5003_v62, %v3523_v44  ;;  %v5045_v1 = vadd.f32 %v5044_v59, %v3531_v48  ;;  %7184 = vmatpush1.bf16.msra.mxu1 %v12962_v47  ;;  %v5005_v2 = vpop.f32.mrb[14].mxu1  ;;  %v5046_v3 = vpop.f32.mrb[18].mxu0  ;;  %7225 = vmatpush1.bf16.msra.mxu0 %v12965_v49  ;;  %v10185_v32 = vrot.slane %v10177_v54, %v14275_v17  ;;  %v12983_v44 = vld [vmem:[%s13844_s1 + $0x208] ss:$1000 sps:$4 sm:$0xff]   ;;  %v12988_v47 = vld [vmem:[%s13844_s1 + $0x9d4] ss:$1000 sps:$4 sm:$0xff]  }
 0x282   : > { %v5006_v6 = vpop.f32.mrb[15].mxu1  ;;  %v5047_v7 = vpop.f32.mrb[19].mxu0  ;;  %7263 = vmatprep.subr.bf16.mxu1 %v12970_v50  ;;  %7304 = vmatprep.subr.bf16.mxu0 %v12973_v53  ;;  %v12991_v48 = vld [vmem:[%s13844_s1 + $0x9dc] ss:$1000 sps:$4 sm:$0xff]   ;;  %v3551_v54 = vrot.slane %v14363_v5, %v14268_v8  ;;  %v12986_v62 = vld [vmem:[%s13844_s1 + $0x9d0] ss:$1000 sps:$4 sm:$0xff]   ;;  %v3563_v59 = vrot.slane %v14363_v5, %v14278_v23 }
 0x283   : > { %v10147_v11 = vcombine.low %v5002_v60, %v5004_v0  ;;  %v10148_v12 = vcombine.low %v5043_v61, %v5045_v1  ;;  %v12994_v0 = vld [vmem:[%s13844_s1 + $0x214] ss:$1000 sps:$4 sm:$0xff]  }
 0x284   : > { %12407 = vmatmul.mubr.msk.bf16.vlgmr.msra.gmra.mrb[120].mxu1 %vm328_vm1, %v13865_v27  ;;  %12408 = vmatmul.mubr.msk.bf16.vlgmr.msra.gmra.mrb[124].mxu0 %vm328_vm1, %v13865_v27  ;;  %v12997_v1 = vld [vmem:[%s13844_s1 + $0x21c] ss:$1000 sps:$4 sm:$0xff]  }
 0x285   : > { %v10169_v20 = vrot.slane %v10147_v11, %v14275_v17  ;;  %v10176_v21 = vrot.slane %v10148_v12, %v14275_v17  ;;  %7264 = vmatpush1.bf16.msra.mxu1 %v12968_v63  ;;  %7305 = vmatpush1.bf16.msra.mxu0 %v12971_v4  ;;  %v12989_v63 = vld [vmem:[%s13844_s1 + $0x9d8] ss:$1000 sps:$4 sm:$0xff]  }
 0x286   : > { %7265 = vmatprep.subr.bf16.mxu1 %v12976_v9  ;;  %7306 = vmatprep.subr.bf16.mxu0 %v12979_v10  ;;  %v12992_v10 = vld [vmem:[%s13844_s1 + $0x210] ss:$1000 sps:$4 sm:$0xff]  }
 0x287   : > { %v10178_v29 = vcombine.low %v10169_v20, %v10176_v21  ;;  %v5083_v30 = vpop.f32.mrb[16].mxu1  ;;  %v5124_v31 = vpop.f32.mrb[20].mxu0  ;;  %7295 = vmatprep.mubr.bf16.mxu1 %v13579_v18  ;;  %7336 = vmatprep.mubr.bf16.mxu0 %v13579_v18  ;;  %v14417_v20 = vld [vmem:[%s14239_s3 + $0x18] sm:$0xff] }
 0x288   : > { %v5084_v33 = vadd.f32 %v5083_v30, %v3535_v13  ;;  %v5125_v34 = vadd.f32 %v5124_v31, %v3543_v16  ;;  %v5085_v35 = vpop.f32.mrb[17].mxu1  ;;  %v5126_v36 = vpop.f32.mrb[21].mxu0  ;;  %v3575_v30 = vrot.slane %v14417_v20, %v14234_v52  ;;  %v3571_v31 = vrot.slane %v14417_v20, %v14244_v55 }
 0x289   : > { %v10192_v37 = vrot.slane %v10178_v29, %v14275_v17  ;;  %v5086_v38 = vadd.f32 %v5085_v35, %v3539_v19  ;;  %v5127_v39 = vadd.f32 %v5126_v36, %v3547_v24  ;;  %7266 = vmatpush1.bf16.msra.mxu1 %v12974_v22  ;;  %v5087_v41 = vpop.f32.mrb[18].mxu1  ;;  %v5128_v42 = vpop.f32.mrb[22].mxu0  ;;  %7307 = vmatpush1.bf16.msra.mxu0 %v12977_v25  ;;  %v12995_v19 = vld [vmem:[%s13844_s1 + $0x218] ss:$1000 sps:$4 sm:$0xff]   ;;  %v13000_v24 = vld [vmem:[%s13844_s1 + $0x9e4] ss:$1000 sps:$4 sm:$0xff]  }
 0x28a   : > { %v5088_v45 = vpop.f32.mrb[19].mxu1  ;;  %v5129_v46 = vpop.f32.mrb[23].mxu0  ;;  %7345 = vmatprep.subr.bf16.mxu1 %v12982_v26  ;;  %7386 = vmatprep.subr.bf16.mxu0 %v12985_v28  ;;  %v13003_v25 = vld [vmem:[%s13844_s1 + $0x9ec] ss:$1000 sps:$4 sm:$0xff]   ;;  %v3567_v29 = vrot.slane %v14417_v20, %v14232_v51  ;;  %v3579_v35 = vrot.slane %v14417_v20, %v14246_v58  ;;  %v13001_v36 = vld [vmem:[%s13844_s1 + $0x9e8] ss:$1000 sps:$4 sm:$0xff]  }
 0x28b   : > { %v10193_v49 = vcombine.low %v10185_v32, %v10192_v37  ;;  %v10194_v50 = vcombine.low %v5084_v33, %v5086_v38  ;;  %v10195_v53 = vcombine.low %v5125_v34, %v5127_v39  ;;  %v12998_v34 = vld [vmem:[%s13844_s1 + $0x9e0] ss:$1000 sps:$4 sm:$0xff]   ;;  %v13006_v37 = vld [vmem:[%s13844_s1 + $0x224] ss:$1000 sps:$4 sm:$0xff]  }
 0x28c   : > { %12409 = vmatmul.mubr.msk.bf16.vlgmr.msra.gmra.mrb[124].mxu1 %vm328_vm1, %v13865_v27  ;;  %12410 = vmatmul.mubr.msk.bf16.vlgmr.msra.gmra.mrb[128].mxu0 %vm328_vm1, %v13865_v27  ;;  %v13009_v38 = vld [vmem:[%s13844_s1 + $0x22c] ss:$1000 sps:$4 sm:$0xff]  }
 0x28d   : > { %11663 = vst [vmem:[%s14347_s6 + $0x8] sm:$0xff] %v10193_v49  ;;  %v10204_v60 = vrot.slane %v10194_v50, %v14275_v17  ;;  %v10211_v61 = vrot.slane %v10195_v53, %v14275_v17  ;;  %7346 = vmatpush1.bf16.msra.mxu1 %v12980_v43  ;;  %7387 = vmatpush1.bf16.msra.mxu0 %v12983_v44 }
 0x28e   : > { %7347 = vmatprep.subr.bf16.mxu1 %v12988_v47  ;;  %7388 = vmatprep.subr.bf16.mxu0 %v12991_v48 }
 0x28f   : > { %v10226_v2 = vcombine.low %v10204_v60, %v10211_v61  ;;  %v5165_v3 = vpop.f32.mrb[20].mxu1  ;;  %v5206_v4 = vpop.f32.mrb[24].mxu0  ;;  %7377 = vmatprep.mubr.bf16.mxu1 %v13579_v18  ;;  %7418 = vmatprep.mubr.bf16.mxu0 %v13579_v18 }
 0x290   : > { %v5166_v6 = vadd.f32 %v5165_v3, %v3551_v54  ;;  %v5207_v7 = vadd.f32 %v5206_v4, %v3559_v56  ;;  %v5167_v9 = vpop.f32.mrb[21].mxu1  ;;  %v5208_v5 = vpop.f32.mrb[25].mxu0  ;;  %v13004_v56 = vld [vmem:[%s13844_s1 + $0x220] ss:$1000 sps:$4 sm:$0xff]   ;;  %v3591_v3 = vrot.slane %v14417_v20, %v14271_v14  ;;  %v3587_v4 = vrot.slane %v14417_v20, %v14273_v15 }
 0x291   : > { %v5168_v11 = vadd.f32 %v5167_v9, %v3555_v57  ;;  %v5209_v12 = vadd.f32 %v5208_v5, %v3563_v59  ;;  %7348 = vmatpush1.bf16.msra.mxu1 %v12986_v62  ;;  %v5169_v13 = vpop.f32.mrb[22].mxu1  ;;  %v5210_v16 = vpop.f32.mrb[26].mxu0  ;;  %7389 = vmatpush1.bf16.msra.mxu0 %v12989_v63  ;;  %v10234_v43 = vrot.slane %v10226_v2, %v14275_v17  ;;  %v13007_v57 = vld [vmem:[%s13844_s1 + $0x228] ss:$1000 sps:$4 sm:$0xff]   ;;  %v13012_v62 = vld [vmem:[%s13844_s1 + $0x9f4] ss:$1000 sps:$4 sm:$0xff]  }
 0x292   : > { %v5170_v21 = vpop.f32.mrb[23].mxu1  ;;  %v5211_v22 = vpop.f32.mrb[27].mxu0  ;;  %7427 = vmatprep.subr.bf16.mxu1 %v12994_v0  ;;  %7468 = vmatprep.subr.bf16.mxu0 %v12997_v1  ;;  %v13015_v59 = vld [vmem:[%s13844_s1 + $0x9fc] ss:$1000 sps:$4 sm:$0xff]   ;;  %v3583_v2 = vrot.slane %v14417_v20, %v14268_v8  ;;  %v13010_v9 = vld [vmem:[%s13844_s1 + $0x9f0] ss:$1000 sps:$4 sm:$0xff]   ;;  %v3595_v5 = vrot.slane %v14417_v20, %v14278_v23 }
 0x293   : > { %v10196_v26 = vcombine.low %v5166_v6, %v5168_v11  ;;  %v10197_v28 = vcombine.low %v5207_v7, %v5209_v12  ;;  %v13018_v11 = vld [vmem:[%s13844_s1 + $0x234] ss:$1000 sps:$4 sm:$0xff]  }
 0x294   : > { %12411 = vmatmul.mubr.msk.bf16.vlgmr.msra.gmra.mrb[128].mxu1 %vm328_vm1, %v13865_v27  ;;  %12412 = vmatmul.mubr.msk.bf16.vlgmr.msra.gmra.mrb[132].mxu0 %vm328_vm1, %v13865_v27  ;;  %v13021_v12 = vld [vmem:[%s13844_s1 + $0x23c] ss:$1000 sps:$4 sm:$0xff]  }
 0x295   : > { %v10218_v32 = vrot.slane %v10196_v26, %v14275_v17  ;;  %v10225_v33 = vrot.slane %v10197_v28, %v14275_v17  ;;  %7428 = vmatpush1.bf16.msra.mxu1 %v12992_v10  ;;  %7469 = vmatpush1.bf16.msra.mxu0 %v12995_v19  ;;  %v13013_v10 = vld [vmem:[%s13844_s1 + $0x9f8] ss:$1000 sps:$4 sm:$0xff]  }
 0x296   : > { %7429 = vmatprep.subr.bf16.mxu1 %v13000_v24  ;;  %7470 = vmatprep.subr.bf16.mxu0 %v13003_v25  ;;  %v13016_v25 = vld [vmem:[%s13844_s1 + $0x230] ss:$1000 sps:$4 sm:$0xff]  }
 0x297   : > { %v10227_v39 = vcombine.low %v10218_v32, %v10225_v33  ;;  %v5247_v41 = vpop.f32.mrb[24].mxu1  ;;  %v5288_v42 = vpop.f32.mrb[28].mxu0  ;;  %7459 = vmatprep.mubr.bf16.mxu1 %v13579_v18  ;;  %7500 = vmatprep.mubr.bf16.mxu0 %v13579_v18  ;;  %v14471_v32 = vld [vmem:[%s14239_s3 + $0x20] sm:$0xff] }
 0x298   : > { %v5248_v44 = vadd.f32 %v5247_v41, %v3567_v29  ;;  %v5289_v45 = vadd.f32 %v5288_v42, %v3575_v30  ;;  %v5249_v46 = vpop.f32.mrb[25].mxu1  ;;  %v5290_v47 = vpop.f32.mrb[29].mxu0  ;;  %v3607_v41 = vrot.slane %v14471_v32, %v14234_v52  ;;  %v3603_v42 = vrot.slane %v14471_v32, %v14244_v55 }
 0x299   : > { %v10241_v48 = vrot.slane %v10227_v39, %v14275_v17  ;;  %v5250_v49 = vadd.f32 %v5249_v46, %v3571_v31  ;;  %v5291_v50 = vadd.f32 %v5290_v47, %v3579_v35  ;;  %7430 = vmatpush1.bf16.msra.mxu1 %v12998_v34  ;;  %v5251_v53 = vpop.f32.mrb[26].mxu1  ;;  %v5292_v54 = vpop.f32.mrb[30].mxu0  ;;  %7471 = vmatpush1.bf16.msra.mxu0 %v13001_v36  ;;  %v13019_v31 = vld [vmem:[%s13844_s1 + $0x238] ss:$1000 sps:$4 sm:$0xff]   ;;  %v13024_v35 = vld [vmem:[%s13844_s1 + $0xa04] ss:$1000 sps:$4 sm:$0xff]  }
 0x29a   : > { %v5252_v60 = vpop.f32.mrb[27].mxu1  ;;  %v5293_v61 = vpop.f32.mrb[31].mxu0  ;;  %7509 = vmatprep.subr.bf16.mxu1 %v13006_v37  ;;  %7550 = vmatprep.subr.bf16.mxu0 %v13009_v38  ;;  %v13027_v36 = vld [vmem:[%s13844_s1 + $0xa0c] ss:$1000 sps:$4 sm:$0xff]   ;;  %v3599_v39 = vrot.slane %v14471_v32, %v14232_v51  ;;  %v3611_v46 = vrot.slane %v14471_v32, %v14246_v58  ;;  %v13025_v47 = vld [vmem:[%s13844_s1 + $0xa08] ss:$1000 sps:$4 sm:$0xff]  }
 0x29b   : > { %v10242_v63 = vcombine.low %v10234_v43, %v10241_v48  ;;  %v10243_v0 = vcombine.low %v5248_v44, %v5250_v49  ;;  %v10244_v1 = vcombine.low %v5289_v45, %v5291_v50  ;;  %v13022_v45 = vld [vmem:[%s13844_s1 + $0xa00] ss:$1000 sps:$4 sm:$0xff]   ;;  %v13030_v48 = vld [vmem:[%s13844_s1 + $0x244] ss:$1000 sps:$4 sm:$0xff]  }
 0x29c   : > { %12413 = vmatmul.mubr.msk.bf16.vlgmr.msra.gmra.mrb[132].mxu1 %vm328_vm1, %v13865_v27  ;;  %12414 = vmatmul.mubr.msk.bf16.vlgmr.msra.gmra.mrb[136].mxu0 %vm328_vm1, %v13865_v27  ;;  %v13033_v49 = vld [vmem:[%s13844_s1 + $0x24c] ss:$1000 sps:$4 sm:$0xff]  }
 0x29d   : > { %11664 = vst [vmem:[%s14347_s6 + $0x10] sm:$0xff] %v10242_v63  ;;  %v10253_v6 = vrot.slane %v10243_v0, %v14275_v17  ;;  %v10260_v7 = vrot.slane %v10244_v1, %v14275_v17  ;;  %7510 = vmatpush1.bf16.msra.mxu1 %v13004_v56  ;;  %7551 = vmatpush1.bf16.msra.mxu0 %v13007_v57 }
 0x29e   : > { %7511 = vmatprep.subr.bf16.mxu1 %v13012_v62  ;;  %7552 = vmatprep.subr.bf16.mxu0 %v13015_v59 }
 0x29f   : > { %v10275_v13 = vcombine.low %v10253_v6, %v10260_v7  ;;  %v5329_v16 = vpop.f32.mrb[28].mxu1  ;;  %v5370_v19 = vpop.f32.mrb[32].mxu0  ;;  %7541 = vmatprep.mubr.bf16.mxu1 %v13579_v18  ;;  %7582 = vmatprep.mubr.bf16.mxu0 %v13579_v18 }
 0x2a0   : > { %v5330_v21 = vadd.f32 %v5329_v16, %v3583_v2  ;;  %v5371_v22 = vadd.f32 %v5370_v19, %v3591_v3  ;;  %v5331_v24 = vpop.f32.mrb[29].mxu1  ;;  %v5372_v20 = vpop.f32.mrb[33].mxu0  ;;  %v13028_v3 = vld [vmem:[%s13844_s1 + $0x240] ss:$1000 sps:$4 sm:$0xff]   ;;  %v3623_v16 = vrot.slane %v14471_v32, %v14271_v14  ;;  %v3619_v19 = vrot.slane %v14471_v32, %v14273_v15 }
 0x2a1   : > { %v5332_v26 = vadd.f32 %v5331_v24, %v3587_v4  ;;  %v5373_v28 = vadd.f32 %v5372_v20, %v3595_v5  ;;  %7512 = vmatpush1.bf16.msra.mxu1 %v13010_v9  ;;  %v5333_v29 = vpop.f32.mrb[30].mxu1  ;;  %v5374_v30 = vpop.f32.mrb[34].mxu0  ;;  %7553 = vmatpush1.bf16.msra.mxu0 %v13013_v10  ;;  %v10283_v56 = vrot.slane %v10275_v13, %v14275_v17  ;;  %v13031_v4 = vld [vmem:[%s13844_s1 + $0x248] ss:$1000 sps:$4 sm:$0xff]   ;;  %v13036_v9 = vld [vmem:[%s13844_s1 + $0xa14] ss:$1000 sps:$4 sm:$0xff]  }
 0x2a2   : > { %v5334_v33 = vpop.f32.mrb[31].mxu1  ;;  %v5375_v34 = vpop.f32.mrb[35].mxu0  ;;  %7591 = vmatprep.subr.bf16.mxu1 %v13018_v11  ;;  %7632 = vmatprep.subr.bf16.mxu0 %v13021_v12  ;;  %v13039_v5 = vld [vmem:[%s13844_s1 + $0xa1c] ss:$1000 sps:$4 sm:$0xff]   ;;  %v3615_v13 = vrot.slane %v14471_v32, %v14268_v8  ;;  %v13034_v24 = vld [vmem:[%s13844_s1 + $0xa10] ss:$1000 sps:$4 sm:$0xff]   ;;  %v3627_v20 = vrot.slane %v14471_v32, %v14278_v23 }
 0x2a3   : > { %v10245_v37 = vcombine.low %v5330_v21, %v5332_v26  ;;  %v10246_v38 = vcombine.low %v5371_v22, %v5373_v28  ;;  %v13042_v26 = vld [vmem:[%s13844_s1 + $0x254] ss:$1000 sps:$4 sm:$0xff]  }
 0x2a4   : > { %12415 = vmatmul.mubr.msk.bf16.vlgmr.msra.gmra.mrb[136].mxu1 %vm328_vm1, %v13865_v27  ;;  %12416 = vmatmul.mubr.msk.bf16.vlgmr.msra.gmra.mrb[140].mxu0 %vm328_vm1, %v13865_v27  ;;  %v13045_v28 = vld [vmem:[%s13844_s1 + $0x25c] ss:$1000 sps:$4 sm:$0xff]  }
 0x2a5   : > { %v10267_v43 = vrot.slane %v10245_v37, %v14275_v17  ;;  %v10274_v44 = vrot.slane %v10246_v38, %v14275_v17  ;;  %7592 = vmatpush1.bf16.msra.mxu1 %v13016_v25  ;;  %7633 = vmatpush1.bf16.msra.mxu0 %v13019_v31  ;;  %v13037_v25 = vld [vmem:[%s13844_s1 + $0xa18] ss:$1000 sps:$4 sm:$0xff]  }
 0x2a6   : > { %7593 = vmatprep.subr.bf16.mxu1 %v13024_v35  ;;  %7634 = vmatprep.subr.bf16.mxu0 %v13027_v36  ;;  %v13040_v36 = vld [vmem:[%s13844_s1 + $0x250] ss:$1000 sps:$4 sm:$0xff]  }
 0x2a7   : > { %v10276_v50 = vcombine.low %v10267_v43, %v10274_v44  ;;  %v5411_v53 = vpop.f32.mrb[32].mxu1  ;;  %v5452_v54 = vpop.f32.mrb[36].mxu0  ;;  %7623 = vmatprep.mubr.bf16.mxu1 %v13579_v18  ;;  %7664 = vmatprep.mubr.bf16.mxu0 %v13579_v18  ;;  %v14525_v43 = vld [vmem:[%s14239_s3 + $0x28] sm:$0xff] }
 0x2a8   : > { %v5412_v57 = vadd.f32 %v5411_v53, %v3599_v39  ;;  %v5453_v60 = vadd.f32 %v5452_v54, %v3607_v41  ;;  %v5413_v61 = vpop.f32.mrb[33].mxu1  ;;  %v5454_v62 = vpop.f32.mrb[37].mxu0  ;;  %v3639_v53 = vrot.slane %v14525_v43, %v14234_v52  ;;  %v3635_v54 = vrot.slane %v14525_v43, %v14244_v55 }
 0x2a9   : > { %v10290_v59 = vrot.slane %v10276_v50, %v14275_v17  ;;  %v5414_v63 = vadd.f32 %v5413_v61, %v3603_v42  ;;  %v5455_v0 = vadd.f32 %v5454_v62, %v3611_v46  ;;  %7594 = vmatpush1.bf16.msra.mxu1 %v13022_v45  ;;  %v5415_v1 = vpop.f32.mrb[34].mxu1  ;;  %v5456_v2 = vpop.f32.mrb[38].mxu0  ;;  %7635 = vmatpush1.bf16.msra.mxu0 %v13025_v47  ;;  %v13043_v42 = vld [vmem:[%s13844_s1 + $0x258] ss:$1000 sps:$4 sm:$0xff]   ;;  %v13048_v46 = vld [vmem:[%s13844_s1 + $0xa24] ss:$1000 sps:$4 sm:$0xff]  }
 0x2aa   : > { %v5416_v6 = vpop.f32.mrb[35].mxu1  ;;  %v5457_v7 = vpop.f32.mrb[39].mxu0  ;;  %7673 = vmatprep.subr.bf16.mxu1 %v13030_v48  ;;  %7714 = vmatprep.subr.bf16.mxu0 %v13033_v49  ;;  %v13051_v47 = vld [vmem:[%s13844_s1 + $0xa2c] ss:$1000 sps:$4 sm:$0xff]   ;;  %v3631_v50 = vrot.slane %v14525_v43, %v14232_v51  ;;  %v3643_v61 = vrot.slane %v14525_v43, %v14246_v58  ;;  %v13049_v62 = vld [vmem:[%s13844_s1 + $0xa28] ss:$1000 sps:$4 sm:$0xff]  }
 0x2ab   : > { %v10291_v10 = vcombine.low %v10283_v56, %v10290_v59  ;;  %v10292_v11 = vcombine.low %v5412_v57, %v5414_v63  ;;  %v10293_v12 = vcombine.low %v5453_v60, %v5455_v0  ;;  %v13046_v60 = vld [vmem:[%s13844_s1 + $0xa20] ss:$1000 sps:$4 sm:$0xff]   ;;  %v13054_v59 = vld [vmem:[%s13844_s1 + $0x264] ss:$1000 sps:$4 sm:$0xff]  }
 0x2ac   : > { %12417 = vmatmul.mubr.msk.bf16.vlgmr.msra.gmra.mrb[140].mxu1 %vm328_vm1, %v13865_v27  ;;  %12418 = vmatmul.mubr.msk.bf16.vlgmr.msra.gmra.mrb[144].mxu0 %vm328_vm1, %v13865_v27  ;;  %v13057_v63 = vld [vmem:[%s13844_s1 + $0x26c] ss:$1000 sps:$4 sm:$0xff]  }
 0x2ad   : > { %11665 = vst [vmem:[%s14347_s6 + $0x18] sm:$0xff] %v10291_v10  ;;  %v10302_v21 = vrot.slane %v10292_v11, %v14275_v17  ;;  %v10309_v22 = vrot.slane %v10293_v12, %v14275_v17  ;;  %7674 = vmatpush1.bf16.msra.mxu1 %v13028_v3  ;;  %7715 = vmatpush1.bf16.msra.mxu0 %v13031_v4 }
 0x2ae   : > { %7675 = vmatprep.subr.bf16.mxu1 %v13036_v9  ;;  %7716 = vmatprep.subr.bf16.mxu0 %v13039_v5 }
 0x2af   : > { %v10324_v29 = vcombine.low %v10302_v21, %v10309_v22  ;;  %v5493_v30 = vpop.f32.mrb[36].mxu1  ;;  %v5534_v31 = vpop.f32.mrb[40].mxu0  ;;  %7705 = vmatprep.mubr.bf16.mxu1 %v13579_v18  ;;  %7746 = vmatprep.mubr.bf16.mxu0 %v13579_v18 }
 0x2b0   : > { %v5494_v33 = vadd.f32 %v5493_v30, %v3615_v13  ;;  %v5535_v34 = vadd.f32 %v5534_v31, %v3623_v16  ;;  %v5495_v35 = vpop.f32.mrb[37].mxu1  ;;  %v5536_v32 = vpop.f32.mrb[41].mxu0  ;;  %v13052_v16 = vld [vmem:[%s13844_s1 + $0x260] ss:$1000 sps:$4 sm:$0xff]   ;;  %v3655_v30 = vrot.slane %v14525_v43, %v14271_v14  ;;  %v3651_v31 = vrot.slane %v14525_v43, %v14273_v15 }
 0x2b1   : > { %v5496_v37 = vadd.f32 %v5495_v35, %v3619_v19  ;;  %v5537_v38 = vadd.f32 %v5536_v32, %v3627_v20  ;;  %7676 = vmatpush1.bf16.msra.mxu1 %v13034_v24  ;;  %v5497_v39 = vpop.f32.mrb[38].mxu1  ;;  %v5538_v41 = vpop.f32.mrb[42].mxu0  ;;  %7717 = vmatpush1.bf16.msra.mxu0 %v13037_v25  ;;  %v10332_v3 = vrot.slane %v10324_v29, %v14275_v17  ;;  %v13055_v19 = vld [vmem:[%s13844_s1 + $0x268] ss:$1000 sps:$4 sm:$0xff]   ;;  %v13060_v24 = vld [vmem:[%s13844_s1 + $0xa34] ss:$1000 sps:$4 sm:$0xff]  }
 0x2b2   : > { %v5498_v44 = vpop.f32.mrb[39].mxu1  ;;  %v5539_v45 = vpop.f32.mrb[43].mxu0  ;;  %7755 = vmatprep.subr.bf16.mxu1 %v13042_v26  ;;  %7796 = vmatprep.subr.bf16.mxu0 %v13045_v28  ;;  %v13063_v20 = vld [vmem:[%s13844_s1 + $0xa3c] ss:$1000 sps:$4 sm:$0xff]   ;;  %v3647_v29 = vrot.slane %v14525_v43, %v14268_v8  ;;  %v13058_v35 = vld [vmem:[%s13844_s1 + $0xa30] ss:$1000 sps:$4 sm:$0xff]   ;;  %v3659_v32 = vrot.slane %v14525_v43, %v14278_v23 }
 0x2b3   : > { %v10294_v48 = vcombine.low %v5494_v33, %v5496_v37  ;;  %v10295_v49 = vcombine.low %v5535_v34, %v5537_v38  ;;  %v13066_v37 = vld [vmem:[%s13844_s1 + $0x274] ss:$1000 sps:$4 sm:$0xff]  }
 0x2b4   : > { %12419 = vmatmul.mubr.msk.bf16.vlgmr.msra.gmra.mrb[144].mxu1 %vm328_vm1, %v13865_v27  ;;  %12420 = vmatmul.mubr.msk.bf16.vlgmr.msra.gmra.mrb[148].mxu0 %vm328_vm1, %v13865_v27  ;;  %v13069_v38 = vld [vmem:[%s13844_s1 + $0x27c] ss:$1000 sps:$4 sm:$0xff]  }
 0x2b5   : > { %v10316_v56 = vrot.slane %v10294_v48, %v14275_v17  ;;  %v10323_v57 = vrot.slane %v10295_v49, %v14275_v17  ;;  %7756 = vmatpush1.bf16.msra.mxu1 %v13040_v36  ;;  %7797 = vmatpush1.bf16.msra.mxu0 %v13043_v42  ;;  %v13061_v36 = vld [vmem:[%s13844_s1 + $0xa38] ss:$1000 sps:$4 sm:$0xff]  }
 0x2b6   : > { %7757 = vmatprep.subr.bf16.mxu1 %v13048_v46  ;;  %7798 = vmatprep.subr.bf16.mxu0 %v13051_v47  ;;  %v13064_v47 = vld [vmem:[%s13844_s1 + $0x270] ss:$1000 sps:$4 sm:$0xff]  }
 0x2b7   : > { %v10325_v0 = vcombine.low %v10316_v56, %v10323_v57  ;;  %v5575_v1 = vpop.f32.mrb[40].mxu1  ;;  %v5616_v2 = vpop.f32.mrb[44].mxu0  ;;  %7787 = vmatprep.mubr.bf16.mxu1 %v13579_v18  ;;  %7828 = vmatprep.mubr.bf16.mxu0 %v13579_v18  ;;  %v14579_v56 = vld [vmem:[%s14239_s3 + $0x30] sm:$0xff] }
 0x2b8   : > { %v5576_v4 = vadd.f32 %v5575_v1, %v3631_v50  ;;  %v5617_v6 = vadd.f32 %v5616_v2, %v3639_v53  ;;  %v5577_v7 = vpop.f32.mrb[41].mxu1  ;;  %v5618_v9 = vpop.f32.mrb[45].mxu0  ;;  %v3671_v1 = vrot.slane %v14579_v56, %v14234_v52  ;;  %v3667_v2 = vrot.slane %v14579_v56, %v14244_v55 }
 0x2b9   : > { %v10339_v5 = vrot.slane %v10325_v0, %v14275_v17  ;;  %v5578_v10 = vadd.f32 %v5577_v7, %v3635_v54  ;;  %v5619_v11 = vadd.f32 %v5618_v9, %v3643_v61  ;;  %7758 = vmatpush1.bf16.msra.mxu1 %v13046_v60  ;;  %v5579_v12 = vpop.f32.mrb[42].mxu1  ;;  %v5620_v13 = vpop.f32.mrb[46].mxu0  ;;  %7799 = vmatpush1.bf16.msra.mxu0 %v13049_v62  ;;  %v13067_v54 = vld [vmem:[%s13844_s1 + $0x278] ss:$1000 sps:$4 sm:$0xff]   ;;  %v13072_v61 = vld [vmem:[%s13844_s1 + $0xa44] ss:$1000 sps:$4 sm:$0xff]  }
 0x2ba   : > { %v5580_v21 = vpop.f32.mrb[43].mxu1  ;;  %v5621_v22 = vpop.f32.mrb[47].mxu0  ;;  %7837 = vmatprep.subr.bf16.mxu1 %v13054_v59  ;;  %7878 = vmatprep.subr.bf16.mxu0 %v13057_v63  ;;  %v13075_v62 = vld [vmem:[%s13844_s1 + $0xa4c] ss:$1000 sps:$4 sm:$0xff]   ;;  %v3663_v0 = vrot.slane %v14579_v56, %v14232_v51  ;;  %v3675_v7 = vrot.slane %v14579_v56, %v14246_v58  ;;  %v13073_v9 = vld [vmem:[%s13844_s1 + $0xa48] ss:$1000 sps:$4 sm:$0xff]  }
 0x2bb   : > { %v10340_v25 = vcombine.low %v10332_v3, %v10339_v5  ;;  %v10341_v26 = vcombine.low %v5576_v4, %v5578_v10  ;;  %v10342_v28 = vcombine.low %v5617_v6, %v5619_v11  ;;  %v13070_v6 = vld [vmem:[%s13844_s1 + $0xa40] ss:$1000 sps:$4 sm:$0xff]   ;;  %v13078_v5 = vld [vmem:[%s13844_s1 + $0x284] ss:$1000 sps:$4 sm:$0xff]  }
 0x2bc   : > { %12421 = vmatmul.mubr.msk.bf16.vlgmr.msra.gmra.mrb[148].mxu1 %vm328_vm1, %v13865_v27  ;;  %12422 = vmatmul.mubr.msk.bf16.vlgmr.msra.gmra.mrb[152].mxu0 %vm328_vm1, %v13865_v27  ;;  %v13081_v10 = vld [vmem:[%s13844_s1 + $0x28c] ss:$1000 sps:$4 sm:$0xff]  }
 0x2bd   : > { %11666 = vst [vmem:[%s14347_s6 + $0x20] sm:$0xff] %v10340_v25  ;;  %v10351_v33 = vrot.slane %v10341_v26, %v14275_v17  ;;  %v10358_v34 = vrot.slane %v10342_v28, %v14275_v17  ;;  %7838 = vmatpush1.bf16.msra.mxu1 %v13052_v16  ;;  %7879 = vmatpush1.bf16.msra.mxu0 %v13055_v19 }
 0x2be   : > { %7839 = vmatprep.subr.bf16.mxu1 %v13060_v24  ;;  %7880 = vmatprep.subr.bf16.mxu0 %v13063_v20 }
 0x2bf   : > { %v10373_v39 = vcombine.low %v10351_v33, %v10358_v34  ;;  %v5657_v41 = vpop.f32.mrb[44].mxu1  ;;  %v5698_v42 = vpop.f32.mrb[48].mxu0  ;;  %7869 = vmatprep.mubr.bf16.mxu1 %v13579_v18  ;;  %7910 = vmatprep.mubr.bf16.mxu0 %v13579_v18 }
 0x2c0   : > { %v5658_v44 = vadd.f32 %v5657_v41, %v3647_v29  ;;  %v5699_v45 = vadd.f32 %v5698_v42, %v3655_v30  ;;  %v5659_v46 = vpop.f32.mrb[45].mxu1  ;;  %v5700_v43 = vpop.f32.mrb[49].mxu0  ;;  %v13076_v30 = vld [vmem:[%s13844_s1 + $0x280] ss:$1000 sps:$4 sm:$0xff]   ;;  %v3687_v41 = vrot.slane %v14579_v56, %v14271_v14  ;;  %v3683_v42 = vrot.slane %v14579_v56, %v14273_v15 }
 0x2c1   : > { %v5660_v48 = vadd.f32 %v5659_v46, %v3651_v31  ;;  %v5701_v49 = vadd.f32 %v5700_v43, %v3659_v32  ;;  %7840 = vmatpush1.bf16.msra.mxu1 %v13058_v35  ;;  %v5661_v50 = vpop.f32.mrb[46].mxu1  ;;  %v5702_v53 = vpop.f32.mrb[50].mxu0  ;;  %7881 = vmatpush1.bf16.msra.mxu0 %v13061_v36  ;;  %v10381_v16 = vrot.slane %v10373_v39, %v14275_v17  ;;  %v13079_v31 = vld [vmem:[%s13844_s1 + $0x288] ss:$1000 sps:$4 sm:$0xff]   ;;  %v13084_v35 = vld [vmem:[%s13844_s1 + $0xa54] ss:$1000 sps:$4 sm:$0xff]  }
 0x2c2   : > { %v5662_v57 = vpop.f32.mrb[47].mxu1  ;;  %v5703_v60 = vpop.f32.mrb[51].mxu0  ;;  %7919 = vmatprep.subr.bf16.mxu1 %v13066_v37  ;;  %7960 = vmatprep.subr.bf16.mxu0 %v13069_v38  ;;  %v13087_v32 = vld [vmem:[%s13844_s1 + $0xa5c] ss:$1000 sps:$4 sm:$0xff]   ;;  %v3679_v39 = vrot.slane %v14579_v56, %v14268_v8  ;;  %v13082_v46 = vld [vmem:[%s13844_s1 + $0xa50] ss:$1000 sps:$4 sm:$0xff]   ;;  %v3691_v43 = vrot.slane %v14579_v56, %v14278_v23 }
 0x2c3   : > { %v10343_v59 = vcombine.low %v5658_v44, %v5660_v48  ;;  %v10344_v63 = vcombine.low %v5699_v45, %v5701_v49  ;;  %v13090_v48 = vld [vmem:[%s13844_s1 + $0x294] ss:$1000 sps:$4 sm:$0xff]  }
 0x2c4   : > { %12423 = vmatmul.mubr.msk.bf16.vlgmr.msra.gmra.mrb[152].mxu1 %vm328_vm1, %v13865_v27  ;;  %12424 = vmatmul.mubr.msk.bf16.vlgmr.msra.gmra.mrb[156].mxu0 %vm328_vm1, %v13865_v27  ;;  %v13093_v49 = vld [vmem:[%s13844_s1 + $0x29c] ss:$1000 sps:$4 sm:$0xff]  }
 0x2c5   : > { %v10365_v3 = vrot.slane %v10343_v59, %v14275_v17  ;;  %v10372_v4 = vrot.slane %v10344_v63, %v14275_v17  ;;  %7920 = vmatpush1.bf16.msra.mxu1 %v13064_v47  ;;  %7961 = vmatpush1.bf16.msra.mxu0 %v13067_v54  ;;  %v13085_v47 = vld [vmem:[%s13844_s1 + $0xa58] ss:$1000 sps:$4 sm:$0xff]  }
 0x2c6   : > { %7921 = vmatprep.subr.bf16.mxu1 %v13072_v61  ;;  %7962 = vmatprep.subr.bf16.mxu0 %v13075_v62  ;;  %v13088_v62 = vld [vmem:[%s13844_s1 + $0x290] ss:$1000 sps:$4 sm:$0xff]  }
 0x2c7   : > { %v10374_v11 = vcombine.low %v10365_v3, %v10372_v4  ;;  %v5739_v12 = vpop.f32.mrb[48].mxu1  ;;  %v5780_v13 = vpop.f32.mrb[52].mxu0  ;;  %7951 = vmatprep.mubr.bf16.mxu1 %v13579_v18  ;;  %7992 = vmatprep.mubr.bf16.mxu0 %v13579_v18  ;;  %v14633_v3 = vld [vmem:[%s14239_s3 + $0x38] sm:$0xff] }
 0x2c8   : > { %v5740_v19 = vadd.f32 %v5739_v12, %v3663_v0  ;;  %v5781_v21 = vadd.f32 %v5780_v13, %v3671_v1  ;;  %v5741_v22 = vpop.f32.mrb[49].mxu1  ;;  %v5782_v24 = vpop.f32.mrb[53].mxu0  ;;  %v3703_v12 = vrot.slane %v14633_v3, %v14234_v52  ;;  %v3699_v13 = vrot.slane %v14633_v3, %v14244_v55 }
 0x2c9   : > { %v10388_v20 = vrot.slane %v10374_v11, %v14275_v17  ;;  %v5742_v25 = vadd.f32 %v5741_v22, %v3667_v2  ;;  %v5783_v26 = vadd.f32 %v5782_v24, %v3675_v7  ;;  %7922 = vmatpush1.bf16.msra.mxu1 %v13070_v6  ;;  %v5743_v28 = vpop.f32.mrb[50].mxu1  ;;  %v5784_v29 = vpop.f32.mrb[54].mxu0  ;;  %7963 = vmatpush1.bf16.msra.mxu0 %v13073_v9  ;;  %v13091_v2 = vld [vmem:[%s13844_s1 + $0x298] ss:$1000 sps:$4 sm:$0xff]   ;;  %v13096_v7 = vld [vmem:[%s13844_s1 + $0xa64] ss:$1000 sps:$4 sm:$0xff]  }
 0x2ca   : > { %v5744_v33 = vpop.f32.mrb[51].mxu1  ;;  %v5785_v34 = vpop.f32.mrb[55].mxu0  ;;  %8001 = vmatprep.subr.bf16.mxu1 %v13078_v5  ;;  %8042 = vmatprep.subr.bf16.mxu0 %v13081_v10  ;;  %v13099_v9 = vld [vmem:[%s13844_s1 + $0xa6c] ss:$1000 sps:$4 sm:$0xff]   ;;  %v3695_v11 = vrot.slane %v14633_v3, %v14232_v51  ;;  %v3707_v22 = vrot.slane %v14633_v3, %v14246_v58  ;;  %v13097_v24 = vld [vmem:[%s13844_s1 + $0xa68] ss:$1000 sps:$4 sm:$0xff]  }
 0x2cb   : > { %v10389_v36 = vcombine.low %v10381_v16, %v10388_v20  ;;  %v10390_v37 = vcombine.low %v5740_v19, %v5742_v25  ;;  %v10391_v38 = vcombine.low %v5781_v21, %v5783_v26  ;;  %v13094_v21 = vld [vmem:[%s13844_s1 + $0xa60] ss:$1000 sps:$4 sm:$0xff]   ;;  %v13102_v20 = vld [vmem:[%s13844_s1 + $0x2a4] ss:$1000 sps:$4 sm:$0xff]  }
 0x2cc   : > { %12425 = vmatmul.mubr.msk.bf16.vlgmr.msra.gmra.mrb[156].mxu1 %vm328_vm1, %v13865_v27  ;;  %12426 = vmatmul.mubr.msk.bf16.vlgmr.msra.gmra.mrb[160].mxu0 %vm328_vm1, %v13865_v27  ;;  %v13105_v25 = vld [vmem:[%s13844_s1 + $0x2ac] ss:$1000 sps:$4 sm:$0xff]  }
 0x2cd   : > { %11667 = vst [vmem:[%s14347_s6 + $0x28] sm:$0xff] %v10389_v36  ;;  %v10400_v44 = vrot.slane %v10390_v37, %v14275_v17  ;;  %v10407_v45 = vrot.slane %v10391_v38, %v14275_v17  ;;  %8002 = vmatpush1.bf16.msra.mxu1 %v13076_v30  ;;  %8043 = vmatpush1.bf16.msra.mxu0 %v13079_v31 }
 0x2ce   : > { %8003 = vmatprep.subr.bf16.mxu1 %v13084_v35  ;;  %8044 = vmatprep.subr.bf16.mxu0 %v13087_v32 }
 0x2cf   : > { %v10422_v50 = vcombine.low %v10400_v44, %v10407_v45  ;;  %v5821_v53 = vpop.f32.mrb[52].mxu1  ;;  %v5862_v54 = vpop.f32.mrb[56].mxu0  ;;  %8033 = vmatprep.mubr.bf16.mxu1 %v13579_v18  ;;  %8074 = vmatprep.mubr.bf16.mxu0 %v13579_v18 }
 0x2d0   : > { %v5822_v57 = vadd.f32 %v5821_v53, %v3679_v39  ;;  %v5863_v60 = vadd.f32 %v5862_v54, %v3687_v41  ;;  %v5823_v61 = vpop.f32.mrb[53].mxu1  ;;  %v5864_v56 = vpop.f32.mrb[57].mxu0  ;;  %v13100_v41 = vld [vmem:[%s13844_s1 + $0x2a0] ss:$1000 sps:$4 sm:$0xff]   ;;  %v3719_v53 = vrot.slane %v14633_v3, %v14271_v14  ;;  %v3715_v54 = vrot.slane %v14633_v3, %v14273_v15 }
 0x2d1   : > { %v5824_v59 = vadd.f32 %v5823_v61, %v3683_v42  ;;  %v5865_v63 = vadd.f32 %v5864_v56, %v3691_v43  ;;  %8004 = vmatpush1.bf16.msra.mxu1 %v13082_v46  ;;  %v5825_v0 = vpop.f32.mrb[54].mxu1  ;;  %v5866_v1 = vpop.f32.mrb[58].mxu0  ;;  %8045 = vmatpush1.bf16.msra.mxu0 %v13085_v47  ;;  %v10430_v30 = vrot.slane %v10422_v50, %v14275_v17  ;;  %v13103_v42 = vld [vmem:[%s13844_s1 + $0x2a8] ss:$1000 sps:$4 sm:$0xff]   ;;  %v13108_v46 = vld [vmem:[%s13844_s1 + $0xa74] ss:$1000 sps:$4 sm:$0xff]  }
 0x2d2   : > { %v5826_v4 = vpop.f32.mrb[55].mxu1  ;;  %v5867_v6 = vpop.f32.mrb[59].mxu0  ;;  %8083 = vmatprep.subr.bf16.mxu1 %v13090_v48  ;;  %8124 = vmatprep.subr.bf16.mxu0 %v13093_v49  ;;  %v13111_v43 = vld [vmem:[%s13844_s1 + $0xa7c] ss:$1000 sps:$4 sm:$0xff]   ;;  %v3711_v50 = vrot.slane %v14633_v3, %v14268_v8  ;;  %v13106_v61 = vld [vmem:[%s13844_s1 + $0xa70] ss:$1000 sps:$4 sm:$0xff]   ;;  %v3723_v56 = vrot.slane %v14633_v3, %v14278_v23 }
 0x2d3   : > { %v10392_v5 = vcombine.low %v5822_v57, %v5824_v59  ;;  %v10393_v10 = vcombine.low %v5863_v60, %v5865_v63  ;;  %v13114_v59 = vld [vmem:[%s13844_s1 + $0x2b4] ss:$1000 sps:$4 sm:$0xff]  }
 0x2d4   : > { %12427 = vmatmul.mubr.msk.bf16.vlgmr.msra.gmra.mrb[160].mxu1 %vm328_vm1, %v13865_v27  ;;  %12428 = vmatmul.mubr.msk.bf16.vlgmr.msra.gmra.mrb[164].mxu0 %vm328_vm1, %v13865_v27  ;;  %v13117_v63 = vld [vmem:[%s13844_s1 + $0x2bc] ss:$1000 sps:$4 sm:$0xff]  }
 0x2d5   : > { %v10414_v16 = vrot.slane %v10392_v5, %v14275_v17  ;;  %v10421_v19 = vrot.slane %v10393_v10, %v14275_v17  ;;  %8084 = vmatpush1.bf16.msra.mxu1 %v13088_v62  ;;  %8125 = vmatpush1.bf16.msra.mxu0 %v13091_v2  ;;  %v13109_v62 = vld [vmem:[%s13844_s1 + $0xa78] ss:$1000 sps:$4 sm:$0xff]  }
 0x2d6   : > { %8085 = vmatprep.subr.bf16.mxu1 %v13096_v7  ;;  %8126 = vmatprep.subr.bf16.mxu0 %v13099_v9  ;;  %v13112_v9 = vld [vmem:[%s13844_s1 + $0x2b0] ss:$1000 sps:$4 sm:$0xff]  }
 0x2d7   : > { %v10423_v26 = vcombine.low %v10414_v16, %v10421_v19  ;;  %v5903_v28 = vpop.f32.mrb[56].mxu1  ;;  %v5944_v29 = vpop.f32.mrb[60].mxu0  ;;  %8115 = vmatprep.mubr.bf16.mxu1 %v13579_v18  ;;  %8156 = vmatprep.mubr.bf16.mxu0 %v13579_v18  ;;  %v14687_v16 = vld [vmem:[%s14239_s3 + $0x40] sm:$0xff] }
 0x2d8   : > { %v5904_v31 = vadd.f32 %v5903_v28, %v3695_v11  ;;  %v5945_v33 = vadd.f32 %v5944_v29, %v3703_v12  ;;  %v5905_v34 = vpop.f32.mrb[57].mxu1  ;;  %v5946_v35 = vpop.f32.mrb[61].mxu0  ;;  %v3735_v28 = vrot.slane %v14687_v16, %v14234_v52  ;;  %v3731_v29 = vrot.slane %v14687_v16, %v14244_v55 }
 0x2d9   : > { %v10437_v32 = vrot.slane %v10423_v26, %v14275_v17  ;;  %v5906_v36 = vadd.f32 %v5905_v34, %v3699_v13  ;;  %v5947_v37 = vadd.f32 %v5946_v35, %v3707_v22  ;;  %8086 = vmatpush1.bf16.msra.mxu1 %v13094_v21  ;;  %v5907_v38 = vpop.f32.mrb[58].mxu1  ;;  %v5948_v39 = vpop.f32.mrb[62].mxu0  ;;  %8127 = vmatpush1.bf16.msra.mxu0 %v13097_v24  ;;  %v13115_v13 = vld [vmem:[%s13844_s1 + $0x2b8] ss:$1000 sps:$4 sm:$0xff]   ;;  %v13120_v22 = vld [vmem:[%s13844_s1 + $0xa84] ss:$1000 sps:$4 sm:$0xff]  }
 0x2da   : > { %v5908_v44 = vpop.f32.mrb[59].mxu1  ;;  %v5949_v45 = vpop.f32.mrb[63].mxu0  ;;  %8165 = vmatprep.subr.bf16.mxu1 %v13102_v20  ;;  %8206 = vmatprep.subr.bf16.mxu0 %v13105_v25  ;;  %v13123_v24 = vld [vmem:[%s13844_s1 + $0xa8c] ss:$1000 sps:$4 sm:$0xff]   ;;  %v3727_v26 = vrot.slane %v14687_v16, %v14232_v51  ;;  %v3739_v34 = vrot.slane %v14687_v16, %v14246_v58  ;;  %v13121_v35 = vld [vmem:[%s13844_s1 + $0xa88] ss:$1000 sps:$4 sm:$0xff]  }
 0x2db   : > { %v10438_v47 = vcombine.low %v10430_v30, %v10437_v32  ;;  %v10439_v48 = vcombine.low %v5904_v31, %v5906_v36  ;;  %v10440_v49 = vcombine.low %v5945_v33, %v5947_v37  ;;  %v13118_v33 = vld [vmem:[%s13844_s1 + $0xa80] ss:$1000 sps:$4 sm:$0xff]   ;;  %v13126_v32 = vld [vmem:[%s13844_s1 + $0x2c4] ss:$1000 sps:$4 sm:$0xff]  }
 0x2dc   : > { %12429 = vmatmul.mubr.msk.bf16.vlgmr.msra.gmra.mrb[164].mxu1 %vm328_vm1, %v13865_v27  ;;  %12430 = vmatmul.mubr.msk.bf16.vlgmr.msra.gmra.mrb[168].mxu0 %vm328_vm1, %v13865_v27  ;;  %v13129_v36 = vld [vmem:[%s13844_s1 + $0x2cc] ss:$1000 sps:$4 sm:$0xff]  }
 0x2dd   : > { %11668 = vst [vmem:[%s14347_s6 + $0x30] sm:$0xff] %v10438_v47  ;;  %v10449_v57 = vrot.slane %v10439_v48, %v14275_v17  ;;  %v10456_v60 = vrot.slane %v10440_v49, %v14275_v17  ;;  %8166 = vmatpush1.bf16.msra.mxu1 %v13100_v41  ;;  %8207 = vmatpush1.bf16.msra.mxu0 %v13103_v42 }
 0x2de   : > { %8167 = vmatprep.subr.bf16.mxu1 %v13108_v46  ;;  %8208 = vmatprep.subr.bf16.mxu0 %v13111_v43 }
 0x2df   : > { %v10471_v0 = vcombine.low %v10449_v57, %v10456_v60  ;;  %v5985_v1 = vpop.f32.mrb[60].mxu1  ;;  %v6026_v2 = vpop.f32.mrb[64].mxu0  ;;  %8197 = vmatprep.mubr.bf16.mxu1 %v13579_v18  ;;  %8238 = vmatprep.mubr.bf16.mxu0 %v13579_v18 }
 0x2e0   : > { %v5986_v4 = vadd.f32 %v5985_v1, %v3711_v50  ;;  %v6027_v6 = vadd.f32 %v6026_v2, %v3719_v53  ;;  %v5987_v7 = vpop.f32.mrb[61].mxu1  ;;  %v6028_v3 = vpop.f32.mrb[65].mxu0  ;;  %v13124_v53 = vld [vmem:[%s13844_s1 + $0x2c0] ss:$1000 sps:$4 sm:$0xff]   ;;  %v3751_v1 = vrot.slane %v14687_v16, %v14271_v14  ;;  %v3747_v2 = vrot.slane %v14687_v16, %v14273_v15 }
 0x2e1   : > { %v5988_v5 = vadd.f32 %v5987_v7, %v3715_v54  ;;  %v6029_v10 = vadd.f32 %v6028_v3, %v3723_v56  ;;  %8168 = vmatpush1.bf16.msra.mxu1 %v13106_v61  ;;  %v5989_v11 = vpop.f32.mrb[62].mxu1  ;;  %v6030_v12 = vpop.f32.mrb[66].mxu0  ;;  %8209 = vmatpush1.bf16.msra.mxu0 %v13109_v62  ;;  %v10479_v41 = vrot.slane %v10471_v0, %v14275_v17  ;;  %v13127_v54 = vld [vmem:[%s13844_s1 + $0x2c8] ss:$1000 sps:$4 sm:$0xff]   ;;  %v13132_v61 = vld [vmem:[%s13844_s1 + $0xa94] ss:$1000 sps:$4 sm:$0xff]  }
 0x2e2   : > { %v5990_v19 = vpop.f32.mrb[63].mxu1  ;;  %v6031_v21 = vpop.f32.mrb[67].mxu0  ;;  %8247 = vmatprep.subr.bf16.mxu1 %v13114_v59  ;;  %8288 = vmatprep.subr.bf16.mxu0 %v13117_v63  ;;  %v13135_v56 = vld [vmem:[%s13844_s1 + $0xa9c] ss:$1000 sps:$4 sm:$0xff]   ;;  %v3743_v0 = vrot.slane %v14687_v16, %v14268_v8  ;;  %v13130_v7 = vld [vmem:[%s13844_s1 + $0xa90] ss:$1000 sps:$4 sm:$0xff]   ;;  %v3755_v3 = vrot.slane %v14687_v16, %v14278_v23 }
 0x2e3   : > { %v10441_v20 = vcombine.low %v5986_v4, %v5988_v5  ;;  %v10442_v25 = vcombine.low %v6027_v6, %v6029_v10  ;;  %v13138_v5 = vld [vmem:[%s13844_s1 + $0x2d4] ss:$1000 sps:$4 sm:$0xff]  }
 0x2e4   : > { %12431 = vmatmul.mubr.msk.bf16.vlgmr.msra.gmra.mrb[168].mxu1 %vm328_vm1, %v13865_v27  ;;  %12432 = vmatmul.mubr.msk.bf16.vlgmr.msra.gmra.mrb[172].mxu0 %vm328_vm1, %v13865_v27  ;;  %v13141_v10 = vld [vmem:[%s13844_s1 + $0x2dc] ss:$1000 sps:$4 sm:$0xff]  }
 0x2e5   : > { %v10463_v30 = vrot.slane %v10441_v20, %v14275_v17  ;;  %v10470_v31 = vrot.slane %v10442_v25, %v14275_v17  ;;  %8248 = vmatpush1.bf16.msra.mxu1 %v13112_v9  ;;  %8289 = vmatpush1.bf16.msra.mxu0 %v13115_v13  ;;  %v13133_v9 = vld [vmem:[%s13844_s1 + $0xa98] ss:$1000 sps:$4 sm:$0xff]  }
 0x2e6   : > { %8249 = vmatprep.subr.bf16.mxu1 %v13120_v22  ;;  %8290 = vmatprep.subr.bf16.mxu0 %v13123_v24  ;;  %v13136_v24 = vld [vmem:[%s13844_s1 + $0x2d0] ss:$1000 sps:$4 sm:$0xff]  }
 0x2e7   : > { %v10472_v37 = vcombine.low %v10463_v30, %v10470_v31  ;;  %v6067_v38 = vpop.f32.mrb[64].mxu1  ;;  %v6108_v39 = vpop.f32.mrb[68].mxu0  ;;  %8279 = vmatprep.mubr.bf16.mxu1 %v13579_v18  ;;  %8320 = vmatprep.mubr.bf16.mxu0 %v13579_v18  ;;  %v14741_v30 = vld [vmem:[%s14239_s3 + $0x48] sm:$0xff] }
 0x2e8   : > { %v6068_v42 = vadd.f32 %v6067_v38, %v3727_v26  ;;  %v6109_v44 = vadd.f32 %v6108_v39, %v3735_v28  ;;  %v6069_v45 = vpop.f32.mrb[65].mxu1  ;;  %v6110_v46 = vpop.f32.mrb[69].mxu0  ;;  %v3767_v38 = vrot.slane %v14741_v30, %v14234_v52  ;;  %v3763_v39 = vrot.slane %v14741_v30, %v14244_v55 }
 0x2e9   : > { %v10486_v43 = vrot.slane %v10472_v37, %v14275_v17  ;;  %v6070_v47 = vadd.f32 %v6069_v45, %v3731_v29  ;;  %v6111_v48 = vadd.f32 %v6110_v46, %v3739_v34  ;;  %8250 = vmatpush1.bf16.msra.mxu1 %v13118_v33  ;;  %v6071_v49 = vpop.f32.mrb[66].mxu1  ;;  %v6112_v50 = vpop.f32.mrb[70].mxu0  ;;  %8291 = vmatpush1.bf16.msra.mxu0 %v13121_v35  ;;  %v13139_v29 = vld [vmem:[%s13844_s1 + $0x2d8] ss:$1000 sps:$4 sm:$0xff]   ;;  %v13144_v34 = vld [vmem:[%s13844_s1 + $0xaa4] ss:$1000 sps:$4 sm:$0xff]  }
 0x2ea   : > { %v6072_v57 = vpop.f32.mrb[67].mxu1  ;;  %v6113_v60 = vpop.f32.mrb[71].mxu0  ;;  %8329 = vmatprep.subr.bf16.mxu1 %v13126_v32  ;;  %8370 = vmatprep.subr.bf16.mxu0 %v13129_v36  ;;  %v13147_v35 = vld [vmem:[%s13844_s1 + $0xaac] ss:$1000 sps:$4 sm:$0xff]   ;;  %v3759_v37 = vrot.slane %v14741_v30, %v14232_v51  ;;  %v3771_v45 = vrot.slane %v14741_v30, %v14246_v58  ;;  %v13145_v46 = vld [vmem:[%s13844_s1 + $0xaa8] ss:$1000 sps:$4 sm:$0xff]  }
 0x2eb   : > { %v10487_v62 = vcombine.low %v10479_v41, %v10486_v43  ;;  %v10488_v59 = vcombine.low %v6068_v42, %v6070_v47  ;;  %v10489_v63 = vcombine.low %v6109_v44, %v6111_v48  ;;  %v13142_v44 = vld [vmem:[%s13844_s1 + $0xaa0] ss:$1000 sps:$4 sm:$0xff]   ;;  %v13150_v43 = vld [vmem:[%s13844_s1 + $0x2e4] ss:$1000 sps:$4 sm:$0xff]  }
 0x2ec   : > { %12433 = vmatmul.mubr.msk.bf16.vlgmr.msra.gmra.mrb[172].mxu1 %vm328_vm1, %v13865_v27  ;;  %12434 = vmatmul.mubr.msk.bf16.vlgmr.msra.gmra.mrb[176].mxu0 %vm328_vm1, %v13865_v27  ;;  %v13153_v47 = vld [vmem:[%s13844_s1 + $0x2ec] ss:$1000 sps:$4 sm:$0xff]  }
 0x2ed   : > { %11669 = vst [vmem:[%s14347_s6 + $0x38] sm:$0xff] %v10487_v62  ;;  %v10498_v4 = vrot.slane %v10488_v59, %v14275_v17  ;;  %v10505_v6 = vrot.slane %v10489_v63, %v14275_v17  ;;  %8330 = vmatpush1.bf16.msra.mxu1 %v13124_v53  ;;  %8371 = vmatpush1.bf16.msra.mxu0 %v13127_v54 }
 0x2ee   : > { %8331 = vmatprep.subr.bf16.mxu1 %v13132_v61  ;;  %8372 = vmatprep.subr.bf16.mxu0 %v13135_v56 }
 0x2ef   : > { %v10520_v11 = vcombine.low %v10498_v4, %v10505_v6  ;;  %v6149_v12 = vpop.f32.mrb[68].mxu1  ;;  %v6190_v13 = vpop.f32.mrb[72].mxu0  ;;  %8361 = vmatprep.mubr.bf16.mxu1 %v13579_v18  ;;  %8402 = vmatprep.mubr.bf16.mxu0 %v13579_v18 }
 0x2f0   : > { %v6150_v19 = vadd.f32 %v6149_v12, %v3743_v0  ;;  %v6191_v21 = vadd.f32 %v6190_v13, %v3751_v1  ;;  %v6151_v22 = vpop.f32.mrb[69].mxu1  ;;  %v6192_v16 = vpop.f32.mrb[73].mxu0  ;;  %v13148_v1 = vld [vmem:[%s13844_s1 + $0x2e0] ss:$1000 sps:$4 sm:$0xff]   ;;  %v3783_v12 = vrot.slane %v14741_v30, %v14271_v14  ;;  %v3779_v13 = vrot.slane %v14741_v30, %v14273_v15 }
 0x2f1   : > { %v6152_v20 = vadd.f32 %v6151_v22, %v3747_v2  ;;  %v6193_v25 = vadd.f32 %v6192_v16, %v3755_v3  ;;  %8332 = vmatpush1.bf16.msra.mxu1 %v13130_v7  ;;  %v6153_v26 = vpop.f32.mrb[70].mxu1  ;;  %v6194_v28 = vpop.f32.mrb[74].mxu0  ;;  %8373 = vmatpush1.bf16.msra.mxu0 %v13133_v9  ;;  %v10528_v53 = vrot.slane %v10520_v11, %v14275_v17  ;;  %v13151_v2 = vld [vmem:[%s13844_s1 + $0x2e8] ss:$1000 sps:$4 sm:$0xff]   ;;  %v13156_v7 = vld [vmem:[%s13844_s1 + $0xab4] ss:$1000 sps:$4 sm:$0xff]  }
 0x2f2   : > { %v6154_v31 = vpop.f32.mrb[71].mxu1  ;;  %v6195_v33 = vpop.f32.mrb[75].mxu0  ;;  %8411 = vmatprep.subr.bf16.mxu1 %v13138_v5  ;;  %8452 = vmatprep.subr.bf16.mxu0 %v13141_v10  ;;  %v13159_v3 = vld [vmem:[%s13844_s1 + $0xabc] ss:$1000 sps:$4 sm:$0xff]   ;;  %v3775_v11 = vrot.slane %v14741_v30, %v14268_v8  ;;  %v13154_v22 = vld [vmem:[%s13844_s1 + $0xab0] ss:$1000 sps:$4 sm:$0xff]   ;;  %v3787_v16 = vrot.slane %v14741_v30, %v14278_v23 }
 0x2f3   : > { %v10490_v32 = vcombine.low %v6150_v19, %v6152_v20  ;;  %v10491_v36 = vcombine.low %v6191_v21, %v6193_v25  ;;  %v13162_v20 = vld [vmem:[%s13844_s1 + $0x2f4] ss:$1000 sps:$4 sm:$0xff]  }
 0x2f4   : > { %12435 = vmatmul.mubr.msk.bf16.vlgmr.msra.gmra.mrb[176].mxu1 %vm328_vm1, %v13865_v27  ;;  %12436 = vmatmul.mubr.msk.bf16.vlgmr.msra.gmra.mrb[180].mxu0 %vm328_vm1, %v13865_v27  ;;  %v13165_v25 = vld [vmem:[%s13844_s1 + $0x2fc] ss:$1000 sps:$4 sm:$0xff]  }
 0x2f5   : > { %v10512_v41 = vrot.slane %v10490_v32, %v14275_v17  ;;  %v10519_v42 = vrot.slane %v10491_v36, %v14275_v17  ;;  %8412 = vmatpush1.bf16.msra.mxu1 %v13136_v24  ;;  %8453 = vmatpush1.bf16.msra.mxu0 %v13139_v29  ;;  %v13157_v24 = vld [vmem:[%s13844_s1 + $0xab8] ss:$1000 sps:$4 sm:$0xff]  }
 0x2f6   : > { %8413 = vmatprep.subr.bf16.mxu1 %v13144_v34  ;;  %8454 = vmatprep.subr.bf16.mxu0 %v13147_v35  ;;  %v13160_v35 = vld [vmem:[%s13844_s1 + $0x2f0] ss:$1000 sps:$4 sm:$0xff]  }
 0x2f7   : > { %v10521_v48 = vcombine.low %v10512_v41, %v10519_v42  ;;  %v6231_v49 = vpop.f32.mrb[72].mxu1  ;;  %v6272_v50 = vpop.f32.mrb[76].mxu0  ;;  %8443 = vmatprep.mubr.bf16.mxu1 %v13579_v18  ;;  %8484 = vmatprep.mubr.bf16.mxu0 %v13579_v18  ;;  %v14795_v41 = vld [vmem:[%s14239_s3 + $0x50] sm:$0xff] }
 0x2f8   : > { %v6232_v54 = vadd.f32 %v6231_v49, %v3759_v37  ;;  %v6273_v57 = vadd.f32 %v6272_v50, %v3767_v38  ;;  %v6233_v60 = vpop.f32.mrb[73].mxu1  ;;  %v6274_v61 = vpop.f32.mrb[77].mxu0  ;;  %v3799_v49 = vrot.slane %v14795_v41, %v14234_v52  ;;  %v3795_v50 = vrot.slane %v14795_v41, %v14244_v55 }
 0x2f9   : > { %v10535_v56 = vrot.slane %v10521_v48, %v14275_v17  ;;  %v6234_v62 = vadd.f32 %v6233_v60, %v3763_v39  ;;  %v6275_v59 = vadd.f32 %v6274_v61, %v3771_v45  ;;  %8414 = vmatpush1.bf16.msra.mxu1 %v13142_v44  ;;  %v6235_v63 = vpop.f32.mrb[74].mxu1  ;;  %v6276_v0 = vpop.f32.mrb[78].mxu0  ;;  %8455 = vmatpush1.bf16.msra.mxu0 %v13145_v46  ;;  %v13163_v39 = vld [vmem:[%s13844_s1 + $0x2f8] ss:$1000 sps:$4 sm:$0xff]   ;;  %v13168_v45 = vld [vmem:[%s13844_s1 + $0xac4] ss:$1000 sps:$4 sm:$0xff]  }
 0x2fa   : > { %v6236_v4 = vpop.f32.mrb[75].mxu1  ;;  %v6277_v6 = vpop.f32.mrb[79].mxu0  ;;  %8493 = vmatprep.subr.bf16.mxu1 %v13150_v43  ;;  %8534 = vmatprep.subr.bf16.mxu0 %v13153_v47  ;;  %v13171_v46 = vld [vmem:[%s13844_s1 + $0xacc] ss:$1000 sps:$4 sm:$0xff]   ;;  %v3791_v48 = vrot.slane %v14795_v41, %v14232_v51  ;;  %v3803_v60 = vrot.slane %v14795_v41, %v14246_v58  ;;  %v13169_v61 = vld [vmem:[%s13844_s1 + $0xac8] ss:$1000 sps:$4 sm:$0xff]  }
 0x2fb   : > { %v10536_v9 = vcombine.low %v10528_v53, %v10535_v56  ;;  %v10537_v5 = vcombine.low %v6232_v54, %v6234_v62  ;;  %v10538_v10 = vcombine.low %v6273_v57, %v6275_v59  ;;  %v13166_v57 = vld [vmem:[%s13844_s1 + $0xac0] ss:$1000 sps:$4 sm:$0xff]   ;;  %v13174_v56 = vld [vmem:[%s13844_s1 + $0x304] ss:$1000 sps:$4 sm:$0xff]  }
 0x2fc   : > { %12437 = vmatmul.mubr.msk.bf16.vlgmr.msra.gmra.mrb[180].mxu1 %vm328_vm1, %v13865_v27  ;;  %12438 = vmatmul.mubr.msk.bf16.vlgmr.msra.gmra.mrb[184].mxu0 %vm328_vm1, %v13865_v27  ;;  %v13177_v62 = vld [vmem:[%s13844_s1 + $0x30c] ss:$1000 sps:$4 sm:$0xff]  }
 0x2fd   : > { %11670 = vst [vmem:[%s14347_s6 + $0x40] sm:$0xff] %v10536_v9  ;;  %v10547_v19 = vrot.slane %v10537_v5, %v14275_v17  ;;  %v10554_v21 = vrot.slane %v10538_v10, %v14275_v17  ;;  %8494 = vmatpush1.bf16.msra.mxu1 %v13148_v1  ;;  %8535 = vmatpush1.bf16.msra.mxu0 %v13151_v2 }
 0x2fe   : > { %8495 = vmatprep.subr.bf16.mxu1 %v13156_v7  ;;  %8536 = vmatprep.subr.bf16.mxu0 %v13159_v3 }
 0x2ff   : > { %v10569_v26 = vcombine.low %v10547_v19, %v10554_v21  ;;  %v6313_v28 = vpop.f32.mrb[76].mxu1  ;;  %v6354_v29 = vpop.f32.mrb[80].mxu0  ;;  %8525 = vmatprep.mubr.bf16.mxu1 %v13579_v18  ;;  %8566 = vmatprep.mubr.bf16.mxu0 %v13579_v18 }
 0x300   : > { %v6314_v31 = vadd.f32 %v6313_v28, %v3775_v11  ;;  %v6355_v33 = vadd.f32 %v6354_v29, %v3783_v12  ;;  %v6315_v34 = vpop.f32.mrb[77].mxu1  ;;  %v6356_v30 = vpop.f32.mrb[81].mxu0  ;;  %v13172_v12 = vld [vmem:[%s13844_s1 + $0x300] ss:$1000 sps:$4 sm:$0xff]   ;;  %v3815_v28 = vrot.slane %v14795_v41, %v14271_v14  ;;  %v3811_v29 = vrot.slane %v14795_v41, %v14273_v15 }
 0x301   : > { %v6316_v32 = vadd.f32 %v6315_v34, %v3779_v13  ;;  %v6357_v36 = vadd.f32 %v6356_v30, %v3787_v16  ;;  %8496 = vmatpush1.bf16.msra.mxu1 %v13154_v22  ;;  %v6317_v37 = vpop.f32.mrb[78].mxu1  ;;  %v6358_v38 = vpop.f32.mrb[82].mxu0  ;;  %8537 = vmatpush1.bf16.msra.mxu0 %v13157_v24  ;;  %v10577_v1 = vrot.slane %v10569_v26, %v14275_v17  ;;  %v13175_v13 = vld [vmem:[%s13844_s1 + $0x308] ss:$1000 sps:$4 sm:$0xff]   ;;  %v13180_v22 = vld [vmem:[%s13844_s1 + $0xad4] ss:$1000 sps:$4 sm:$0xff]  }
 0x302   : > { %v6318_v42 = vpop.f32.mrb[79].mxu1  ;;  %v6359_v44 = vpop.f32.mrb[83].mxu0  ;;  %8575 = vmatprep.subr.bf16.mxu1 %v13162_v20  ;;  %8616 = vmatprep.subr.bf16.mxu0 %v13165_v25  ;;  %v13183_v16 = vld [vmem:[%s13844_s1 + $0xadc] ss:$1000 sps:$4 sm:$0xff]   ;;  %v3807_v26 = vrot.slane %v14795_v41, %v14268_v8  ;;  %v13178_v34 = vld [vmem:[%s13844_s1 + $0xad0] ss:$1000 sps:$4 sm:$0xff]   ;;  %v3819_v30 = vrot.slane %v14795_v41, %v14278_v23 }
 0x303   : > { %v10539_v43 = vcombine.low %v6314_v31, %v6316_v32  ;;  %v10540_v47 = vcombine.low %v6355_v33, %v6357_v36  ;;  %v13186_v32 = vld [vmem:[%s13844_s1 + $0x314] ss:$1000 sps:$4 sm:$0xff]  }
 0x304   : > { %12439 = vmatmul.mubr.msk.bf16.vlgmr.msra.gmra.mrb[184].mxu1 %vm328_vm1, %v13865_v27  ;;  %12440 = vmatmul.mubr.msk.bf16.vlgmr.msra.gmra.mrb[188].mxu0 %vm328_vm1, %v13865_v27  ;;  %v13189_v36 = vld [vmem:[%s13844_s1 + $0x31c] ss:$1000 sps:$4 sm:$0xff]  }
 0x305   : > { %v10561_v53 = vrot.slane %v10539_v43, %v14275_v17  ;;  %v10568_v54 = vrot.slane %v10540_v47, %v14275_v17  ;;  %8576 = vmatpush1.bf16.msra.mxu1 %v13160_v35  ;;  %8617 = vmatpush1.bf16.msra.mxu0 %v13163_v39  ;;  %v13181_v35 = vld [vmem:[%s13844_s1 + $0xad8] ss:$1000 sps:$4 sm:$0xff]  }
 0x306   : > { %8577 = vmatprep.subr.bf16.mxu1 %v13168_v45  ;;  %8618 = vmatprep.subr.bf16.mxu0 %v13171_v46  ;;  %v13184_v46 = vld [vmem:[%s13844_s1 + $0x310] ss:$1000 sps:$4 sm:$0xff]  }
 0x307   : > { %v10570_v59 = vcombine.low %v10561_v53, %v10568_v54  ;;  %v6395_v63 = vpop.f32.mrb[80].mxu1  ;;  %v6436_v0 = vpop.f32.mrb[84].mxu0  ;;  %8607 = vmatprep.mubr.bf16.mxu1 %v13579_v18  ;;  %8648 = vmatprep.mubr.bf16.mxu0 %v13579_v18  ;;  %v14849_v53 = vld [vmem:[%s14239_s3 + $0x58] sm:$0xff] }
 0x308   : > { %v6396_v2 = vadd.f32 %v6395_v63, %v3791_v48  ;;  %v6437_v4 = vadd.f32 %v6436_v0, %v3799_v49  ;;  %v6397_v6 = vpop.f32.mrb[81].mxu1  ;;  %v6438_v7 = vpop.f32.mrb[85].mxu0  ;;  %v3831_v63 = vrot.slane %v14849_v53, %v14234_v52  ;;  %v3827_v0 = vrot.slane %v14849_v53, %v14244_v55 }
 0x309   : > { %v10584_v3 = vrot.slane %v10570_v59, %v14275_v17  ;;  %v6398_v9 = vadd.f32 %v6397_v6, %v3795_v50  ;;  %v6439_v5 = vadd.f32 %v6438_v7, %v3803_v60  ;;  %8578 = vmatpush1.bf16.msra.mxu1 %v13166_v57  ;;  %v6399_v10 = vpop.f32.mrb[82].mxu1  ;;  %v6440_v11 = vpop.f32.mrb[86].mxu0  ;;  %8619 = vmatpush1.bf16.msra.mxu0 %v13169_v61  ;;  %v13187_v50 = vld [vmem:[%s13844_s1 + $0x318] ss:$1000 sps:$4 sm:$0xff]   ;;  %v13192_v60 = vld [vmem:[%s13844_s1 + $0xae4] ss:$1000 sps:$4 sm:$0xff]  }
 0x30a   : > { %v6400_v19 = vpop.f32.mrb[83].mxu1  ;;  %v6441_v21 = vpop.f32.mrb[87].mxu0  ;;  %8657 = vmatprep.subr.bf16.mxu1 %v13174_v56  ;;  %8698 = vmatprep.subr.bf16.mxu0 %v13177_v62  ;;  %v13195_v61 = vld [vmem:[%s13844_s1 + $0xaec] ss:$1000 sps:$4 sm:$0xff]   ;;  %v3823_v59 = vrot.slane %v14849_v53, %v14232_v51  ;;  %v3835_v6 = vrot.slane %v14849_v53, %v14246_v58  ;;  %v13193_v7 = vld [vmem:[%s13844_s1 + $0xae8] ss:$1000 sps:$4 sm:$0xff]  }
 0x30b   : > { %v10585_v24 = vcombine.low %v10577_v1, %v10584_v3  ;;  %v10586_v20 = vcombine.low %v6396_v2, %v6398_v9  ;;  %v10587_v25 = vcombine.low %v6437_v4, %v6439_v5  ;;  %v13190_v4 = vld [vmem:[%s13844_s1 + $0xae0] ss:$1000 sps:$4 sm:$0xff]   ;;  %v13198_v3 = vld [vmem:[%s13844_s1 + $0x324] ss:$1000 sps:$4 sm:$0xff]  }
 0x30c   : > { %12441 = vmatmul.mubr.msk.bf16.vlgmr.msra.gmra.mrb[188].mxu1 %vm328_vm1, %v13865_v27  ;;  %12442 = vmatmul.mubr.msk.bf16.vlgmr.msra.gmra.mrb[192].mxu0 %vm328_vm1, %v13865_v27  ;;  %v13201_v9 = vld [vmem:[%s13844_s1 + $0x32c] ss:$1000 sps:$4 sm:$0xff]  }
 0x30d   : > { %11671 = vst [vmem:[%s14347_s6 + $0x48] sm:$0xff] %v10585_v24  ;;  %v10596_v31 = vrot.slane %v10586_v20, %v14275_v17  ;;  %v10603_v33 = vrot.slane %v10587_v25, %v14275_v17  ;;  %8658 = vmatpush1.bf16.msra.mxu1 %v13172_v12  ;;  %8699 = vmatpush1.bf16.msra.mxu0 %v13175_v13 }
 0x30e   : > { %8659 = vmatprep.subr.bf16.mxu1 %v13180_v22  ;;  %8700 = vmatprep.subr.bf16.mxu0 %v13183_v16 }
 0x30f   : > { %v10618_v37 = vcombine.low %v10596_v31, %v10603_v33  ;;  %v6477_v38 = vpop.f32.mrb[84].mxu1  ;;  %v6518_v39 = vpop.f32.mrb[88].mxu0  ;;  %8689 = vmatprep.mubr.bf16.mxu1 %v13579_v18  ;;  %8730 = vmatprep.mubr.bf16.mxu0 %v13579_v18 }
 0x310   : > { %v6478_v42 = vadd.f32 %v6477_v38, %v3807_v26  ;;  %v6519_v44 = vadd.f32 %v6518_v39, %v3815_v28  ;;  %v6479_v45 = vpop.f32.mrb[85].mxu1  ;;  %v6520_v41 = vpop.f32.mrb[89].mxu0  ;;  %v13196_v28 = vld [vmem:[%s13844_s1 + $0x320] ss:$1000 sps:$4 sm:$0xff]   ;;  %v3847_v38 = vrot.slane %v14849_v53, %v14271_v14  ;;  %v3843_v39 = vrot.slane %v14849_v53, %v14273_v15 }
 0x311   : > { %v6480_v43 = vadd.f32 %v6479_v45, %v3811_v29  ;;  %v6521_v47 = vadd.f32 %v6520_v41, %v3819_v30  ;;  %8660 = vmatpush1.bf16.msra.mxu1 %v13178_v34  ;;  %v6481_v48 = vpop.f32.mrb[86].mxu1  ;;  %v6522_v49 = vpop.f32.mrb[90].mxu0  ;;  %8701 = vmatpush1.bf16.msra.mxu0 %v13181_v35  ;;  %v10626_v12 = vrot.slane %v10618_v37, %v14275_v17  ;;  %v13199_v29 = vld [vmem:[%s13844_s1 + $0x328] ss:$1000 sps:$4 sm:$0xff]   ;;  %v13204_v34 = vld [vmem:[%s13844_s1 + $0xaf4] ss:$1000 sps:$4 sm:$0xff]  }
 0x312   : > { %v6482_v54 = vpop.f32.mrb[87].mxu1  ;;  %v6523_v57 = vpop.f32.mrb[91].mxu0  ;;  %8739 = vmatprep.subr.bf16.mxu1 %v13186_v32  ;;  %8780 = vmatprep.subr.bf16.mxu0 %v13189_v36  ;;  %v13207_v30 = vld [vmem:[%s13844_s1 + $0xafc] ss:$1000 sps:$4 sm:$0xff]   ;;  %v3839_v37 = vrot.slane %v14849_v53, %v14268_v8  ;;  %v13202_v45 = vld [vmem:[%s13844_s1 + $0xaf0] ss:$1000 sps:$4 sm:$0xff]   ;;  %v3851_v41 = vrot.slane %v14849_v53, %v14278_v23 }
 0x313   : > { %v10588_v56 = vcombine.low %v6478_v42, %v6480_v43  ;;  %v10589_v62 = vcombine.low %v6519_v44, %v6521_v47  ;;  %v13210_v43 = vld [vmem:[%s13844_s1 + $0x334] ss:$1000 sps:$4 sm:$0xff]  }
 0x314   : > { %12443 = vmatmul.mubr.msk.bf16.vlgmr.msra.gmra.mrb[192].mxu1 %vm328_vm1, %v13865_v27  ;;  %12444 = vmatmul.mubr.msk.bf16.vlgmr.msra.gmra.mrb[196].mxu0 %vm328_vm1, %v13865_v27  ;;  %v13213_v47 = vld [vmem:[%s13844_s1 + $0x33c] ss:$1000 sps:$4 sm:$0xff]  }
 0x315   : > { %v10610_v1 = vrot.slane %v10588_v56, %v14275_v17  ;;  %v10617_v2 = vrot.slane %v10589_v62, %v14275_v17  ;;  %8740 = vmatpush1.bf16.msra.mxu1 %v13184_v46  ;;  %8781 = vmatpush1.bf16.msra.mxu0 %v13187_v50  ;;  %v13205_v46 = vld [vmem:[%s13844_s1 + $0xaf8] ss:$1000 sps:$4 sm:$0xff]  }
 0x316   : > { %8741 = vmatprep.subr.bf16.mxu1 %v13192_v60  ;;  %8782 = vmatprep.subr.bf16.mxu0 %v13195_v61  ;;  %v13208_v61 = vld [vmem:[%s13844_s1 + $0x330] ss:$1000 sps:$4 sm:$0xff]  }
 0x317   : > { %v10619_v5 = vcombine.low %v10610_v1, %v10617_v2  ;;  %v6559_v10 = vpop.f32.mrb[88].mxu1  ;;  %v6600_v11 = vpop.f32.mrb[92].mxu0  ;;  %8771 = vmatprep.mubr.bf16.mxu1 %v13579_v18  ;;  %8812 = vmatprep.mubr.bf16.mxu0 %v13579_v18  ;;  %v14903_v1 = vld [vmem:[%s14239_s3 + $0x60] sm:$0xff] }
 0x318   : > { %v6560_v13 = vadd.f32 %v6559_v10, %v3823_v59  ;;  %v6601_v19 = vadd.f32 %v6600_v11, %v3831_v63  ;;  %v6561_v21 = vpop.f32.mrb[89].mxu1  ;;  %v6602_v22 = vpop.f32.mrb[93].mxu0  ;;  %v3863_v10 = vrot.slane %v14903_v1, %v14234_v52  ;;  %v3859_v11 = vrot.slane %v14903_v1, %v14244_v55 }
 0x319   : > { %v10633_v16 = vrot.slane %v10619_v5, %v14275_v17  ;;  %v6562_v24 = vadd.f32 %v6561_v21, %v3827_v0  ;;  %v6603_v20 = vadd.f32 %v6602_v22, %v3835_v6  ;;  %8742 = vmatpush1.bf16.msra.mxu1 %v13190_v4  ;;  %v6563_v25 = vpop.f32.mrb[90].mxu1  ;;  %v6604_v26 = vpop.f32.mrb[94].mxu0  ;;  %8783 = vmatpush1.bf16.msra.mxu0 %v13193_v7  ;;  %v13211_v0 = vld [vmem:[%s13844_s1 + $0x338] ss:$1000 sps:$4 sm:$0xff]   ;;  %v13216_v6 = vld [vmem:[%s13844_s1 + $0xb04] ss:$1000 sps:$4 sm:$0xff]  }
 0x31a   : > { %v6564_v31 = vpop.f32.mrb[91].mxu1  ;;  %v6605_v33 = vpop.f32.mrb[95].mxu0  ;;  %8821 = vmatprep.subr.bf16.mxu1 %v13198_v3  ;;  %8862 = vmatprep.subr.bf16.mxu0 %v13201_v9  ;;  %v13219_v7 = vld [vmem:[%s13844_s1 + $0xb0c] ss:$1000 sps:$4 sm:$0xff]   ;;  %v3855_v5 = vrot.slane %v14903_v1, %v14232_v51  ;;  %v3867_v21 = vrot.slane %v14903_v1, %v14246_v58  ;;  %v13217_v22 = vld [vmem:[%s13844_s1 + $0xb08] ss:$1000 sps:$4 sm:$0xff]  }
 0x31b   : > { %v10634_v35 = vcombine.low %v10626_v12, %v10633_v16  ;;  %v10635_v32 = vcombine.low %v6560_v13, %v6562_v24  ;;  %v10636_v36 = vcombine.low %v6601_v19, %v6603_v20  ;;  %v13214_v19 = vld [vmem:[%s13844_s1 + $0xb00] ss:$1000 sps:$4 sm:$0xff]   ;;  %v13222_v16 = vld [vmem:[%s13844_s1 + $0x344] ss:$1000 sps:$4 sm:$0xff]  }
 0x31c   : > { %12445 = vmatmul.mubr.msk.bf16.vlgmr.msra.gmra.mrb[196].mxu1 %vm328_vm1, %v13865_v27  ;;  %12446 = vmatmul.mubr.msk.bf16.vlgmr.msra.gmra.mrb[200].mxu0 %vm328_vm1, %v13865_v27  ;;  %v13225_v24 = vld [vmem:[%s13844_s1 + $0x34c] ss:$1000 sps:$4 sm:$0xff]  }
 0x31d   : > { %11672 = vst [vmem:[%s14347_s6 + $0x50] sm:$0xff] %v10634_v35  ;;  %v10645_v42 = vrot.slane %v10635_v32, %v14275_v17  ;;  %v10652_v44 = vrot.slane %v10636_v36, %v14275_v17  ;;  %8822 = vmatpush1.bf16.msra.mxu1 %v13196_v28  ;;  %8863 = vmatpush1.bf16.msra.mxu0 %v13199_v29 }
 0x31e   : > { %8823 = vmatprep.subr.bf16.mxu1 %v13204_v34  ;;  %8864 = vmatprep.subr.bf16.mxu0 %v13207_v30 }
 0x31f   : > { %v10667_v48 = vcombine.low %v10645_v42, %v10652_v44  ;;  %v6641_v49 = vpop.f32.mrb[92].mxu1  ;;  %v6682_v50 = vpop.f32.mrb[96].mxu0  ;;  %8853 = vmatprep.mubr.bf16.mxu1 %v13579_v18  ;;  %8894 = vmatprep.mubr.bf16.mxu0 %v13579_v18 }
 0x320   : > { %v6642_v54 = vadd.f32 %v6641_v49, %v3839_v37  ;;  %v6683_v57 = vadd.f32 %v6682_v50, %v3847_v38  ;;  %v6643_v60 = vpop.f32.mrb[93].mxu1  ;;  %v6684_v53 = vpop.f32.mrb[97].mxu0  ;;  %v13220_v38 = vld [vmem:[%s13844_s1 + $0x340] ss:$1000 sps:$4 sm:$0xff]   ;;  %v3879_v49 = vrot.slane %v14903_v1, %v14271_v14  ;;  %v3875_v50 = vrot.slane %v14903_v1, %v14273_v15 }
 0x321   : > { %v6644_v56 = vadd.f32 %v6643_v60, %v3843_v39  ;;  %v6685_v62 = vadd.f32 %v6684_v53, %v3851_v41  ;;  %8824 = vmatpush1.bf16.msra.mxu1 %v13202_v45  ;;  %v6645_v59 = vpop.f32.mrb[94].mxu1  ;;  %v6686_v63 = vpop.f32.mrb[98].mxu0  ;;  %8865 = vmatpush1.bf16.msra.mxu0 %v13205_v46  ;;  %v10675_v28 = vrot.slane %v10667_v48, %v14275_v17  ;;  %v13223_v39 = vld [vmem:[%s13844_s1 + $0x348] ss:$1000 sps:$4 sm:$0xff]   ;;  %v13228_v45 = vld [vmem:[%s13844_s1 + $0xb14] ss:$1000 sps:$4 sm:$0xff]  }
 0x322   : > { %v6646_v2 = vpop.f32.mrb[95].mxu1  ;;  %v6687_v4 = vpop.f32.mrb[99].mxu0  ;;  %8903 = vmatprep.subr.bf16.mxu1 %v13210_v43  ;;  %8944 = vmatprep.subr.bf16.mxu0 %v13213_v47  ;;  %v13231_v41 = vld [vmem:[%s13844_s1 + $0xb1c] ss:$1000 sps:$4 sm:$0xff]   ;;  %v3871_v48 = vrot.slane %v14903_v1, %v14268_v8  ;;  %v13226_v60 = vld [vmem:[%s13844_s1 + $0xb10] ss:$1000 sps:$4 sm:$0xff]   ;;  %v3883_v53 = vrot.slane %v14903_v1, %v14278_v23 }
 0x323   : > { %v10637_v3 = vcombine.low %v6642_v54, %v6644_v56  ;;  %v10638_v9 = vcombine.low %v6683_v57, %v6685_v62  ;;  %v13234_v56 = vld [vmem:[%s13844_s1 + $0x354] ss:$1000 sps:$4 sm:$0xff]  }
 0x324   : > { %12447 = vmatmul.mubr.msk.bf16.vlgmr.msra.gmra.mrb[200].mxu1 %vm328_vm1, %v13865_v27  ;;  %12448 = vmatmul.mubr.msk.bf16.vlgmr.msra.gmra.mrb[204].mxu0 %vm328_vm1, %v13865_v27  ;;  %v13237_v62 = vld [vmem:[%s13844_s1 + $0x35c] ss:$1000 sps:$4 sm:$0xff]  }
 0x325   : > { %v10659_v12 = vrot.slane %v10637_v3, %v14275_v17  ;;  %v10666_v13 = vrot.slane %v10638_v9, %v14275_v17  ;;  %8904 = vmatpush1.bf16.msra.mxu1 %v13208_v61  ;;  %8945 = vmatpush1.bf16.msra.mxu0 %v13211_v0  ;;  %v13229_v61 = vld [vmem:[%s13844_s1 + $0xb18] ss:$1000 sps:$4 sm:$0xff]  }
 0x326   : > { %8905 = vmatprep.subr.bf16.mxu1 %v13216_v6  ;;  %8946 = vmatprep.subr.bf16.mxu0 %v13219_v7  ;;  %v13232_v7 = vld [vmem:[%s13844_s1 + $0x350] ss:$1000 sps:$4 sm:$0xff]  }
 0x327   : > { %v10668_v20 = vcombine.low %v10659_v12, %v10666_v13  ;;  %v6723_v25 = vpop.f32.mrb[96].mxu1  ;;  %v6764_v26 = vpop.f32.mrb[100].mxu0  ;;  %8935 = vmatprep.mubr.bf16.mxu1 %v13579_v18  ;;  %8976 = vmatprep.mubr.bf16.mxu0 %v13579_v18  ;;  %v14957_v12 = vld [vmem:[%s14239_s3 + $0x68] sm:$0xff] }
 0x328   : > { %v6724_v29 = vadd.f32 %v6723_v25, %v3855_v5  ;;  %v6765_v31 = vadd.f32 %v6764_v26, %v3863_v10  ;;  %v6725_v33 = vpop.f32.mrb[97].mxu1  ;;  %v6766_v34 = vpop.f32.mrb[101].mxu0  ;;  %v3895_v25 = vrot.slane %v14957_v12, %v14234_v52  ;;  %v3891_v26 = vrot.slane %v14957_v12, %v14244_v55 }
 0x329   : > { %v10682_v30 = vrot.slane %v10668_v20, %v14275_v17  ;;  %v6726_v35 = vadd.f32 %v6725_v33, %v3859_v11  ;;  %v6767_v32 = vadd.f32 %v6766_v34, %v3867_v21  ;;  %8906 = vmatpush1.bf16.msra.mxu1 %v13214_v19  ;;  %v6727_v36 = vpop.f32.mrb[98].mxu1  ;;  %v6768_v37 = vpop.f32.mrb[102].mxu0  ;;  %8947 = vmatpush1.bf16.msra.mxu0 %v13217_v22  ;;  %v13235_v11 = vld [vmem:[%s13844_s1 + $0x358] ss:$1000 sps:$4 sm:$0xff]   ;;  %v13240_v21 = vld [vmem:[%s13844_s1 + $0xb24] ss:$1000 sps:$4 sm:$0xff]  }
 0x32a   : > { %v6728_v42 = vpop.f32.mrb[99].mxu1  ;;  %v6769_v44 = vpop.f32.mrb[103].mxu0  ;;  %8985 = vmatprep.subr.bf16.mxu1 %v13222_v16  ;;  %9026 = vmatprep.subr.bf16.mxu0 %v13225_v24  ;;  %v13243_v22 = vld [vmem:[%s13844_s1 + $0xb2c] ss:$1000 sps:$4 sm:$0xff]   ;;  %v3887_v20 = vrot.slane %v14957_v12, %v14232_v51  ;;  %v3899_v33 = vrot.slane %v14957_v12, %v14246_v58  ;;  %v13241_v34 = vld [vmem:[%s13844_s1 + $0xb28] ss:$1000 sps:$4 sm:$0xff]  }
 0x32b   : > { %v10683_v46 = vcombine.low %v10675_v28, %v10682_v30  ;;  %v10684_v43 = vcombine.low %v6724_v29, %v6726_v35  ;;  %v10685_v47 = vcombine.low %v6765_v31, %v6767_v32  ;;  %v13238_v31 = vld [vmem:[%s13844_s1 + $0xb20] ss:$1000 sps:$4 sm:$0xff]   ;;  %v13246_v30 = vld [vmem:[%s13844_s1 + $0x364] ss:$1000 sps:$4 sm:$0xff]  }
 0x32c   : > { %12449 = vmatmul.mubr.msk.bf16.vlgmr.msra.gmra.mrb[204].mxu1 %vm328_vm1, %v13865_v27  ;;  %12450 = vmatmul.mubr.msk.bf16.vlgmr.msra.gmra.mrb[208].mxu0 %vm328_vm1, %v13865_v27  ;;  %v13249_v35 = vld [vmem:[%s13844_s1 + $0x36c] ss:$1000 sps:$4 sm:$0xff]  }
 0x32d   : > { %11673 = vst [vmem:[%s14347_s6 + $0x58] sm:$0xff] %v10683_v46  ;;  %v10694_v54 = vrot.slane %v10684_v43, %v14275_v17  ;;  %v10701_v57 = vrot.slane %v10685_v47, %v14275_v17  ;;  %8986 = vmatpush1.bf16.msra.mxu1 %v13220_v38  ;;  %9027 = vmatpush1.bf16.msra.mxu0 %v13223_v39 }
 0x32e   : > { %8987 = vmatprep.subr.bf16.mxu1 %v13228_v45  ;;  %9028 = vmatprep.subr.bf16.mxu0 %v13231_v41 }
 0x32f   : > { %v10716_v59 = vcombine.low %v10694_v54, %v10701_v57  ;;  %v6805_v63 = vpop.f32.mrb[100].mxu1  ;;  %v6846_v0 = vpop.f32.mrb[104].mxu0  ;;  %9017 = vmatprep.mubr.bf16.mxu1 %v13579_v18  ;;  %9058 = vmatprep.mubr.bf16.mxu0 %v13579_v18 }
 0x330   : > { %v6806_v2 = vadd.f32 %v6805_v63, %v3871_v48  ;;  %v6847_v4 = vadd.f32 %v6846_v0, %v3879_v49  ;;  %v6807_v6 = vpop.f32.mrb[101].mxu1  ;;  %v6848_v1 = vpop.f32.mrb[105].mxu0  ;;  %v13244_v49 = vld [vmem:[%s13844_s1 + $0x360] ss:$1000 sps:$4 sm:$0xff]   ;;  %v3911_v63 = vrot.slane %v14957_v12, %v14271_v14  ;;  %v3907_v0 = vrot.slane %v14957_v12, %v14273_v15 }
 0x331   : > { %v6808_v3 = vadd.f32 %v6807_v6, %v3875_v50  ;;  %v6849_v9 = vadd.f32 %v6848_v1, %v3883_v53  ;;  %8988 = vmatpush1.bf16.msra.mxu1 %v13226_v60  ;;  %v6809_v5 = vpop.f32.mrb[102].mxu1  ;;  %v6850_v10 = vpop.f32.mrb[106].mxu0  ;;  %9029 = vmatpush1.bf16.msra.mxu0 %v13229_v61  ;;  %v10724_v38 = vrot.slane %v10716_v59, %v14275_v17  ;;  %v13247_v50 = vld [vmem:[%s13844_s1 + $0x368] ss:$1000 sps:$4 sm:$0xff]   ;;  %v13252_v60 = vld [vmem:[%s13844_s1 + $0xb34] ss:$1000 sps:$4 sm:$0xff]  }
 0x332   : > { %v6810_v13 = vpop.f32.mrb[103].mxu1  ;;  %v6851_v19 = vpop.f32.mrb[107].mxu0  ;;  %9067 = vmatprep.subr.bf16.mxu1 %v13234_v56  ;;  %9108 = vmatprep.subr.bf16.mxu0 %v13237_v62  ;;  %v13255_v53 = vld [vmem:[%s13844_s1 + $0xb3c] ss:$1000 sps:$4 sm:$0xff]   ;;  %v3903_v59 = vrot.slane %v14957_v12, %v14268_v8  ;;  %v13250_v6 = vld [vmem:[%s13844_s1 + $0xb30] ss:$1000 sps:$4 sm:$0xff]   ;;  %v3915_v1 = vrot.slane %v14957_v12, %v14278_v23 }
 0x333   : > { %v10686_v16 = vcombine.low %v6806_v2, %v6808_v3  ;;  %v10687_v24 = vcombine.low %v6847_v4, %v6849_v9  ;;  %v13258_v3 = vld [vmem:[%s13844_s1 + $0x374] ss:$1000 sps:$4 sm:$0xff]  }
 0x334   : > { %12451 = vmatmul.mubr.msk.bf16.vlgmr.msra.gmra.mrb[208].mxu1 %vm328_vm1, %v13865_v27  ;;  %12452 = vmatmul.mubr.msk.bf16.vlgmr.msra.gmra.mrb[212].mxu0 %vm328_vm1, %v13865_v27  ;;  %v13261_v9 = vld [vmem:[%s13844_s1 + $0x37c] ss:$1000 sps:$4 sm:$0xff]  }
 0x335   : > { %v10708_v28 = vrot.slane %v10686_v16, %v14275_v17  ;;  %v10715_v29 = vrot.slane %v10687_v24, %v14275_v17  ;;  %9068 = vmatpush1.bf16.msra.mxu1 %v13232_v7  ;;  %9109 = vmatpush1.bf16.msra.mxu0 %v13235_v11  ;;  %v13253_v7 = vld [vmem:[%s13844_s1 + $0xb38] ss:$1000 sps:$4 sm:$0xff]  }
 0x336   : > { %9069 = vmatprep.subr.bf16.mxu1 %v13240_v21  ;;  %9110 = vmatprep.subr.bf16.mxu0 %v13243_v22  ;;  %v13256_v22 = vld [vmem:[%s13844_s1 + $0x370] ss:$1000 sps:$4 sm:$0xff]  }
 0x337   : > { %v10717_v32 = vcombine.low %v10708_v28, %v10715_v29  ;;  %v6887_v36 = vpop.f32.mrb[104].mxu1  ;;  %v6928_v37 = vpop.f32.mrb[108].mxu0  ;;  %9099 = vmatprep.mubr.bf16.mxu1 %v13579_v18  ;;  %9140 = vmatprep.mubr.bf16.mxu0 %v13579_v18  ;;  %v15011_v28 = vld [vmem:[%s14239_s3 + $0x70] sm:$0xff] }
 0x338   : > { %v6888_v39 = vadd.f32 %v6887_v36, %v3887_v20  ;;  %v6929_v42 = vadd.f32 %v6928_v37, %v3895_v25  ;;  %v6889_v44 = vpop.f32.mrb[105].mxu1  ;;  %v6930_v45 = vpop.f32.mrb[109].mxu0  ;;  %v3927_v36 = vrot.slane %v15011_v28, %v14234_v52  ;;  %v3923_v37 = vrot.slane %v15011_v28, %v14244_v55 }
 0x339   : > { %v10731_v41 = vrot.slane %v10717_v32, %v14275_v17  ;;  %v6890_v46 = vadd.f32 %v6889_v44, %v3891_v26  ;;  %v6931_v43 = vadd.f32 %v6930_v45, %v3899_v33  ;;  %9070 = vmatpush1.bf16.msra.mxu1 %v13238_v31  ;;  %v6891_v47 = vpop.f32.mrb[106].mxu1  ;;  %v6932_v48 = vpop.f32.mrb[110].mxu0  ;;  %9111 = vmatpush1.bf16.msra.mxu0 %v13241_v34  ;;  %v13259_v26 = vld [vmem:[%s13844_s1 + $0x378] ss:$1000 sps:$4 sm:$0xff]   ;;  %v13264_v33 = vld [vmem:[%s13844_s1 + $0xb44] ss:$1000 sps:$4 sm:$0xff]  }
 0x33a   : > { %v6892_v54 = vpop.f32.mrb[107].mxu1  ;;  %v6933_v57 = vpop.f32.mrb[111].mxu0  ;;  %9149 = vmatprep.subr.bf16.mxu1 %v13246_v30  ;;  %9190 = vmatprep.subr.bf16.mxu0 %v13249_v35  ;;  %v13267_v34 = vld [vmem:[%s13844_s1 + $0xb4c] ss:$1000 sps:$4 sm:$0xff]   ;;  %v3919_v32 = vrot.slane %v15011_v28, %v14232_v51  ;;  %v3931_v44 = vrot.slane %v15011_v28, %v14246_v58  ;;  %v13265_v45 = vld [vmem:[%s13844_s1 + $0xb48] ss:$1000 sps:$4 sm:$0xff]  }
 0x33b   : > { %v10732_v61 = vcombine.low %v10724_v38, %v10731_v41  ;;  %v10733_v56 = vcombine.low %v6888_v39, %v6890_v46  ;;  %v10734_v62 = vcombine.low %v6929_v42, %v6931_v43  ;;  %v13262_v42 = vld [vmem:[%s13844_s1 + $0xb40] ss:$1000 sps:$4 sm:$0xff]   ;;  %v13270_v41 = vld [vmem:[%s13844_s1 + $0x384] ss:$1000 sps:$4 sm:$0xff]  }
 0x33c   : > { %12453 = vmatmul.mubr.msk.bf16.vlgmr.msra.gmra.mrb[212].mxu1 %vm328_vm1, %v13865_v27  ;;  %12454 = vmatmul.mubr.msk.bf16.vlgmr.msra.gmra.mrb[216].mxu0 %vm328_vm1, %v13865_v27  ;;  %v13273_v46 = vld [vmem:[%s13844_s1 + $0x38c] ss:$1000 sps:$4 sm:$0xff]  }
 0x33d   : > { %11674 = vst [vmem:[%s14347_s6 + $0x60] sm:$0xff] %v10732_v61  ;;  %v10743_v2 = vrot.slane %v10733_v56, %v14275_v17  ;;  %v10750_v4 = vrot.slane %v10734_v62, %v14275_v17  ;;  %9150 = vmatpush1.bf16.msra.mxu1 %v13244_v49  ;;  %9191 = vmatpush1.bf16.msra.mxu0 %v13247_v50 }
 0x33e   : > { %9151 = vmatprep.subr.bf16.mxu1 %v13252_v60  ;;  %9192 = vmatprep.subr.bf16.mxu0 %v13255_v53 }
 0x33f   : > { %v10765_v5 = vcombine.low %v10743_v2, %v10750_v4  ;;  %v6969_v10 = vpop.f32.mrb[108].mxu1  ;;  %v7010_v11 = vpop.f32.mrb[112].mxu0  ;;  %9181 = vmatprep.mubr.bf16.mxu1 %v13579_v18  ;;  %9222 = vmatprep.mubr.bf16.mxu0 %v13579_v18 }
 0x340   : > { %v6970_v13 = vadd.f32 %v6969_v10, %v3903_v59  ;;  %v7011_v19 = vadd.f32 %v7010_v11, %v3911_v63  ;;  %v6971_v21 = vpop.f32.mrb[109].mxu1  ;;  %v7012_v12 = vpop.f32.mrb[113].mxu0  ;;  %v13268_v63 = vld [vmem:[%s13844_s1 + $0x380] ss:$1000 sps:$4 sm:$0xff]   ;;  %v3943_v10 = vrot.slane %v15011_v28, %v14271_v14  ;;  %v3939_v11 = vrot.slane %v15011_v28, %v14273_v15 }
 0x341   : > { %v6972_v16 = vadd.f32 %v6971_v21, %v3907_v0  ;;  %v7013_v24 = vadd.f32 %v7012_v12, %v3915_v1  ;;  %9152 = vmatpush1.bf16.msra.mxu1 %v13250_v6  ;;  %v6973_v20 = vpop.f32.mrb[110].mxu1  ;;  %v7014_v25 = vpop.f32.mrb[114].mxu0  ;;  %9193 = vmatpush1.bf16.msra.mxu0 %v13253_v7  ;;  %v10773_v49 = vrot.slane %v10765_v5, %v14275_v17  ;;  %v13271_v0 = vld [vmem:[%s13844_s1 + $0x388] ss:$1000 sps:$4 sm:$0xff]   ;;  %v13276_v6 = vld [vmem:[%s13844_s1 + $0xb54] ss:$1000 sps:$4 sm:$0xff]  }
 0x342   : > { %v6974_v29 = vpop.f32.mrb[111].mxu1  ;;  %v7015_v31 = vpop.f32.mrb[115].mxu0  ;;  %9231 = vmatprep.subr.bf16.mxu1 %v13258_v3  ;;  %9272 = vmatprep.subr.bf16.mxu0 %v13261_v9  ;;  %v13279_v1 = vld [vmem:[%s13844_s1 + $0xb5c] ss:$1000 sps:$4 sm:$0xff]   ;;  %v3935_v5 = vrot.slane %v15011_v28, %v14268_v8  ;;  %v13274_v21 = vld [vmem:[%s13844_s1 + $0xb50] ss:$1000 sps:$4 sm:$0xff]   ;;  %v3947_v12 = vrot.slane %v15011_v28, %v14278_v23 }
 0x343   : > { %v10735_v30 = vcombine.low %v6970_v13, %v6972_v16  ;;  %v10736_v35 = vcombine.low %v7011_v19, %v7013_v24  ;;  %v13282_v16 = vld [vmem:[%s13844_s1 + $0x394] ss:$1000 sps:$4 sm:$0xff]  }
 0x344   : > { %12455 = vmatmul.mubr.msk.bf16.vlgmr.msra.gmra.mrb[216].mxu1 %vm328_vm1, %v13865_v27  ;;  %12456 = vmatmul.mubr.msk.bf16.vlgmr.msra.gmra.mrb[220].mxu0 %vm328_vm1, %v13865_v27  ;;  %v13285_v24 = vld [vmem:[%s13844_s1 + $0x39c] ss:$1000 sps:$4 sm:$0xff]  }
 0x345   : > { %v10757_v38 = vrot.slane %v10735_v30, %v14275_v17  ;;  %v10764_v39 = vrot.slane %v10736_v35, %v14275_v17  ;;  %9232 = vmatpush1.bf16.msra.mxu1 %v13256_v22  ;;  %9273 = vmatpush1.bf16.msra.mxu0 %v13259_v26  ;;  %v13277_v22 = vld [vmem:[%s13844_s1 + $0xb58] ss:$1000 sps:$4 sm:$0xff]  }
 0x346   : > { %9233 = vmatprep.subr.bf16.mxu1 %v13264_v33  ;;  %9274 = vmatprep.subr.bf16.mxu0 %v13267_v34  ;;  %v13280_v34 = vld [vmem:[%s13844_s1 + $0x390] ss:$1000 sps:$4 sm:$0xff]  }
 0x347   : > { %v10766_v43 = vcombine.low %v10757_v38, %v10764_v39  ;;  %v7051_v47 = vpop.f32.mrb[112].mxu1  ;;  %v7092_v48 = vpop.f32.mrb[116].mxu0  ;;  %9263 = vmatprep.mubr.bf16.mxu1 %v13579_v18  ;;  %9304 = vmatprep.mubr.bf16.mxu0 %v13579_v18  ;;  %v15065_v38 = vld [vmem:[%s14239_s3 + $0x78] sm:$0xff] }
 0x348   : > { %v7052_v50 = vadd.f32 %v7051_v47, %v3919_v32  ;;  %v7093_v54 = vadd.f32 %v7092_v48, %v3927_v36  ;;  %v7053_v57 = vpop.f32.mrb[113].mxu1  ;;  %v7094_v60 = vpop.f32.mrb[117].mxu0  ;;  %v3959_v47 = vrot.slane %v15065_v38, %v14234_v52  ;;  %v3955_v48 = vrot.slane %v15065_v38, %v14244_v55 }
 0x349   : > { %v10780_v53 = vrot.slane %v10766_v43, %v14275_v17  ;;  %v7054_v61 = vadd.f32 %v7053_v57, %v3923_v37  ;;  %v7095_v56 = vadd.f32 %v7094_v60, %v3931_v44  ;;  %9234 = vmatpush1.bf16.msra.mxu1 %v13262_v42  ;;  %v7055_v62 = vpop.f32.mrb[114].mxu1  ;;  %v7096_v59 = vpop.f32.mrb[118].mxu0  ;;  %9275 = vmatpush1.bf16.msra.mxu0 %v13265_v45  ;;  %v13283_v37 = vld [vmem:[%s13844_s1 + $0x398] ss:$1000 sps:$4 sm:$0xff]   ;;  %v13288_v44 = vld [vmem:[%s13844_s1 + $0xb64] ss:$1000 sps:$4 sm:$0xff]  }
 0x34a   : > { %v7056_v2 = vpop.f32.mrb[115].mxu1  ;;  %v7097_v4 = vpop.f32.mrb[119].mxu0  ;;  %9313 = vmatprep.subr.bf16.mxu1 %v13270_v41  ;;  %9354 = vmatprep.subr.bf16.mxu0 %v13273_v46  ;;  %v13291_v45 = vld [vmem:[%s13844_s1 + $0xb6c] ss:$1000 sps:$4 sm:$0xff]   ;;  %v3951_v43 = vrot.slane %v15065_v38, %v14232_v51  ;;  %v3963_v57 = vrot.slane %v15065_v38, %v14246_v58  ;;  %v13289_v60 = vld [vmem:[%s13844_s1 + $0xb68] ss:$1000 sps:$4 sm:$0xff]  }
 0x34b   : > { %v10781_v7 = vcombine.low %v10773_v49, %v10780_v53  ;;  %v10782_v3 = vcombine.low %v7052_v50, %v7054_v61  ;;  %v10783_v9 = vcombine.low %v7093_v54, %v7095_v56  ;;  %v13286_v54 = vld [vmem:[%s13844_s1 + $0xb60] ss:$1000 sps:$4 sm:$0xff]   ;;  %v13294_v53 = vld [vmem:[%s13844_s1 + $0x3a4] ss:$1000 sps:$4 sm:$0xff]  }
 0x34c   : > { %12457 = vmatmul.mubr.msk.bf16.vlgmr.msra.gmra.mrb[220].mxu1 %vm328_vm1, %v13865_v27  ;;  %12458 = vmatmul.mubr.msk.bf16.vlgmr.msra.gmra.mrb[224].mxu0 %vm328_vm1, %v13865_v27  ;;  %v13297_v61 = vld [vmem:[%s13844_s1 + $0x3ac] ss:$1000 sps:$4 sm:$0xff]  }
 0x34d   : > { %11675 = vst [vmem:[%s14347_s6 + $0x68] sm:$0xff] %v10781_v7  ;;  %v10792_v13 = vrot.slane %v10782_v3, %v14275_v17  ;;  %v10799_v19 = vrot.slane %v10783_v9, %v14275_v17  ;;  %9314 = vmatpush1.bf16.msra.mxu1 %v13268_v63  ;;  %9355 = vmatpush1.bf16.msra.mxu0 %v13271_v0 }
 0x34e   : > { %9315 = vmatprep.subr.bf16.mxu1 %v13276_v6  ;;  %9356 = vmatprep.subr.bf16.mxu0 %v13279_v1 }
 0x34f   : > { %v10814_v20 = vcombine.low %v10792_v13, %v10799_v19  ;;  %v7133_v25 = vpop.f32.mrb[116].mxu1  ;;  %v7174_v26 = vpop.f32.mrb[120].mxu0  ;;  %9345 = vmatprep.mubr.bf16.mxu1 %v13579_v18  ;;  %9386 = vmatprep.mubr.bf16.mxu0 %v13579_v18 }
 0x350   : > { %v7134_v29 = vadd.f32 %v7133_v25, %v3935_v5  ;;  %v7175_v31 = vadd.f32 %v7174_v26, %v3943_v10  ;;  %v7135_v33 = vpop.f32.mrb[117].mxu1  ;;  %v7176_v28 = vpop.f32.mrb[121].mxu0  ;;  %v13292_v10 = vld [vmem:[%s13844_s1 + $0x3a0] ss:$1000 sps:$4 sm:$0xff]   ;;  %v3975_v25 = vrot.slane %v15065_v38, %v14271_v14  ;;  %v3971_v26 = vrot.slane %v15065_v38, %v14273_v15 }
 0x351   : > { %v7136_v30 = vadd.f32 %v7135_v33, %v3939_v11  ;;  %v7177_v35 = vadd.f32 %v7176_v28, %v3947_v12  ;;  %9316 = vmatpush1.bf16.msra.mxu1 %v13274_v21  ;;  %v7137_v32 = vpop.f32.mrb[118].mxu1  ;;  %v7178_v36 = vpop.f32.mrb[122].mxu0  ;;  %9357 = vmatpush1.bf16.msra.mxu0 %v13277_v22  ;;  %v10822_v63 = vrot.slane %v10814_v20, %v14275_v17  ;;  %v13295_v11 = vld [vmem:[%s13844_s1 + $0x3a8] ss:$1000 sps:$4 sm:$0xff]   ;;  %v13300_v21 = vld [vmem:[%s13844_s1 + $0xb74] ss:$1000 sps:$4 sm:$0xff]  }
 0x352   : > { %v7138_v39 = vpop.f32.mrb[119].mxu1  ;;  %v7179_v42 = vpop.f32.mrb[123].mxu0  ;;  %9395 = vmatprep.subr.bf16.mxu1 %v13282_v16  ;;  %9436 = vmatprep.subr.bf16.mxu0 %v13285_v24  ;;  %v13303_v12 = vld [vmem:[%s13844_s1 + $0xb7c] ss:$1000 sps:$4 sm:$0xff]   ;;  %v3967_v20 = vrot.slane %v15065_v38, %v14268_v8  ;;  %v13298_v33 = vld [vmem:[%s13844_s1 + $0xb70] ss:$1000 sps:$4 sm:$0xff]   ;;  %v3979_v28 = vrot.slane %v15065_v38, %v14278_v23 }
 0x353   : > { %v10784_v41 = vcombine.low %v7134_v29, %v7136_v30  ;;  %v10785_v46 = vcombine.low %v7175_v31, %v7177_v35  ;;  %v13306_v30 = vld [vmem:[%s13844_s1 + $0x3b4] ss:$1000 sps:$4 sm:$0xff]  }
 0x354   : > { %12459 = vmatmul.mubr.msk.bf16.vlgmr.msra.gmra.mrb[224].mxu1 %vm328_vm1, %v13865_v27  ;;  %12460 = vmatmul.mubr.msk.bf16.vlgmr.msra.gmra.mrb[228].mxu0 %vm328_vm1, %v13865_v27  ;;  %v13309_v35 = vld [vmem:[%s13844_s1 + $0x3bc] ss:$1000 sps:$4 sm:$0xff]  }
 0x355   : > { %v10806_v49 = vrot.slane %v10784_v41, %v14275_v17  ;;  %v10813_v50 = vrot.slane %v10785_v46, %v14275_v17  ;;  %9396 = vmatpush1.bf16.msra.mxu1 %v13280_v34  ;;  %9437 = vmatpush1.bf16.msra.mxu0 %v13283_v37  ;;  %v13301_v34 = vld [vmem:[%s13844_s1 + $0xb78] ss:$1000 sps:$4 sm:$0xff]  }
 0x356   : > { %9397 = vmatprep.subr.bf16.mxu1 %v13288_v44  ;;  %9438 = vmatprep.subr.bf16.mxu0 %v13291_v45  ;;  %v13304_v45 = vld [vmem:[%s13844_s1 + $0x3b0] ss:$1000 sps:$4 sm:$0xff]  }
 0x357   : > { %v10815_v56 = vcombine.low %v10806_v49, %v10813_v50  ;;  %v7215_v62 = vpop.f32.mrb[120].mxu1  ;;  %v7256_v59 = vpop.f32.mrb[124].mxu0  ;;  %9427 = vmatprep.mubr.bf16.mxu1 %v13579_v18  ;;  %9468 = vmatprep.mubr.bf16.mxu0 %v13579_v18  ;;  %v15119_v49 = vld [vmem:[%s14239_s3 + $0x80] sm:$0xff] }
 0x358   : > { %v7216_v0 = vadd.f32 %v7215_v62, %v3951_v43  ;;  %v7257_v2 = vadd.f32 %v7256_v59, %v3959_v47  ;;  %v7217_v4 = vpop.f32.mrb[121].mxu1  ;;  %v7258_v6 = vpop.f32.mrb[125].mxu0  ;;  %v3991_v62 = vrot.slane %v15119_v49, %v14234_v52  ;;  %v3987_v59 = vrot.slane %v15119_v49, %v14244_v55 }
 0x359   : > { %v10829_v1 = vrot.slane %v10815_v56, %v14275_v17  ;;  %v7218_v7 = vadd.f32 %v7217_v4, %v3955_v48  ;;  %v7259_v3 = vadd.f32 %v7258_v6, %v3963_v57  ;;  %9398 = vmatpush1.bf16.msra.mxu1 %v13286_v54  ;;  %v7219_v9 = vpop.f32.mrb[122].mxu1  ;;  %v7260_v5 = vpop.f32.mrb[126].mxu0  ;;  %9439 = vmatpush1.bf16.msra.mxu0 %v13289_v60  ;;  %v13307_v48 = vld [vmem:[%s13844_s1 + $0x3b8] ss:$1000 sps:$4 sm:$0xff]   ;;  %v13312_v57 = vld [vmem:[%s13844_s1 + $0xb84] ss:$1000 sps:$4 sm:$0xff]  }
 0x35a   : > { %v7220_v13 = vpop.f32.mrb[123].mxu1  ;;  %v7261_v19 = vpop.f32.mrb[127].mxu0  ;;  %9477 = vmatprep.subr.bf16.mxu1 %v13294_v53  ;;  %9518 = vmatprep.subr.bf16.mxu0 %v13297_v61  ;;  %v13315_v60 = vld [vmem:[%s13844_s1 + $0xb8c] ss:$1000 sps:$4 sm:$0xff]   ;;  %v3983_v56 = vrot.slane %v15119_v49, %v14232_v51  ;;  %v3995_v4 = vrot.slane %v15119_v49, %v14246_v58  ;;  %v13313_v6 = vld [vmem:[%s13844_s1 + $0xb88] ss:$1000 sps:$4 sm:$0xff]  }
 0x35b   : > { %v10830_v22 = vcombine.low %v10822_v63, %v10829_v1  ;;  %v10831_v16 = vcombine.low %v7216_v0, %v7218_v7  ;;  %v10832_v24 = vcombine.low %v7257_v2, %v7259_v3  ;;  %v13310_v2 = vld [vmem:[%s13844_s1 + $0xb80] ss:$1000 sps:$4 sm:$0xff]   ;;  %v13318_v1 = vld [vmem:[%s13844_s1 + $0x3c4] ss:$1000 sps:$4 sm:$0xff]  }
 0x35c   : > { %12461 = vmatmul.mubr.msk.bf16.vlgmr.msra.gmra.mrb[228].mxu1 %vm328_vm1, %v13865_v27  ;;  %12462 = vmatmul.mubr.msk.bf16.vlgmr.msra.gmra.mrb[232].mxu0 %vm328_vm1, %v13865_v27  ;;  %v13321_v7 = vld [vmem:[%s13844_s1 + $0x3cc] ss:$1000 sps:$4 sm:$0xff]  }
 0x35d   : > { %11676 = vst [vmem:[%s14347_s6 + $0x70] sm:$0xff] %v10830_v22  ;;  %v10841_v29 = vrot.slane %v10831_v16, %v14275_v17  ;;  %v10848_v31 = vrot.slane %v10832_v24, %v14275_v17  ;;  %9478 = vmatpush1.bf16.msra.mxu1 %v13292_v10  ;;  %9519 = vmatpush1.bf16.msra.mxu0 %v13295_v11 }
 0x35e   : > { %9479 = vmatprep.subr.bf16.mxu1 %v13300_v21  ;;  %9520 = vmatprep.subr.bf16.mxu0 %v13303_v12 }
 0x35f   : > { %v10863_v32 = vcombine.low %v10841_v29, %v10848_v31  ;;  %v7297_v36 = vpop.f32.mrb[124].mxu1  ;;  %v7338_v37 = vpop.f32.mrb[128].mxu0  ;;  %9509 = vmatprep.mubr.bf16.mxu1 %v13579_v18  ;;  %9550 = vmatprep.mubr.bf16.mxu0 %v13579_v18 }
 0x360   : > { %v7298_v39 = vadd.f32 %v7297_v36, %v3967_v20  ;;  %v7339_v42 = vadd.f32 %v7338_v37, %v3975_v25  ;;  %v7299_v44 = vpop.f32.mrb[125].mxu1  ;;  %v7340_v38 = vpop.f32.mrb[129].mxu0  ;;  %v13316_v25 = vld [vmem:[%s13844_s1 + $0x3c0] ss:$1000 sps:$4 sm:$0xff]   ;;  %v4007_v36 = vrot.slane %v15119_v49, %v14271_v14  ;;  %v4003_v37 = vrot.slane %v15119_v49, %v14273_v15 }
 0x361   : > { %v7300_v41 = vadd.f32 %v7299_v44, %v3971_v26  ;;  %v7341_v46 = vadd.f32 %v7340_v38, %v3979_v28  ;;  %9480 = vmatpush1.bf16.msra.mxu1 %v13298_v33  ;;  %v7301_v43 = vpop.f32.mrb[126].mxu1  ;;  %v7342_v47 = vpop.f32.mrb[130].mxu0  ;;  %9521 = vmatpush1.bf16.msra.mxu0 %v13301_v34  ;;  %v10871_v10 = vrot.slane %v10863_v32, %v14275_v17  ;;  %v13319_v26 = vld [vmem:[%s13844_s1 + $0x3c8] ss:$1000 sps:$4 sm:$0xff]   ;;  %v13324_v33 = vld [vmem:[%s13844_s1 + $0xb94] ss:$1000 sps:$4 sm:$0xff]  }
 0x362   : > { %v7302_v50 = vpop.f32.mrb[127].mxu1  ;;  %v7343_v54 = vpop.f32.mrb[131].mxu0  ;;  %9559 = vmatprep.subr.bf16.mxu1 %v13306_v30  ;;  %9600 = vmatprep.subr.bf16.mxu0 %v13309_v35  ;;  %v13327_v28 = vld [vmem:[%s13844_s1 + $0xb9c] ss:$1000 sps:$4 sm:$0xff]   ;;  %v3999_v32 = vrot.slane %v15119_v49, %v14268_v8  ;;  %v13322_v44 = vld [vmem:[%s13844_s1 + $0xb90] ss:$1000 sps:$4 sm:$0xff]   ;;  %v4011_v38 = vrot.slane %v15119_v49, %v14278_v23 }
 0x363   : > { %v10833_v53 = vcombine.low %v7298_v39, %v7300_v41  ;;  %v10834_v61 = vcombine.low %v7339_v42, %v7341_v46  ;;  %v13330_v41 = vld [vmem:[%s13844_s1 + $0x3d4] ss:$1000 sps:$4 sm:$0xff]  }
 0x364   : > { %12463 = vmatmul.mubr.msk.bf16.vlgmr.msra.gmra.mrb[232].mxu1 %vm328_vm1, %v13865_v27  ;;  %12464 = vmatmul.mubr.msk.bf16.vlgmr.msra.gmra.mrb[236].mxu0 %vm328_vm1, %v13865_v27  ;;  %v13333_v46 = vld [vmem:[%s13844_s1 + $0x3dc] ss:$1000 sps:$4 sm:$0xff]  }
 0x365   : > { %v10855_v63 = vrot.slane %v10833_v53, %v14275_v17  ;;  %v10862_v0 = vrot.slane %v10834_v61, %v14275_v17  ;;  %9560 = vmatpush1.bf16.msra.mxu1 %v13304_v45  ;;  %9601 = vmatpush1.bf16.msra.mxu0 %v13307_v48  ;;  %v13325_v45 = vld [vmem:[%s13844_s1 + $0xb98] ss:$1000 sps:$4 sm:$0xff]  }
 0x366   : > { %9561 = vmatprep.subr.bf16.mxu1 %v13312_v57  ;;  %9602 = vmatprep.subr.bf16.mxu0 %v13315_v60  ;;  %v13328_v60 = vld [vmem:[%s13844_s1 + $0x3d0] ss:$1000 sps:$4 sm:$0xff]  }
 0x367   : > { %v10864_v3 = vcombine.low %v10855_v63, %v10862_v0  ;;  %v7379_v9 = vpop.f32.mrb[128].mxu1  ;;  %v7420_v5 = vpop.f32.mrb[132].mxu0  ;;  %9591 = vmatprep.mubr.bf16.mxu1 %v13579_v18  ;;  %9632 = vmatprep.mubr.bf16.mxu0 %v13579_v18  ;;  %v15173_v63 = vld [vmem:[%s14239_s3 + $0x88] sm:$0xff] }
 0x368   : > { %v7380_v11 = vadd.f32 %v7379_v9, %v3983_v56  ;;  %v7421_v13 = vadd.f32 %v7420_v5, %v3991_v62  ;;  %v7381_v19 = vpop.f32.mrb[129].mxu1  ;;  %v7422_v21 = vpop.f32.mrb[133].mxu0  ;;  %v4023_v9 = vrot.slane %v15173_v63, %v14234_v52  ;;  %v4019_v5 = vrot.slane %v15173_v63, %v14244_v55 }
 0x369   : > { %v10878_v12 = vrot.slane %v10864_v3, %v14275_v17  ;;  %v7382_v22 = vadd.f32 %v7381_v19, %v3987_v59  ;;  %v7423_v16 = vadd.f32 %v7422_v21, %v3995_v4  ;;  %9562 = vmatpush1.bf16.msra.mxu1 %v13310_v2  ;;  %v7383_v24 = vpop.f32.mrb[130].mxu1  ;;  %v7424_v20 = vpop.f32.mrb[134].mxu0  ;;  %9603 = vmatpush1.bf16.msra.mxu0 %v13313_v6  ;;  %v13331_v59 = vld [vmem:[%s13844_s1 + $0x3d8] ss:$1000 sps:$4 sm:$0xff]   ;;  %v13336_v4 = vld [vmem:[%s13844_s1 + $0xba4] ss:$1000 sps:$4 sm:$0xff]  }
 0x36a   : > { %v7384_v29 = vpop.f32.mrb[131].mxu1  ;;  %v7425_v31 = vpop.f32.mrb[135].mxu0  ;;  %9641 = vmatprep.subr.bf16.mxu1 %v13318_v1  ;;  %9682 = vmatprep.subr.bf16.mxu0 %v13321_v7  ;;  %v13339_v6 = vld [vmem:[%s13844_s1 + $0xbac] ss:$1000 sps:$4 sm:$0xff]   ;;  %v4015_v3 = vrot.slane %v15173_v63, %v14232_v51  ;;  %v4027_v19 = vrot.slane %v15173_v63, %v14246_v58  ;;  %v13337_v21 = vld [vmem:[%s13844_s1 + $0xba8] ss:$1000 sps:$4 sm:$0xff]  }
 0x36b   : > { %v10879_v34 = vcombine.low %v10871_v10, %v10878_v12  ;;  %v10880_v30 = vcombine.low %v7380_v11, %v7382_v22  ;;  %v10881_v35 = vcombine.low %v7421_v13, %v7423_v16  ;;  %v13334_v13 = vld [vmem:[%s13844_s1 + $0xba0] ss:$1000 sps:$4 sm:$0xff]   ;;  %v13342_v12 = vld [vmem:[%s13844_s1 + $0x3e4] ss:$1000 sps:$4 sm:$0xff]  }
 0x36c   : > { %12465 = vmatmul.mubr.msk.bf16.vlgmr.msra.gmra.mrb[236].mxu1 %vm328_vm1, %v13865_v27  ;;  %12466 = vmatmul.mubr.msk.bf16.vlgmr.msra.gmra.mrb[240].mxu0 %vm328_vm1, %v13865_v27 }
 0x36d   : > { %11677 = vst [vmem:[%s14347_s6 + $0x78] sm:$0xff] %v10879_v34  ;;  %v10890_v39 = vrot.slane %v10880_v30, %v14275_v17  ;;  %v10897_v42 = vrot.slane %v10881_v35, %v14275_v17  ;;  %9642 = vmatpush1.bf16.msra.mxu1 %v13316_v25  ;;  %9683 = vmatpush1.bf16.msra.mxu0 %v13319_v26 }
 0x36e   : > { %9643 = vmatprep.subr.bf16.mxu1 %v13324_v33  ;;  %9684 = vmatprep.subr.bf16.mxu0 %v13327_v28 }
 0x36f   : > { %v10912_v43 = vcombine.low %v10890_v39, %v10897_v42  ;;  %v7461_v47 = vpop.f32.mrb[132].mxu1  ;;  %v7502_v48 = vpop.f32.mrb[136].mxu0  ;;  %9673 = vmatprep.mubr.bf16.mxu1 %v13579_v18  ;;  %9714 = vmatprep.mubr.bf16.mxu0 %v13579_v18  ;;  %v13345_v39 = vld [vmem:[%s13844_s1 + $0xbb4] ss:$1000 sps:$4 sm:$0xff]  }
 0x370   : > { %v7462_v50 = vadd.f32 %v7461_v47, %v3999_v32  ;;  %v7503_v54 = vadd.f32 %v7502_v48, %v4007_v36  ;;  %v7463_v57 = vpop.f32.mrb[133].mxu1  ;;  %v7504_v49 = vpop.f32.mrb[137].mxu0  ;;  %v13340_v32 = vld [vmem:[%s13844_s1 + $0x3e0] ss:$1000 sps:$4 sm:$0xff]   ;;  %v13343_v48 = vld [vmem:[%s13844_s1 + $0xbb0] ss:$1000 sps:$4 sm:$0xff]  }
 0x371   : > { %v7464_v53 = vadd.f32 %v7463_v57, %v4003_v37  ;;  %v7505_v61 = vadd.f32 %v7504_v49, %v4011_v38  ;;  %9644 = vmatpush1.bf16.msra.mxu1 %v13322_v44  ;;  %v7465_v56 = vpop.f32.mrb[134].mxu1  ;;  %v7506_v62 = vpop.f32.mrb[138].mxu0  ;;  %9685 = vmatpush1.bf16.msra.mxu0 %v13325_v45  ;;  %v10920_v20 = vrot.slane %v10912_v43, %v14275_v17 }
 0x372   : > { %v7466_v0 = vpop.f32.mrb[135].mxu1  ;;  %v7507_v2 = vpop.f32.mrb[139].mxu0  ;;  %9723 = vmatprep.subr.bf16.mxu1 %v13330_v41  ;;  %9764 = vmatprep.subr.bf16.mxu0 %v13333_v46  ;;  %v4031_v45 = vrot.slane %v15173_v63, %v14268_v8  ;;  %v4039_v41 = vrot.slane %v15173_v63, %v14271_v14  ;;  %v4035_v46 = vrot.slane %v15173_v63, %v14273_v15 }
 0x373   : > { %v10882_v1 = vcombine.low %v7462_v50, %v7464_v53  ;;  %v10883_v7 = vcombine.low %v7503_v54, %v7505_v61  ;;  %v4043_v50 = vrot.slane %v15173_v63, %v14278_v23 }
 0x374   : > { %12467 = vmatmul.mubr.msk.bf16.vlgmr.msra.gmra.mrb[240].mxu1 %vm328_vm1, %v13865_v27  ;;  %12468 = vmatmul.mubr.msk.bf16.vlgmr.msra.gmra.mrb[244].mxu0 %vm328_vm1, %v13865_v27 }
 0x375   : > { %v10904_v10 = vrot.slane %v10882_v1, %v14275_v17  ;;  %v10911_v11 = vrot.slane %v10883_v7, %v14275_v17  ;;  %9724 = vmatpush1.bf16.msra.mxu1 %v13328_v60  ;;  %9765 = vmatpush1.bf16.msra.mxu0 %v13331_v59 }
 0x376   : > { %9725 = vmatprep.subr.bf16.mxu1 %v13336_v4  ;;  %9766 = vmatprep.subr.bf16.mxu0 %v13339_v6  ;;  %v922_v4 = vld [vmem:[%s14239_s3 + $0x90] sm:$0xff] }
 0x377   : > { %v10913_v22 = vcombine.low %v10904_v10, %v10911_v11  ;;  %v7543_v16 = vpop.f32.mrb[136].mxu1  ;;  %v7584_v24 = vpop.f32.mrb[140].mxu0  ;;  %9755 = vmatprep.mubr.bf16.mxu1 %v13579_v18  ;;  %9796 = vmatprep.mubr.bf16.mxu0 %v13579_v18  ;;  %v4051_v10 = vrot.slane %v922_v4, %v14244_v55  ;;  %v4059_v11 = vrot.slane %v922_v4, %v14246_v58 }
 0x378   : > { %v7544_v25 = vadd.f32 %v7543_v16, %v4015_v3  ;;  %v7585_v26 = vadd.f32 %v7584_v24, %v4023_v9  ;;  %v7545_v29 = vpop.f32.mrb[137].mxu1  ;;  %v7586_v31 = vpop.f32.mrb[141].mxu0  ;;  %v4055_v3 = vrot.slane %v922_v4, %v14234_v52 }
 0x379   : > { %v10927_v33 = vrot.slane %v10913_v22, %v14275_v17  ;;  %v7546_v28 = vadd.f32 %v7545_v29, %v4019_v5  ;;  %v7587_v34 = vadd.f32 %v7586_v31, %v4027_v19  ;;  %9726 = vmatpush1.bf16.msra.mxu1 %v13334_v13  ;;  %v7547_v30 = vpop.f32.mrb[138].mxu1  ;;  %v7588_v35 = vpop.f32.mrb[142].mxu0  ;;  %9767 = vmatpush1.bf16.msra.mxu0 %v13337_v21 }
 0x37a   : > { %v7548_v36 = vpop.f32.mrb[139].mxu1  ;;  %v7589_v37 = vpop.f32.mrb[143].mxu0  ;;  %9805 = vmatprep.subr.bf16.mxu1 %v13342_v12 }
 0x37b   : > { %v10928_v42 = vcombine.low %v10920_v20, %v10927_v33  ;;  %v10929_v44 = vcombine.low %v7544_v25, %v7546_v28  ;;  %v10930_v38 = vcombine.low %v7585_v26, %v7587_v34  ;;  %v4071_v36 = vrot.slane %v922_v4, %v14271_v14 }
 0x37c   : > { %12469 = vmatmul.mubr.msk.bf16.vlgmr.msra.gmra.mrb[244].mxu1 %vm328_vm1, %v13865_v27  ;;  %12470 = vmatmul.mubr.msk.bf16.vlgmr.msra.gmra.mrb[248].mxu0 %vm328_vm1, %v13865_v27 }
 0x37d   : > { %11678 = vst [vmem:[%s14347_s6 + $0x80] sm:$0xff] %v10928_v42  ;;  %v10939_v43 = vrot.slane %v10929_v44, %v14275_v17  ;;  %v10946_v47 = vrot.slane %v10930_v38, %v14275_v17  ;;  %9806 = vmatpush1.bf16.msra.mxu1 %v13340_v32  ;;  %9837 = vmatprep.mubr.bf16.mxu1 %v13579_v18 }
 0x37e   : > { %9807 = vmatprep.subr.bf16.mxu1 %v13345_v39  ;;  %v4047_v18 = vrot.slane %v922_v4, %v14232_v51  ;;  %v4063_v32 = vrot.slane %v922_v4, %v14268_v8  ;;  %v4067_v42 = vrot.slane %v922_v4, %v14273_v15  ;;  %v4075_v44 = vrot.slane %v922_v4, %v14278_v23 }
 0x37f   : > { %v10961_v54 = vcombine.low %v10939_v43, %v10946_v47  ;;  %v7625_v57 = vpop.f32.mrb[140].mxu1  ;;  %v7666_v49 = vpop.f32.mrb[144].mxu0 }
 0x380   : > { %v7626_v60 = vadd.f32 %v7625_v57, %v4031_v45  ;;  %v7667_v53 = vadd.f32 %v7666_v49, %v4039_v41  ;;  %v7627_v61 = vpop.f32.mrb[141].mxu1  ;;  %v7668_v56 = vpop.f32.mrb[145].mxu0 }
 0x381   : > { %v7628_v62 = vadd.f32 %v7627_v61, %v4035_v46  ;;  %v7669_v59 = vadd.f32 %v7668_v56, %v4043_v50  ;;  %9808 = vmatpush1.bf16.msra.mxu1 %v13343_v48  ;;  %v7629_v0 = vpop.f32.mrb[142].mxu1  ;;  %v7670_v2 = vpop.f32.mrb[146].mxu0  ;;  %v10969_v24 = vrot.slane %v10961_v54, %v14275_v17 }
 0x382   : > { %v7630_v6 = vpop.f32.mrb[143].mxu1  ;;  %v7671_v1 = vpop.f32.mrb[147].mxu0 }
 0x383   : > { %v10931_v7 = vcombine.low %v7626_v60, %v7628_v62  ;;  %v10932_v63 = vcombine.low %v7667_v53, %v7669_v59  ;;  %v923_v60 = vld [vmem:[%s14239_s3 + $0x98] sm:$0xff] }
 0x384   : > { %12471 = vmatmul.mubr.msk.bf16.vlgmr.msra.gmra.mrb[248].mxu1 %vm328_vm1, %v13865_v27  ;;  %v4079_v59 = vrot.slane %v923_v60, %v14232_v51  ;;  %v4087_v0 = vrot.slane %v923_v60, %v14234_v52  ;;  %v4083_v6 = vrot.slane %v923_v60, %v14244_v55  ;;  %v4091_v1 = vrot.slane %v923_v60, %v14246_v58 }
 0x385   : > { %v10953_v9 = vrot.slane %v10931_v7, %v14275_v17  ;;  %v10960_v5 = vrot.slane %v10932_v63, %v14275_v17 }
 0x387   : > { %v10962_v13 = vcombine.low %v10953_v9, %v10960_v5  ;;  %v7707_v19 = vpop.f32.mrb[144].mxu1  ;;  %v7748_v21 = vpop.f32.mrb[148].mxu0 }
 0x388   : > { %v7708_v12 = vadd.f32 %v7707_v19, %v4047_v18  ;;  %v7749_v22 = vadd.f32 %v7748_v21, %v4055_v3  ;;  %v7709_v16 = vpop.f32.mrb[145].mxu1  ;;  %v7750_v27 = vpop.f32.mrb[149].mxu0 }
 0x389   : > { %v10976_v20 = vrot.slane %v10962_v13, %v14275_v17  ;;  %v7710_v25 = vadd.f32 %v7709_v16, %v4051_v10  ;;  %v7751_v26 = vadd.f32 %v7750_v27, %v4059_v11  ;;  %v7711_v29 = vpop.f32.mrb[146].mxu1  ;;  %v7752_v31 = vpop.f32.mrb[150].mxu0 }
 0x38a   : > { %v7712_v33 = vpop.f32.mrb[147].mxu1  ;;  %v7753_v28 = vpop.f32.mrb[151].mxu0  ;;  %v4103_v29 = vrot.slane %v923_v60, %v14271_v14 }
 0x38b   : > { %v10977_v34 = vcombine.low %v10969_v24, %v10976_v20  ;;  %v10978_v30 = vcombine.low %v7708_v12, %v7710_v25  ;;  %v10979_v35 = vcombine.low %v7749_v22, %v7751_v26  ;;  %v4095_v26 = vrot.slane %v923_v60, %v14268_v8 }
 0x38c   : > { %v4099_v28 = vrot.slane %v923_v60, %v14273_v15 }
 0x38d   : > { %11679 = vst [vmem:[%s14347_s6 + $0x88] sm:$0xff] %v10977_v34  ;;  %v10988_v37 = vrot.slane %v10978_v30, %v14275_v17  ;;  %v10995_v39 = vrot.slane %v10979_v35, %v14275_v17  ;;  %v4107_v34 = vrot.slane %v923_v60, %v14278_v23 }
 0x38f   : > { %v11010_v38 = vcombine.low %v10988_v37, %v10995_v39  ;;  %v7789_v45 = vpop.f32.mrb[148].mxu1  ;;  %v7830_v41 = vpop.f32.mrb[152].mxu0 }
 0x390   : > { %v7790_v46 = vadd.f32 %v7789_v45, %v4063_v32  ;;  %v7831_v43 = vadd.f32 %v7830_v41, %v4071_v36  ;;  %v7791_v47 = vpop.f32.mrb[149].mxu1  ;;  %v7832_v48 = vpop.f32.mrb[153].mxu0 }
 0x391   : > { %v7792_v50 = vadd.f32 %v7791_v47, %v4067_v42  ;;  %v7833_v54 = vadd.f32 %v7832_v48, %v4075_v44  ;;  %v7793_v57 = vpop.f32.mrb[150].mxu1  ;;  %v7834_v49 = vpop.f32.mrb[154].mxu0  ;;  %v11018_v11 = vrot.slane %v11010_v38, %v14275_v17 }
 0x392   : > { %v7794_v53 = vpop.f32.mrb[151].mxu1  ;;  %v7835_v61 = vpop.f32.mrb[155].mxu0 }
 0x393   : > { %v10980_v56 = vcombine.low %v7790_v46, %v7792_v50  ;;  %v10981_v62 = vcombine.low %v7831_v43, %v7833_v54  ;;  %v924_v46 = vld [vmem:[%s14239_s3 + $0xa0] sm:$0xff] }
 0x394   : > { %v4111_v54 = vrot.slane %v924_v46, %v14232_v51  ;;  %v4119_v57 = vrot.slane %v924_v46, %v14234_v52  ;;  %v4115_v53 = vrot.slane %v924_v46, %v14244_v55  ;;  %v4123_v61 = vrot.slane %v924_v46, %v14246_v58 }
 0x395   : > { %v11002_v2 = vrot.slane %v10980_v56, %v14275_v17  ;;  %v11009_v4 = vrot.slane %v10981_v62, %v14275_v17 }
 0x397   : > { %v11011_v7 = vcombine.low %v11002_v2, %v11009_v4  ;;  %v7871_v63 = vpop.f32.mrb[152].mxu1  ;;  %v7912_v18 = vpop.f32.mrb[156].mxu0 }
 0x398   : > { %v7872_v3 = vadd.f32 %v7871_v63, %v4079_v59  ;;  %v7913_v9 = vadd.f32 %v7912_v18, %v4087_v0  ;;  %v7873_v5 = vpop.f32.mrb[153].mxu1  ;;  %v7914_v10 = vpop.f32.mrb[157].mxu0 }
 0x399   : > { %v11025_v13 = vrot.slane %v11011_v7, %v14275_v17  ;;  %v7874_v19 = vadd.f32 %v7873_v5, %v4083_v6  ;;  %v7915_v21 = vadd.f32 %v7914_v10, %v4091_v1  ;;  %v7875_v12 = vpop.f32.mrb[154].mxu1  ;;  %v7916_v22 = vpop.f32.mrb[158].mxu0 }
 0x39a   : > { %v7876_v16 = vpop.f32.mrb[155].mxu1  ;;  %v7917_v27 = vpop.f32.mrb[159].mxu0  ;;  %v4135_v12 = vrot.slane %v924_v46, %v14271_v14 }
 0x39b   : > { %v11026_v24 = vcombine.low %v11018_v11, %v11025_v13  ;;  %v11027_v20 = vcombine.low %v7872_v3, %v7874_v19  ;;  %v11028_v25 = vcombine.low %v7913_v9, %v7915_v21  ;;  %v4127_v21 = vrot.slane %v924_v46, %v14268_v8 }
 0x39c   : > { %v4131_v27 = vrot.slane %v924_v46, %v14273_v15 }
 0x39d   : > { %11680 = vst [vmem:[%s14347_s6 + $0x90] sm:$0xff] %v11026_v24  ;;  %v11037_v31 = vrot.slane %v11027_v20, %v14275_v17  ;;  %v11044_v33 = vrot.slane %v11028_v25, %v14275_v17  ;;  %v4139_v24 = vrot.slane %v924_v46, %v14278_v23 }
 0x39f   : > { %v11059_v30 = vcombine.low %v11037_v31, %v11044_v33  ;;  %v7953_v35 = vpop.f32.mrb[156].mxu1  ;;  %v7994_v32 = vpop.f32.mrb[160].mxu0 }
 0x3a0   : > { %v7954_v36 = vadd.f32 %v7953_v35, %v4095_v26  ;;  %v7995_v37 = vadd.f32 %v7994_v32, %v4103_v29  ;;  %v7955_v39 = vpop.f32.mrb[157].mxu1  ;;  %v7996_v42 = vpop.f32.mrb[161].mxu0 }
 0x3a1   : > { %v7956_v44 = vadd.f32 %v7955_v39, %v4099_v28  ;;  %v7997_v38 = vadd.f32 %v7996_v42, %v4107_v34  ;;  %v7957_v45 = vpop.f32.mrb[158].mxu1  ;;  %v7998_v41 = vpop.f32.mrb[162].mxu0  ;;  %v11067_v1 = vrot.slane %v11059_v30, %v14275_v17 }
 0x3a2   : > { %v7958_v43 = vpop.f32.mrb[159].mxu1  ;;  %v7999_v47 = vpop.f32.mrb[163].mxu0 }
 0x3a3   : > { %v11029_v48 = vcombine.low %v7954_v36, %v7956_v44  ;;  %v11030_v50 = vcombine.low %v7995_v37, %v7997_v38  ;;  %v925_v36 = vld [vmem:[%s14239_s3 + $0xa8] sm:$0xff] }
 0x3a4   : > { %v4143_v38 = vrot.slane %v925_v36, %v14232_v51  ;;  %v4151_v45 = vrot.slane %v925_v36, %v14234_v52  ;;  %v4147_v43 = vrot.slane %v925_v36, %v14244_v55  ;;  %v4155_v47 = vrot.slane %v925_v36, %v14246_v58 }
 0x3a5   : > { %v11051_v49 = vrot.slane %v11029_v48, %v14275_v17  ;;  %v11058_v60 = vrot.slane %v11030_v50, %v14275_v17 }
 0x3a7   : > { %v11060_v56 = vcombine.low %v11051_v49, %v11058_v60  ;;  %v8035_v62 = vpop.f32.mrb[160].mxu1  ;;  %v8076_v59 = vpop.f32.mrb[164].mxu0 }
 0x3a8   : > { %v8036_v0 = vadd.f32 %v8035_v62, %v4111_v54  ;;  %v8077_v2 = vadd.f32 %v8076_v59, %v4119_v57  ;;  %v8037_v4 = vpop.f32.mrb[161].mxu1  ;;  %v8078_v6 = vpop.f32.mrb[165].mxu0 }
 0x3a9   : > { %v11074_v7 = vrot.slane %v11060_v56, %v14275_v17  ;;  %v8038_v63 = vadd.f32 %v8037_v4, %v4115_v53  ;;  %v8079_v18 = vadd.f32 %v8078_v6, %v4123_v61  ;;  %v8039_v3 = vpop.f32.mrb[162].mxu1  ;;  %v8080_v9 = vpop.f32.mrb[166].mxu0 }
 0x3aa   : > { %v8040_v5 = vpop.f32.mrb[163].mxu1  ;;  %v8081_v10 = vpop.f32.mrb[167].mxu0  ;;  %v4167_v3 = vrot.slane %v925_v36, %v14271_v14 }
 0x3ab   : > { %v11075_v11 = vcombine.low %v11067_v1, %v11074_v7  ;;  %v11076_v13 = vcombine.low %v8036_v0, %v8038_v63  ;;  %v11077_v19 = vcombine.low %v8077_v2, %v8079_v18  ;;  %v4159_v18 = vrot.slane %v925_v36, %v14268_v8 }
 0x3ac   : > { %v4163_v10 = vrot.slane %v925_v36, %v14273_v15 }
 0x3ad   : > { %11681 = vst [vmem:[%s14347_s6 + $0x98] sm:$0xff] %v11075_v11  ;;  %v11086_v22 = vrot.slane %v11076_v13, %v14275_v17  ;;  %v11093_v16 = vrot.slane %v11077_v19, %v14275_v17  ;;  %v4171_v11 = vrot.slane %v925_v36, %v14278_v23 }
 0x3af   : > { %v11108_v20 = vcombine.low %v11086_v22, %v11093_v16  ;;  %v8117_v25 = vpop.f32.mrb[164].mxu1  ;;  %v8158_v26 = vpop.f32.mrb[168].mxu0 }
 0x3b0   : > { %v8118_v29 = vadd.f32 %v8117_v25, %v4127_v21  ;;  %v8159_v31 = vadd.f32 %v8158_v26, %v4135_v12  ;;  %v8119_v33 = vpop.f32.mrb[165].mxu1  ;;  %v8160_v28 = vpop.f32.mrb[169].mxu0 }
 0x3b1   : > { %v8120_v34 = vadd.f32 %v8119_v33, %v4131_v27  ;;  %v8161_v30 = vadd.f32 %v8160_v28, %v4139_v24  ;;  %v8121_v35 = vpop.f32.mrb[166].mxu1  ;;  %v8162_v32 = vpop.f32.mrb[170].mxu0  ;;  %v11116_v61 = vrot.slane %v11108_v20, %v14275_v17 }
 0x3b2   : > { %v8122_v37 = vpop.f32.mrb[167].mxu1  ;;  %v8163_v39 = vpop.f32.mrb[171].mxu0 }
 0x3b3   : > { %v11078_v42 = vcombine.low %v8118_v29, %v8120_v34  ;;  %v11079_v44 = vcombine.low %v8159_v31, %v8161_v30  ;;  %v926_v29 = vld [vmem:[%s14239_s3 + $0xb0] sm:$0xff] }
 0x3b4   : > { %v4175_v30 = vrot.slane %v926_v29, %v14232_v51  ;;  %v4183_v35 = vrot.slane %v926_v29, %v14234_v52  ;;  %v4179_v37 = vrot.slane %v926_v29, %v14244_v55  ;;  %v4187_v39 = vrot.slane %v926_v29, %v14246_v58 }
 0x3b5   : > { %v11100_v41 = vrot.slane %v11078_v42, %v14275_v17  ;;  %v11107_v46 = vrot.slane %v11079_v44, %v14275_v17 }
 0x3b7   : > { %v11109_v48 = vcombine.low %v11100_v41, %v11107_v46  ;;  %v8199_v50 = vpop.f32.mrb[168].mxu1  ;;  %v8240_v54 = vpop.f32.mrb[172].mxu0 }
 0x3b8   : > { %v8200_v57 = vadd.f32 %v8199_v50, %v4143_v38  ;;  %v8241_v49 = vadd.f32 %v8240_v54, %v4151_v45  ;;  %v8201_v60 = vpop.f32.mrb[169].mxu1  ;;  %v8242_v53 = vpop.f32.mrb[173].mxu0 }
 0x3b9   : > { %v11123_v56 = vrot.slane %v11109_v48, %v14275_v17  ;;  %v8202_v62 = vadd.f32 %v8201_v60, %v4147_v43  ;;  %v8243_v59 = vadd.f32 %v8242_v53, %v4155_v47  ;;  %v8203_v0 = vpop.f32.mrb[170].mxu1  ;;  %v8244_v2 = vpop.f32.mrb[174].mxu0 }
 0x3ba   : > { %v8204_v4 = vpop.f32.mrb[171].mxu1  ;;  %v8245_v6 = vpop.f32.mrb[175].mxu0  ;;  %v4199_v0 = vrot.slane %v926_v29, %v14271_v14 }
 0x3bb   : > { %v11124_v1 = vcombine.low %v11116_v61, %v11123_v56  ;;  %v11125_v7 = vcombine.low %v8200_v57, %v8202_v62  ;;  %v11126_v63 = vcombine.low %v8241_v49, %v8243_v59  ;;  %v4191_v59 = vrot.slane %v926_v29, %v14268_v8 }
 0x3bc   : > { %v4195_v6 = vrot.slane %v926_v29, %v14273_v15 }
 0x3bd   : > { %11682 = vst [vmem:[%s14347_s6 + $0xa0] sm:$0xff] %v11124_v1  ;;  %v11135_v9 = vrot.slane %v11125_v7, %v14275_v17  ;;  %v11142_v5 = vrot.slane %v11126_v63, %v14275_v17  ;;  %v4203_v1 = vrot.slane %v926_v29, %v14278_v23 }
 0x3bf   : > { %v11157_v13 = vcombine.low %v11135_v9, %v11142_v5  ;;  %v8281_v19 = vpop.f32.mrb[172].mxu1  ;;  %v8322_v21 = vpop.f32.mrb[176].mxu0 }
 0x3c0   : > { %v8282_v12 = vadd.f32 %v8281_v19, %v4159_v18  ;;  %v8323_v22 = vadd.f32 %v8322_v21, %v4167_v3  ;;  %v8283_v16 = vpop.f32.mrb[173].mxu1  ;;  %v8324_v27 = vpop.f32.mrb[177].mxu0 }
 0x3c1   : > { %v8284_v24 = vadd.f32 %v8283_v16, %v4163_v10  ;;  %v8325_v20 = vadd.f32 %v8324_v27, %v4171_v11  ;;  %v8285_v25 = vpop.f32.mrb[174].mxu1  ;;  %v8326_v26 = vpop.f32.mrb[178].mxu0  ;;  %v11165_v47 = vrot.slane %v11157_v13, %v14275_v17 }
 0x3c2   : > { %v8286_v31 = vpop.f32.mrb[175].mxu1  ;;  %v8327_v33 = vpop.f32.mrb[179].mxu0 }
 0x3c3   : > { %v11127_v28 = vcombine.low %v8282_v12, %v8284_v24  ;;  %v11128_v34 = vcombine.low %v8323_v22, %v8325_v20  ;;  %v927_v12 = vld [vmem:[%s14239_s3 + $0xb8] sm:$0xff] }
 0x3c4   : > { %v4207_v20 = vrot.slane %v927_v12, %v14232_v51  ;;  %v4215_v25 = vrot.slane %v927_v12, %v14234_v52  ;;  %v4211_v31 = vrot.slane %v927_v12, %v14244_v55  ;;  %v4219_v33 = vrot.slane %v927_v12, %v14246_v58 }
 0x3c5   : > { %v11149_v32 = vrot.slane %v11127_v28, %v14275_v17  ;;  %v11156_v36 = vrot.slane %v11128_v34, %v14275_v17 }
 0x3c7   : > { %v11158_v42 = vcombine.low %v11149_v32, %v11156_v36  ;;  %v8363_v44 = vpop.f32.mrb[176].mxu1  ;;  %v8404_v38 = vpop.f32.mrb[180].mxu0 }
 0x3c8   : > { %v8364_v45 = vadd.f32 %v8363_v44, %v4175_v30  ;;  %v8405_v41 = vadd.f32 %v8404_v38, %v4183_v35  ;;  %v8365_v46 = vpop.f32.mrb[177].mxu1  ;;  %v8406_v43 = vpop.f32.mrb[181].mxu0 }
 0x3c9   : > { %v11172_v48 = vrot.slane %v11158_v42, %v14275_v17  ;;  %v8366_v50 = vadd.f32 %v8365_v46, %v4179_v37  ;;  %v8407_v54 = vadd.f32 %v8406_v43, %v4187_v39  ;;  %v8367_v57 = vpop.f32.mrb[178].mxu1  ;;  %v8408_v49 = vpop.f32.mrb[182].mxu0 }
 0x3ca   : > { %v8368_v60 = vpop.f32.mrb[179].mxu1  ;;  %v8409_v53 = vpop.f32.mrb[183].mxu0  ;;  %v4231_v57 = vrot.slane %v927_v12, %v14271_v14 }
 0x3cb   : > { %v11173_v61 = vcombine.low %v11165_v47, %v11172_v48  ;;  %v11174_v56 = vcombine.low %v8364_v45, %v8366_v50  ;;  %v11175_v62 = vcombine.low %v8405_v41, %v8407_v54  ;;  %v4223_v54 = vrot.slane %v927_v12, %v14268_v8 }
 0x3cc   : > { %v4227_v53 = vrot.slane %v927_v12, %v14273_v15 }
 0x3cd   : > { %11683 = vst [vmem:[%s14347_s6 + $0xa8] sm:$0xff] %v11173_v61  ;;  %v11184_v2 = vrot.slane %v11174_v56, %v14275_v17  ;;  %v11191_v4 = vrot.slane %v11175_v62, %v14275_v17  ;;  %v4235_v61 = vrot.slane %v927_v12, %v14278_v23 }
 0x3cf   : > { %v11206_v7 = vcombine.low %v11184_v2, %v11191_v4  ;;  %v8445_v63 = vpop.f32.mrb[180].mxu1  ;;  %v8486_v18 = vpop.f32.mrb[184].mxu0 }
 0x3d0   : > { %v8446_v3 = vadd.f32 %v8445_v63, %v4191_v59  ;;  %v8487_v9 = vadd.f32 %v8486_v18, %v4199_v0  ;;  %v8447_v5 = vpop.f32.mrb[181].mxu1  ;;  %v8488_v10 = vpop.f32.mrb[185].mxu0 }
 0x3d1   : > { %v8448_v11 = vadd.f32 %v8447_v5, %v4195_v6  ;;  %v8489_v13 = vadd.f32 %v8488_v10, %v4203_v1  ;;  %v8449_v19 = vpop.f32.mrb[182].mxu1  ;;  %v8490_v21 = vpop.f32.mrb[186].mxu0  ;;  %v11214_v39 = vrot.slane %v11206_v7, %v14275_v17 }
 0x3d2   : > { %v8450_v22 = vpop.f32.mrb[183].mxu1  ;;  %v8491_v16 = vpop.f32.mrb[187].mxu0 }
 0x3d3   : > { %v11176_v27 = vcombine.low %v8446_v3, %v8448_v11  ;;  %v11177_v24 = vcombine.low %v8487_v9, %v8489_v13  ;;  %v928_v3 = vld [vmem:[%s14239_s3 + $0xc0] sm:$0xff] }
 0x3d4   : > { %v4239_v13 = vrot.slane %v928_v3, %v14232_v51  ;;  %v4247_v19 = vrot.slane %v928_v3, %v14234_v52  ;;  %v4243_v22 = vrot.slane %v928_v3, %v14244_v55  ;;  %v4251_v16 = vrot.slane %v928_v3, %v14246_v58 }
 0x3d5   : > { %v11198_v26 = vrot.slane %v11176_v27, %v14275_v17  ;;  %v11205_v29 = vrot.slane %v11177_v24, %v14275_v17 }
 0x3d7   : > { %v11207_v28 = vcombine.low %v11198_v26, %v11205_v29  ;;  %v8527_v34 = vpop.f32.mrb[184].mxu1  ;;  %v8568_v30 = vpop.f32.mrb[188].mxu0 }
 0x3d8   : > { %v8528_v35 = vadd.f32 %v8527_v34, %v4207_v20  ;;  %v8569_v32 = vadd.f32 %v8568_v30, %v4215_v25  ;;  %v8529_v36 = vpop.f32.mrb[185].mxu1  ;;  %v8570_v37 = vpop.f32.mrb[189].mxu0 }
 0x3d9   : > { %v11221_v42 = vrot.slane %v11207_v28, %v14275_v17  ;;  %v8530_v44 = vadd.f32 %v8529_v36, %v4211_v31  ;;  %v8571_v38 = vadd.f32 %v8570_v37, %v4219_v33  ;;  %v8531_v45 = vpop.f32.mrb[186].mxu1  ;;  %v8572_v41 = vpop.f32.mrb[190].mxu0 }
 0x3da   : > { %v8532_v46 = vpop.f32.mrb[187].mxu1  ;;  %v8573_v43 = vpop.f32.mrb[191].mxu0  ;;  %v4263_v45 = vrot.slane %v928_v3, %v14271_v14 }
 0x3db   : > { %v11222_v47 = vcombine.low %v11214_v39, %v11221_v42  ;;  %v11223_v48 = vcombine.low %v8528_v35, %v8530_v44  ;;  %v11224_v50 = vcombine.low %v8569_v32, %v8571_v38  ;;  %v4255_v38 = vrot.slane %v928_v3, %v14268_v8 }
 0x3dc   : > { %v4259_v43 = vrot.slane %v928_v3, %v14273_v15 }
 0x3dd   : > { %11684 = vst [vmem:[%s14347_s6 + $0xb0] sm:$0xff] %v11222_v47  ;;  %v11233_v49 = vrot.slane %v11223_v48, %v14275_v17  ;;  %v11240_v60 = vrot.slane %v11224_v50, %v14275_v17  ;;  %v4267_v47 = vrot.slane %v928_v3, %v14278_v23 }
 0x3df   : > { %v11255_v56 = vcombine.low %v11233_v49, %v11240_v60  ;;  %v8609_v62 = vpop.f32.mrb[188].mxu1  ;;  %v8650_v59 = vpop.f32.mrb[192].mxu0 }
 0x3e0   : > { %v8610_v0 = vadd.f32 %v8609_v62, %v4223_v54  ;;  %v8651_v2 = vadd.f32 %v8650_v59, %v4231_v57  ;;  %v8611_v4 = vpop.f32.mrb[189].mxu1  ;;  %v8652_v6 = vpop.f32.mrb[193].mxu0 }
 0x3e1   : > { %v8612_v1 = vadd.f32 %v8611_v4, %v4227_v53  ;;  %v8653_v7 = vadd.f32 %v8652_v6, %v4235_v61  ;;  %v8613_v63 = vpop.f32.mrb[190].mxu1  ;;  %v8654_v18 = vpop.f32.mrb[194].mxu0  ;;  %v11263_v33 = vrot.slane %v11255_v56, %v14275_v17 }
 0x3e2   : > { %v8614_v9 = vpop.f32.mrb[191].mxu1  ;;  %v8655_v5 = vpop.f32.mrb[195].mxu0 }
 0x3e3   : > { %v11225_v10 = vcombine.low %v8610_v0, %v8612_v1  ;;  %v11226_v11 = vcombine.low %v8651_v2, %v8653_v7  ;;  %v929_v0 = vld [vmem:[%s14239_s3 + $0xc8] sm:$0xff] }
 0x3e4   : > { %v4271_v7 = vrot.slane %v929_v0, %v14232_v51  ;;  %v4279_v63 = vrot.slane %v929_v0, %v14234_v52  ;;  %v4275_v9 = vrot.slane %v929_v0, %v14244_v55  ;;  %v4283_v5 = vrot.slane %v929_v0, %v14246_v58 }
 0x3e5   : > { %v11247_v21 = vrot.slane %v11225_v10, %v14275_v17  ;;  %v11254_v12 = vrot.slane %v11226_v11, %v14275_v17 }
 0x3e7   : > { %v11256_v27 = vcombine.low %v11247_v21, %v11254_v12  ;;  %v8691_v24 = vpop.f32.mrb[192].mxu1  ;;  %v8732_v20 = vpop.f32.mrb[196].mxu0 }
 0x3e8   : > { %v8692_v25 = vadd.f32 %v8691_v24, %v4239_v13  ;;  %v8733_v26 = vadd.f32 %v8732_v20, %v4247_v19  ;;  %v8693_v29 = vpop.f32.mrb[193].mxu1  ;;  %v8734_v31 = vpop.f32.mrb[197].mxu0 }
 0x3e9   : > { %v11270_v28 = vrot.slane %v11256_v27, %v14275_v17  ;;  %v8694_v34 = vadd.f32 %v8693_v29, %v4243_v22  ;;  %v8735_v30 = vadd.f32 %v8734_v31, %v4251_v16  ;;  %v8695_v35 = vpop.f32.mrb[194].mxu1  ;;  %v8736_v32 = vpop.f32.mrb[198].mxu0 }
 0x3ea   : > { %v8696_v36 = vpop.f32.mrb[195].mxu1  ;;  %v8737_v37 = vpop.f32.mrb[199].mxu0  ;;  %v4295_v35 = vrot.slane %v929_v0, %v14271_v14 }
 0x3eb   : > { %v11271_v39 = vcombine.low %v11263_v33, %v11270_v28  ;;  %v11272_v42 = vcombine.low %v8692_v25, %v8694_v34  ;;  %v11273_v44 = vcombine.low %v8733_v26, %v8735_v30  ;;  %v4287_v30 = vrot.slane %v929_v0, %v14268_v8 }
 0x3ec   : > { %v4291_v37 = vrot.slane %v929_v0, %v14273_v15 }
 0x3ed   : > { %11685 = vst [vmem:[%s14347_s6 + $0xb8] sm:$0xff] %v11271_v39  ;;  %v11282_v41 = vrot.slane %v11272_v42, %v14275_v17  ;;  %v11289_v46 = vrot.slane %v11273_v44, %v14275_v17  ;;  %v4299_v39 = vrot.slane %v929_v0, %v14278_v23 }
 0x3ef   : > { %v11304_v48 = vcombine.low %v11282_v41, %v11289_v46  ;;  %v8773_v50 = vpop.f32.mrb[196].mxu1  ;;  %v8814_v54 = vpop.f32.mrb[200].mxu0 }
 0x3f0   : > { %v8774_v57 = vadd.f32 %v8773_v50, %v4255_v38  ;;  %v8815_v49 = vadd.f32 %v8814_v54, %v4263_v45  ;;  %v8775_v60 = vpop.f32.mrb[197].mxu1  ;;  %v8816_v53 = vpop.f32.mrb[201].mxu0 }
 0x3f1   : > { %v8776_v61 = vadd.f32 %v8775_v60, %v4259_v43  ;;  %v8817_v56 = vadd.f32 %v8816_v53, %v4267_v47  ;;  %v8777_v62 = vpop.f32.mrb[198].mxu1  ;;  %v8818_v59 = vpop.f32.mrb[202].mxu0  ;;  %v11312_v16 = vrot.slane %v11304_v48, %v14275_v17 }
 0x3f2   : > { %v8778_v2 = vpop.f32.mrb[199].mxu1  ;;  %v8819_v4 = vpop.f32.mrb[203].mxu0 }
 0x3f3   : > { %v11274_v6 = vcombine.low %v8774_v57, %v8776_v61  ;;  %v11275_v1 = vcombine.low %v8815_v49, %v8817_v56  ;;  %v930_v57 = vld [vmem:[%s14239_s3 + $0xd0] sm:$0xff] }
 0x3f4   : > { %v4303_v56 = vrot.slane %v930_v57, %v14232_v51  ;;  %v4311_v62 = vrot.slane %v930_v57, %v14234_v52  ;;  %v4307_v2 = vrot.slane %v930_v57, %v14244_v55  ;;  %v4315_v4 = vrot.slane %v930_v57, %v14246_v58 }
 0x3f5   : > { %v11296_v18 = vrot.slane %v11274_v6, %v14275_v17  ;;  %v11303_v3 = vrot.slane %v11275_v1, %v14275_v17 }
 0x3f7   : > { %v11305_v10 = vcombine.low %v11296_v18, %v11303_v3  ;;  %v8855_v11 = vpop.f32.mrb[200].mxu1  ;;  %v8896_v13 = vpop.f32.mrb[204].mxu0 }
 0x3f8   : > { %v8856_v19 = vadd.f32 %v8855_v11, %v4271_v7  ;;  %v8897_v21 = vadd.f32 %v8896_v13, %v4279_v63  ;;  %v8857_v12 = vpop.f32.mrb[201].mxu1  ;;  %v8898_v22 = vpop.f32.mrb[205].mxu0 }
 0x3f9   : > { %v11319_v27 = vrot.slane %v11305_v10, %v14275_v17  ;;  %v8858_v24 = vadd.f32 %v8857_v12, %v4275_v9  ;;  %v8899_v20 = vadd.f32 %v8898_v22, %v4283_v5  ;;  %v8859_v25 = vpop.f32.mrb[202].mxu1  ;;  %v8900_v26 = vpop.f32.mrb[206].mxu0 }
 0x3fa   : > { %v8860_v29 = vpop.f32.mrb[203].mxu1  ;;  %v8901_v31 = vpop.f32.mrb[207].mxu0  ;;  %v4327_v25 = vrot.slane %v930_v57, %v14271_v14 }
 0x3fb   : > { %v11320_v33 = vcombine.low %v11312_v16, %v11319_v27  ;;  %v11321_v28 = vcombine.low %v8856_v19, %v8858_v24  ;;  %v11322_v34 = vcombine.low %v8897_v21, %v8899_v20  ;;  %v4319_v20 = vrot.slane %v930_v57, %v14268_v8 }
 0x3fc   : > { %v4323_v31 = vrot.slane %v930_v57, %v14273_v15 }
 0x3fd   : > { %11686 = vst [vmem:[%s14347_s6 + $0xc0] sm:$0xff] %v11320_v33  ;;  %v11331_v32 = vrot.slane %v11321_v28, %v14275_v17  ;;  %v11338_v36 = vrot.slane %v11322_v34, %v14275_v17  ;;  %v4331_v33 = vrot.slane %v930_v57, %v14278_v23 }
 0x3ff   : > { %v11353_v42 = vcombine.low %v11331_v32, %v11338_v36  ;;  %v8937_v44 = vpop.f32.mrb[204].mxu1  ;;  %v8978_v38 = vpop.f32.mrb[208].mxu0 }
 0x400   : > { %v8938_v45 = vadd.f32 %v8937_v44, %v4287_v30  ;;  %v8979_v41 = vadd.f32 %v8978_v38, %v4295_v35  ;;  %v8939_v46 = vpop.f32.mrb[205].mxu1  ;;  %v8980_v43 = vpop.f32.mrb[209].mxu0 }
 0x401   : > { %v8940_v47 = vadd.f32 %v8939_v46, %v4291_v37  ;;  %v8981_v48 = vadd.f32 %v8980_v43, %v4299_v39  ;;  %v8941_v50 = vpop.f32.mrb[206].mxu1  ;;  %v8982_v54 = vpop.f32.mrb[210].mxu0  ;;  %v11361_v5 = vrot.slane %v11353_v42, %v14275_v17 }
 0x402   : > { %v8942_v49 = vpop.f32.mrb[207].mxu1  ;;  %v8983_v60 = vpop.f32.mrb[211].mxu0 }
 0x403   : > { %v11323_v53 = vcombine.low %v8938_v45, %v8940_v47  ;;  %v11324_v61 = vcombine.low %v8979_v41, %v8981_v48  ;;  %v931_v45 = vld [vmem:[%s14239_s3 + $0xd8] sm:$0xff] }
 0x404   : > { %v4335_v48 = vrot.slane %v931_v45, %v14232_v51  ;;  %v4343_v50 = vrot.slane %v931_v45, %v14234_v52  ;;  %v4339_v49 = vrot.slane %v931_v45, %v14244_v55  ;;  %v4347_v60 = vrot.slane %v931_v45, %v14246_v58 }
 0x405   : > { %v11345_v59 = vrot.slane %v11323_v53, %v14275_v17  ;;  %v11352_v0 = vrot.slane %v11324_v61, %v14275_v17 }
 0x407   : > { %v11354_v6 = vcombine.low %v11345_v59, %v11352_v0  ;;  %v9019_v1 = vpop.f32.mrb[208].mxu1  ;;  %v9060_v7 = vpop.f32.mrb[212].mxu0 }
 0x408   : > { %v9020_v63 = vadd.f32 %v9019_v1, %v4303_v56  ;;  %v9061_v18 = vadd.f32 %v9060_v7, %v4311_v62  ;;  %v9021_v3 = vpop.f32.mrb[209].mxu1  ;;  %v9062_v9 = vpop.f32.mrb[213].mxu0 }
 0x409   : > { %v11368_v10 = vrot.slane %v11354_v6, %v14275_v17  ;;  %v9022_v11 = vadd.f32 %v9021_v3, %v4307_v2  ;;  %v9063_v13 = vadd.f32 %v9062_v9, %v4315_v4  ;;  %v9023_v19 = vpop.f32.mrb[210].mxu1  ;;  %v9064_v21 = vpop.f32.mrb[214].mxu0 }
 0x40a   : > { %v9024_v12 = vpop.f32.mrb[211].mxu1  ;;  %v9065_v22 = vpop.f32.mrb[215].mxu0  ;;  %v4359_v19 = vrot.slane %v931_v45, %v14271_v14 }
 0x40b   : > { %v11369_v16 = vcombine.low %v11361_v5, %v11368_v10  ;;  %v11370_v27 = vcombine.low %v9020_v63, %v9022_v11  ;;  %v11371_v24 = vcombine.low %v9061_v18, %v9063_v13  ;;  %v4351_v13 = vrot.slane %v931_v45, %v14268_v8 }
 0x40c   : > { %v4355_v22 = vrot.slane %v931_v45, %v14273_v15 }
 0x40d   : > { %11687 = vst [vmem:[%s14347_s6 + $0xc8] sm:$0xff] %v11369_v16  ;;  %v11380_v26 = vrot.slane %v11370_v27, %v14275_v17  ;;  %v11387_v29 = vrot.slane %v11371_v24, %v14275_v17  ;;  %v4363_v16 = vrot.slane %v931_v45, %v14278_v23 }
 0x40f   : > { %v11402_v28 = vcombine.low %v11380_v26, %v11387_v29  ;;  %v9101_v34 = vpop.f32.mrb[212].mxu1  ;;  %v9142_v30 = vpop.f32.mrb[216].mxu0 }
 0x410   : > { %v9102_v35 = vadd.f32 %v9101_v34, %v4319_v20  ;;  %v9143_v32 = vadd.f32 %v9142_v30, %v4327_v25  ;;  %v9103_v36 = vpop.f32.mrb[213].mxu1  ;;  %v9144_v37 = vpop.f32.mrb[217].mxu0 }
 0x411   : > { %v9104_v39 = vadd.f32 %v9103_v36, %v4323_v31  ;;  %v9145_v42 = vadd.f32 %v9144_v37, %v4331_v33  ;;  %v9105_v44 = vpop.f32.mrb[214].mxu1  ;;  %v9146_v38 = vpop.f32.mrb[218].mxu0  ;;  %v11410_v4 = vrot.slane %v11402_v28, %v14275_v17 }
 0x412   : > { %v9106_v41 = vpop.f32.mrb[215].mxu1  ;;  %v9147_v46 = vpop.f32.mrb[219].mxu0 }
 0x413   : > { %v11372_v43 = vcombine.low %v9102_v35, %v9104_v39  ;;  %v11373_v47 = vcombine.low %v9143_v32, %v9145_v42  ;;  %v932_v35 = vld [vmem:[%s14239_s3 + $0xe0] sm:$0xff] }
 0x414   : > { %v4367_v42 = vrot.slane %v932_v35, %v14232_v51  ;;  %v4375_v44 = vrot.slane %v932_v35, %v14234_v52  ;;  %v4371_v41 = vrot.slane %v932_v35, %v14244_v55  ;;  %v4379_v46 = vrot.slane %v932_v35, %v14246_v58 }
 0x415   : > { %v11394_v54 = vrot.slane %v11372_v43, %v14275_v17  ;;  %v11401_v57 = vrot.slane %v11373_v47, %v14275_v17 }
 0x417   : > { %v11403_v53 = vcombine.low %v11394_v54, %v11401_v57  ;;  %v9183_v61 = vpop.f32.mrb[216].mxu1  ;;  %v9224_v56 = vpop.f32.mrb[220].mxu0 }
 0x418   : > { %v9184_v62 = vadd.f32 %v9183_v61, %v4335_v48  ;;  %v9225_v59 = vadd.f32 %v9224_v56, %v4343_v50  ;;  %v9185_v0 = vpop.f32.mrb[217].mxu1  ;;  %v9226_v2 = vpop.f32.mrb[221].mxu0 }
 0x419   : > { %v11417_v6 = vrot.slane %v11403_v53, %v14275_v17  ;;  %v9186_v1 = vadd.f32 %v9185_v0, %v4339_v49  ;;  %v9227_v7 = vadd.f32 %v9226_v2, %v4347_v60  ;;  %v9187_v63 = vpop.f32.mrb[218].mxu1  ;;  %v9228_v18 = vpop.f32.mrb[222].mxu0 }
 0x41a   : > { %v9188_v3 = vpop.f32.mrb[219].mxu1  ;;  %v9229_v9 = vpop.f32.mrb[223].mxu0  ;;  %v4391_v63 = vrot.slane %v932_v35, %v14271_v14 }
 0x41b   : > { %v11418_v5 = vcombine.low %v11410_v4, %v11417_v6  ;;  %v11419_v10 = vcombine.low %v9184_v62, %v9186_v1  ;;  %v11420_v11 = vcombine.low %v9225_v59, %v9227_v7  ;;  %v4383_v7 = vrot.slane %v932_v35, %v14268_v8 }
 0x41c   : > { %v4387_v9 = vrot.slane %v932_v35, %v14273_v15 }
 0x41d   : > { %11688 = vst [vmem:[%s14347_s6 + $0xd0] sm:$0xff] %v11418_v5  ;;  %v11429_v21 = vrot.slane %v11419_v10, %v14275_v17  ;;  %v11436_v12 = vrot.slane %v11420_v11, %v14275_v17  ;;  %v4395_v5 = vrot.slane %v932_v35, %v14278_v23 }
 0x41f   : > { %v11451_v27 = vcombine.low %v11429_v21, %v11436_v12  ;;  %v9265_v24 = vpop.f32.mrb[220].mxu1  ;;  %v9306_v20 = vpop.f32.mrb[224].mxu0 }
 0x420   : > { %v9266_v25 = vadd.f32 %v9265_v24, %v4351_v13  ;;  %v9307_v26 = vadd.f32 %v9306_v20, %v4359_v19  ;;  %v9267_v29 = vpop.f32.mrb[221].mxu1  ;;  %v9308_v31 = vpop.f32.mrb[225].mxu0 }
 0x421   : > { %v9268_v33 = vadd.f32 %v9267_v29, %v4355_v22  ;;  %v9309_v28 = vadd.f32 %v9308_v31, %v4363_v16  ;;  %v9269_v34 = vpop.f32.mrb[222].mxu1  ;;  %v9310_v30 = vpop.f32.mrb[226].mxu0  ;;  %v11459_v60 = vrot.slane %v11451_v27, %v14275_v17 }
 0x422   : > { %v9270_v32 = vpop.f32.mrb[223].mxu1  ;;  %v9311_v36 = vpop.f32.mrb[227].mxu0 }
 0x423   : > { %v11421_v37 = vcombine.low %v9266_v25, %v9268_v33  ;;  %v11422_v39 = vcombine.low %v9307_v26, %v9309_v28  ;;  %v933_v25 = vld [vmem:[%s14239_s3 + $0xe8] sm:$0xff] }
 0x424   : > { %v4399_v28 = vrot.slane %v933_v25, %v14232_v51  ;;  %v4407_v34 = vrot.slane %v933_v25, %v14234_v52  ;;  %v4403_v32 = vrot.slane %v933_v25, %v14244_v55  ;;  %v4411_v36 = vrot.slane %v933_v25, %v14246_v58 }
 0x425   : > { %v11443_v38 = vrot.slane %v11421_v37, %v14275_v17  ;;  %v11450_v45 = vrot.slane %v11422_v39, %v14275_v17 }
 0x427   : > { %v11452_v43 = vcombine.low %v11443_v38, %v11450_v45  ;;  %v9347_v47 = vpop.f32.mrb[224].mxu1  ;;  %v9388_v48 = vpop.f32.mrb[228].mxu0 }
 0x428   : > { %v9348_v50 = vadd.f32 %v9347_v47, %v4367_v42  ;;  %v9389_v54 = vadd.f32 %v9388_v48, %v4375_v44  ;;  %v9349_v57 = vpop.f32.mrb[225].mxu1  ;;  %v9390_v49 = vpop.f32.mrb[229].mxu0 }
 0x429   : > { %v11466_v53 = vrot.slane %v11452_v43, %v14275_v17  ;;  %v9350_v61 = vadd.f32 %v9349_v57, %v4371_v41  ;;  %v9391_v56 = vadd.f32 %v9390_v49, %v4379_v46  ;;  %v9351_v62 = vpop.f32.mrb[226].mxu1  ;;  %v9392_v59 = vpop.f32.mrb[230].mxu0 }
 0x42a   : > { %v9352_v0 = vpop.f32.mrb[227].mxu1  ;;  %v9393_v2 = vpop.f32.mrb[231].mxu0  ;;  %v4423_v62 = vrot.slane %v933_v25, %v14271_v14 }
 0x42b   : > { %v11467_v4 = vcombine.low %v11459_v60, %v11466_v53  ;;  %v11468_v6 = vcombine.low %v9348_v50, %v9350_v61  ;;  %v11469_v1 = vcombine.low %v9389_v54, %v9391_v56  ;;  %v4415_v56 = vrot.slane %v933_v25, %v14268_v8 }
 0x42c   : > { %v4419_v2 = vrot.slane %v933_v25, %v14273_v15 }
 0x42d   : > { %11689 = vst [vmem:[%s14347_s6 + $0xd8] sm:$0xff] %v11467_v4  ;;  %v11478_v18 = vrot.slane %v11468_v6, %v14275_v17  ;;  %v11485_v3 = vrot.slane %v11469_v1, %v14275_v17  ;;  %v4427_v4 = vrot.slane %v933_v25, %v14278_v23 }
 0x42f   : > { %v11500_v10 = vcombine.low %v11478_v18, %v11485_v3  ;;  %v9429_v11 = vpop.f32.mrb[228].mxu1  ;;  %v9470_v13 = vpop.f32.mrb[232].mxu0 }
 0x430   : > { %v9430_v19 = vadd.f32 %v9429_v11, %v4383_v7  ;;  %v9471_v21 = vadd.f32 %v9470_v13, %v4391_v63  ;;  %v9431_v12 = vpop.f32.mrb[229].mxu1  ;;  %v9472_v22 = vpop.f32.mrb[233].mxu0 }
 0x431   : > { %v9432_v16 = vadd.f32 %v9431_v12, %v4387_v9  ;;  %v9473_v27 = vadd.f32 %v9472_v22, %v4395_v5  ;;  %v9433_v24 = vpop.f32.mrb[230].mxu1  ;;  %v9474_v20 = vpop.f32.mrb[234].mxu0  ;;  %v11508_v46 = vrot.slane %v11500_v10, %v14275_v17 }
 0x432   : > { %v9434_v26 = vpop.f32.mrb[231].mxu1  ;;  %v9475_v29 = vpop.f32.mrb[235].mxu0 }
 0x433   : > { %v11470_v31 = vcombine.low %v9430_v19, %v9432_v16  ;;  %v11471_v33 = vcombine.low %v9471_v21, %v9473_v27  ;;  %v934_v19 = vld [vmem:[%s14239_s3 + $0xf0] sm:$0xff] }
 0x434   : > { %v4431_v27 = vrot.slane %v934_v19, %v14232_v51  ;;  %v4439_v24 = vrot.slane %v934_v19, %v14234_v52  ;;  %v4435_v26 = vrot.slane %v934_v19, %v14244_v55  ;;  %v4443_v29 = vrot.slane %v934_v19, %v14246_v58 }
 0x435   : > { %v11492_v30 = vrot.slane %v11470_v31, %v14275_v17  ;;  %v11499_v35 = vrot.slane %v11471_v33, %v14275_v17 }
 0x437   : > { %v11501_v37 = vcombine.low %v11492_v30, %v11499_v35  ;;  %v9511_v39 = vpop.f32.mrb[232].mxu1  ;;  %v9552_v42 = vpop.f32.mrb[236].mxu0 }
 0x438   : > { %v9512_v44 = vadd.f32 %v9511_v39, %v4399_v28  ;;  %v9553_v38 = vadd.f32 %v9552_v42, %v4407_v34  ;;  %v9513_v45 = vpop.f32.mrb[233].mxu1  ;;  %v9554_v41 = vpop.f32.mrb[237].mxu0 }
 0x439   : > { %v11515_v43 = vrot.slane %v11501_v37, %v14275_v17  ;;  %v9514_v47 = vadd.f32 %v9513_v45, %v4403_v32  ;;  %v9555_v48 = vadd.f32 %v9554_v41, %v4411_v36  ;;  %v9515_v50 = vpop.f32.mrb[234].mxu1  ;;  %v9556_v54 = vpop.f32.mrb[238].mxu0 }
 0x43a   : > { %v9516_v57 = vpop.f32.mrb[235].mxu1  ;;  %v9557_v49 = vpop.f32.mrb[239].mxu0  ;;  %v4451_v54 = vrot.slane %v934_v19, %v14273_v15 }
 0x43b   : > { %v11516_v60 = vcombine.low %v11508_v46, %v11515_v43  ;;  %v11517_v53 = vcombine.low %v9512_v44, %v9514_v47  ;;  %v11518_v61 = vcombine.low %v9553_v38, %v9555_v48  ;;  %v4447_v43 = vrot.slane %v934_v19, %v14268_v8 }
 0x43c   : > { %v4455_v47 = vrot.slane %v934_v19, %v14271_v14  ;;  %v4459_v57 = vrot.slane %v934_v19, %v14278_v23 }
 0x43d   : > { %11690 = vst [vmem:[%s14347_s6 + $0xe0] sm:$0xff] %v11516_v60  ;;  %v11527_v59 = vrot.slane %v11517_v53, %v14275_v17  ;;  %v11534_v0 = vrot.slane %v11518_v61, %v14275_v17 }
 0x43f   : > { %v11549_v6 = vcombine.low %v11527_v59, %v11534_v0  ;;  %v9593_v1 = vpop.f32.mrb[236].mxu1  ;;  %v9634_v7 = vpop.f32.mrb[240].mxu0 }
 0x440   : > { %v9594_v63 = vadd.f32 %v9593_v1, %v4415_v56  ;;  %v9635_v18 = vadd.f32 %v9634_v7, %v4423_v62  ;;  %v9595_v3 = vpop.f32.mrb[237].mxu1  ;;  %v9636_v9 = vpop.f32.mrb[241].mxu0 }
 0x441   : > { %v9596_v5 = vadd.f32 %v9595_v3, %v4419_v2  ;;  %v9637_v10 = vadd.f32 %v9636_v9, %v4427_v4  ;;  %v9597_v11 = vpop.f32.mrb[238].mxu1  ;;  %v9638_v13 = vpop.f32.mrb[242].mxu0  ;;  %v11557_v36 = vrot.slane %v11549_v6, %v14275_v17  ;;  %v935_v4 = vld [vmem:[%s14239_s3 + $0xf8] sm:$0x3] }
 0x442   : > { %v9598_v21 = vpop.f32.mrb[239].mxu1  ;;  %v9639_v12 = vpop.f32.mrb[243].mxu0  ;;  %v4463_v15 = vrot.slane %v935_v4, %v14232_v51  ;;  %v4467_v3 = vrot.slane %v935_v4, %v14244_v55 }
 0x443   : > { %v11519_v22 = vcombine.low %v9594_v63, %v9596_v5  ;;  %v11520_v16 = vcombine.low %v9635_v18, %v9637_v10 }
 0x445   : > { %v11541_v20 = vrot.slane %v11519_v22, %v14275_v17  ;;  %v11548_v25 = vrot.slane %v11520_v16, %v14275_v17 }
 0x447   : > { %v11550_v31 = vcombine.low %v11541_v20, %v11548_v25  ;;  %v9675_v33 = vpop.f32.mrb[240].mxu1  ;;  %v9716_v28 = vpop.f32.mrb[244].mxu0 }
 0x448   : > { %v9676_v34 = vadd.f32 %v9675_v33, %v4431_v27  ;;  %v9717_v30 = vadd.f32 %v9716_v28, %v4439_v24  ;;  %v9677_v35 = vpop.f32.mrb[241].mxu1  ;;  %v9718_v32 = vpop.f32.mrb[245].mxu0 }
 0x449   : > { %v11564_v52 = vrot.slane %v11550_v31, %v14275_v17  ;;  %v9678_v37 = vadd.f32 %v9677_v35, %v4435_v26  ;;  %v9719_v39 = vadd.f32 %v9718_v32, %v4443_v29  ;;  %v9679_v42 = vpop.f32.mrb[242].mxu1  ;;  %v9720_v44 = vpop.f32.mrb[246].mxu0 }
 0x44a   : > { %v9680_v38 = vpop.f32.mrb[243].mxu1  ;;  %v9721_v45 = vpop.f32.mrb[247].mxu0 }
 0x44b   : > { %v11565_v41 = vcombine.low %v11557_v36, %v11564_v52  ;;  %v11566_v58 = vcombine.low %v9676_v34, %v9678_v37  ;;  %v11567_v46 = vcombine.low %v9717_v30, %v9719_v39 }
 0x44d   : > { %11691 = vst [vmem:[%s14347_s6 + $0xe8] sm:$0xff] %v11565_v41  ;;  %v11576_v48 = vrot.slane %v11566_v58, %v14275_v17  ;;  %v11583_v50 = vrot.slane %v11567_v46, %v14275_v17 }
 0x44f   : > { %v11598_v49 = vcombine.low %v11576_v48, %v11583_v50  ;;  %v9757_v60 = vpop.f32.mrb[244].mxu1  ;;  %v9798_v53 = vpop.f32.mrb[248].mxu0 }
 0x450   : > { %v9758_v61 = vadd.f32 %v9757_v60, %v4447_v43  ;;  %v9799_v56 = vadd.f32 %v9798_v53, %v4455_v47  ;;  %v9759_v62 = vpop.f32.mrb[245].mxu1  ;;  %v9800_v59 = vpop.f32.mrb[249].mxu0 }
 0x451   : > { %v9760_v8 = vadd.f32 %v9759_v62, %v4451_v54  ;;  %v9801_v0 = vadd.f32 %v9800_v59, %v4459_v57  ;;  %v9761_v14 = vpop.f32.mrb[246].mxu1  ;;  %v9802_v2 = vpop.f32.mrb[250].mxu0  ;;  %v11606_v13 = vrot.slane %v11598_v49, %v14275_v17 }
 0x452   : > { %v9762_v6 = vpop.f32.mrb[247].mxu1  ;;  %v9803_v1 = vpop.f32.mrb[251].mxu0 }
 0x453   : > { %v11568_v7 = vcombine.low %v9758_v61, %v9760_v8  ;;  %v11569_v63 = vcombine.low %v9799_v56, %v9801_v0 }
 0x455   : > { %v11590_v23 = vrot.slane %v11568_v7, %v14275_v17  ;;  %v11597_v18 = vrot.slane %v11569_v63, %v14275_v17 }
 0x457   : > { %v11599_v9 = vcombine.low %v11590_v23, %v11597_v18  ;;  %v9839_v5 = vpop.f32.mrb[248].mxu1 }
 0x458   : > { %v9840_v10 = vadd.f32 %v9839_v5, %v4463_v15  ;;  %v9841_v11 = vpop.f32.mrb[249].mxu1 }
 0x459   : > { %v11613_v19 = vrot.slane %v11599_v9, %v14275_v17  ;;  %v9842_v21 = vadd.f32 %v9841_v11, %v4467_v3  ;;  %v9843_v51 = vpop.f32.mrb[250].mxu1 }
 0x45a   : > { %v9844_v12 = vpop.f32.mrb[251].mxu1 }
 0x45b   : > { %v11614_v22 = vcombine.low %v11606_v13, %v11613_v19  ;;  %v11615_v16 = vcombine.low %v9840_v10, %v9842_v21 }
 0x45d   : > { %11692 = vst [vmem:[%s14347_s6 + $0xf0] sm:$0xff] %v11614_v22  ;;  %v11622_v55 = vrot.slane %v11615_v16, %v14275_v17 }
 0x45f   : > { %v11629_v27 = vrot.slane %v11622_v55, %v14275_v17 }
 0x461   : > { %11697 = vst.msk [vmem:[%s14347_s6 + $0xf8] sm:$0x3] %vm11695_vm2, %v11629_v27 }
 0x462   : > { %13503 = shalt.err (!%p13500_p6)
}
 0x463   : > { %s13504_s27 = scalar_lea.hbm %s15443_s16, 4000  ;;  %s13508_s17 = scalar_lea.hbm %s15492_s5, 44000 }
 0x464   : > { %p13505_p1 = scmp.ne.s32.totalorder %s15443_s16, %s13504_s27  ;;  %p13509_p11 = scmp.lt.u32.totalorder %s15443_s16, %s15492_s5 }
 0x465   : > { %p13510_p13 = scmp.lt.u32.totalorder %s13508_s17, %s13504_s27  ;;  %p13512_p8 = scmp.lt.u32.totalorder %s13504_s27, %s15443_s16 }
 0x466   : > { %p13506_p0 = pnand %p13505_p1, %p15531_p9 }
 0x467   : > { %p13511_p3 = por %p13510_p13, %p13509_p11 }
 0x468   : > { %p13507_p5 = pneg %p13506_p0 }
 0x469   : > { %p13513_p12 = por %p13512_p8, %p13511_p3 }
 0x46b   : > { %p13514_p7 = pnand %p13513_p12, %p13507_p5 }
 0x46d   : > { %13517 = shalt.err (!%p13514_p7)
}
 0x46e   : > { %12520 = dma.vmem_to_hbm [thread:$0]  (%p15531_p9), %s15445_s10, 4000, %s15443_s16, %s11699_s22  }
 0x46f PF: > { %s15532_s7 = sld [smem:[#allocation18_spill]]  ;;  %p12550_p10 = scmp.ge.s32.totalorder %s13564_s21, 2 }
 0x470   : > { %s11725_s12 = sand.u32 1, %s13552_s18  }
 0x471   : > { %s11726_s1 = scalar_lea.sflag [#allocation4], %s11725_s12 }
 0x475   : > { %p15533_p2 = scmp.ne.s32.totalorder %s15532_s7, 0 }
 0x477   : > { %p12540_p4 = pnand %p12550_p10, %p15533_p2 }
 0x479   : > { %13547 = dma.done.wait (!%p12540_p4), %s11726_s1, 4000  }
 0x47a   : > { %13549 = vsyncadd (!%p12540_p4), %s11726_s1, 4294963296  ;;  %s15534_s21 = sld [smem:[#allocation16_spill]]  ;;  %s15535_s29 = sld [smem:[#allocation17_spill]] }
 0x47b   : > { %s15536_s18 = smov %s13556_s19  ;;  %s15537_s19 = smov %s13560_s20 }
 0x480   : > { %p20_p6 = scmp.ge.s32.totalorder %s15534_s21, 13   ;;  %s15538_s20 = smov %s15535_s29 }
 0x482   :  { %22 = sbr.rel (!%p20_p6) target bundleno = 10 (0xa), region = 109 }
 0x489   :  { %11731 = vsyncpa [#allocation3], 1 }
 0x48a   :  { %11733 = vsyncpa [#allocation3 + $0x1], 1 }
 0x48b   :  { %11734 = vsyncpa [#allocation6], 1 }
 0x48c   :  { %11735 = vsyncpa [#allocation9], 1 }
 0x48d   :  { %11737 = vsyncpa [#allocation9 + $0x1], 1 }
 0x48e   :  { %11738 = vsyncpa [#allocation4], 1 }
 0x48f   :  { %11740 = vsyncpa [#allocation4 + $0x1], 1 }

</bundles_post_ra>
